<compile_context>
chip_gen: v7x
topology: tpu7x:2x2x1
jax: 0.10.0
libtpu: 0.0.40
codegen_flags: <defaults>
</compile_context>

<pallas_src>
import numpy as np
import jax
import jax.numpy as jnp
from jax.experimental import pallas as pl
from jax.experimental.pallas import tpu as pltpu


# ---------------------------------------------------------------------------
# Fused 2-layer bidirectional LSTM kernel (one grid step per modality)
# ---------------------------------------------------------------------------

def _fused_lstm_kernel(
    x_ref,                                               # (1, T, B, Dp)
    w1f_ih_ref, w1f_hh_ref, b1f_ref,                     # layer 1 forward
    w1b_ih_ref, w1b_hh_ref, b1b_ref,                     # layer 1 backward
    w2f_ihf_ref, w2f_ihb_ref, w2f_hh_ref, b2f_ref,       # layer 2 forward
    w2b_ihf_ref, w2b_ihb_ref, b2b_ref,                   # layer 2 backward
    out_ref,                                             # (1, B, 2H)
):
    f32 = jnp.float32
    T = x_ref.shape[1]
    B = x_ref.shape[2]
    H = w1f_hh_ref.shape[1]

    # Hoist all weight loads / bias broadcasts out of the unrolled loops.
    w1f_ih = w1f_ih_ref[0]
    w1f_hh = w1f_hh_ref[0]
    w1b_ih = w1b_ih_ref[0]
    w1b_hh = w1b_hh_ref[0]
    w2f_ihf = w2f_ihf_ref[0]
    w2f_ihb = w2f_ihb_ref[0]
    w2f_hh = w2f_hh_ref[0]
    w2b_ihf = w2b_ihf_ref[0]
    w2b_ihb = w2b_ihb_ref[0]

    b1f = jnp.broadcast_to(b1f_ref[0], (B, 4 * H))
    b1b = jnp.broadcast_to(b1b_ref[0], (B, 4 * H))
    b2f = jnp.broadcast_to(b2f_ref[0], (B, 4 * H))
    b2b = jnp.broadcast_to(b2b_ref[0], (B, 4 * H))

    zeros = jnp.zeros((B, H), f32)

    def cell(gates, c):
        # Whole-vreg activations (2 EUP pushes), then static lane slices.
        sig = jax.nn.sigmoid(gates)
        th = jnp.tanh(gates)
        i = sig[:, 0:H]
        f = sig[:, H:2 * H]
        g = th[:, 2 * H:3 * H]
        o = sig[:, 3 * H:4 * H]
        c_new = f * c + i * g
        h_new = o * jnp.tanh(c_new)
        return h_new, c_new

    # ---- layer 1, forward direction (keep all timestep outputs in vregs) --
    h, c = zeros, zeros
    h1f = []
    for t in range(T):
        x_t = x_ref[0, t]                                  # (B, Dp)
        gates = (jnp.dot(x_t, w1f_ih, preferred_element_type=f32)
                 + jnp.dot(h, w1f_hh, preferred_element_type=f32) + b1f)
        h, c = cell(gates, c)
        h1f.append(h)

    # ---- layer 1, backward direction ---------------------------------------
    h, c = zeros, zeros
    h1b = [None] * T
    for s in range(T):
        t = T - 1 - s
        x_t = x_ref[0, t]
        gates = (jnp.dot(x_t, w1b_ih, preferred_element_type=f32)
                 + jnp.dot(h, w1b_hh, preferred_element_type=f32) + b1b)
        h, c = cell(gates, c)
        h1b[t] = h

    # ---- layer 2, forward direction: only the final hidden state is used --
    h, c = zeros, zeros
    for t in range(T):
        gates = (jnp.dot(h1f[t], w2f_ihf, preferred_element_type=f32)
                 + jnp.dot(h1b[t], w2f_ihb, preferred_element_type=f32)
                 + jnp.dot(h, w2f_hh, preferred_element_type=f32) + b2f)
        h, c = cell(gates, c)
    h2f_last = h

    # ---- layer 2, backward direction: out[-1] = single step from zero state
    gates = (jnp.dot(h1f[T - 1], w2b_ihf, preferred_element_type=f32)
             + jnp.dot(h1b[T - 1], w2b_ihb, preferred_element_type=f32) + b2b)
    h2b_last, _ = cell(gates, zeros)

    out_ref[0] = jnp.concatenate([h2f_last, h2b_last], axis=-1)


def fused_bidir_lstm(x_stacked, weights):
    """x_stacked: (2, T, B, Dp).  Returns (2, B, 2H) = last-step bidir output."""
    M, T, B, Dp = x_stacked.shape
    H = weights[1].shape[1]                                # w1f_hh: (2, H, 4H)

    w_specs = [pl.BlockSpec((1,) + w.shape[1:], lambda m: (m, 0, 0))
               for w in weights]

    return pl.pallas_call(
        _fused_lstm_kernel,
        out_shape=jax.ShapeDtypeStruct((M, B, 2 * H), jnp.float32),
        grid_spec=pltpu.PrefetchScalarGridSpec(
            num_scalar_prefetch=0,
            grid=(M,),
            in_specs=[pl.BlockSpec((1, T, B, Dp),
                                   lambda m: (m, 0, 0, 0))] + w_specs,
            out_specs=pl.BlockSpec((1, B, 2 * H), lambda m: (m, 0, 0)),
        ),
        compiler_params=pltpu.CompilerParams(
            dimension_semantics=("parallel",)),          # 2 TCs on v7x
    )(x_stacked, *weights)


# ---------------------------------------------------------------------------
# MLP head kernel (fc1 weight pre-split per modality -> no concat glue)
# ---------------------------------------------------------------------------

def _mlp_kernel(y_ref, w1i_ref, w1m_ref, b1_ref, w2_ref, b2_ref, out_ref):
    h = (jnp.dot(y_ref[0], w1i_ref[...], preferred_element_type=jnp.float32)
         + jnp.dot(y_ref[1], w1m_ref[...], preferred_element_type=jnp.float32)
         + b1_ref[...])
    h = jnp.maximum(h, 0.0)                                # ReLU
    out_ref[...] = (jnp.dot(h, w2_ref[...], preferred_element_type=jnp.float32)
                    + b2_ref[...]).astype(out_ref.dtype)


def mlp_head(y, w1i, w1m, b1, w2, b2):
    B = y.shape[1]
    C = w2.shape[1]
    return pl.pallas_call(
        _mlp_kernel,
        out_shape=jax.ShapeDtypeStruct((B, C), jnp.float32),
    )(y, w1i, w1m, b1, w2, b2)


# ---------------------------------------------------------------------------
# Model glue
# ---------------------------------------------------------------------------

def classifier_forward(x_insole, x_mocap, packed):
    lstm_w = packed["lstm"]
    d_pad = lstm_w[0].shape[1]                             # w1f_ih: (2, Dp, 4H)

    def prep(x):                                           # (B,T,D) -> (T,B,Dp)
        x = jnp.pad(x, ((0, 0), (0, 0), (0, d_pad - x.shape[-1])))
        return jnp.transpose(x, (1, 0, 2))

    x = jnp.stack([prep(x_insole), prep(x_mocap)], axis=0)  # (2,T,B,Dp)
    lstm_out = fused_bidir_lstm(x, lstm_w)                   # (2,B,2H)
    return mlp_head(lstm_out, *packed["fc"])                 # (B,num_classes)


# ---------------------------------------------------------------------------
# Parameter init (PyTorch layout) + packing for the fused kernel
# ---------------------------------------------------------------------------

def init_lstm_params(key, input_size, hidden, num_layers=2):
    params = []
    s = 1.0 / np.sqrt(hidden)
    for layer in range(num_layers):
        d_in = input_size if layer == 0 else 2 * hidden
        dirs = []
        for _ in range(2):  # forward, backward
            key, k1, k2, k3, k4 = jax.random.split(key, 5)
            w_ih = jax.random.uniform(k1, (4 * hidden, d_in), jnp.float32, -s, s)
            w_hh = jax.random.uniform(k2, (4 * hidden, hidden), jnp.float32, -s, s)
            b_ih = jax.random.uniform(k3, (4 * hidden,), jnp.float32, -s, s)
            b_hh = jax.random.uniform(k4, (4 * hidden,), jnp.float32, -s, s)
            dirs.append((w_ih.T, w_hh.T, (b_ih + b_hh)[None, :]))
        params.append(tuple(dirs))
    return params, key


def init_params(key, insole_in, mocap_in, hidden, num_classes):
    lstm_ins, key = init_lstm_params(key, insole_in, hidden)
    lstm_moc, key = init_lstm_params(key, mocap_in, hidden)
    key, k1, k2, k3, k4 = jax.random.split(key, 5)
    fc_hidden = 256
    s1 = 1.0 / np.sqrt(4 * hidden)
    s2 = 1.0 / np.sqrt(fc_hidden)
    w1 = jax.random.uniform(k1, (fc_hidden, 4 * hidden), jnp.float32, -s1, s1)
    b1 = jax.random.uniform(k2, (fc_hidden,), jnp.float32, -s1, s1)
    w2 = jax.random.uniform(k3, (num_classes, fc_hidden), jnp.float32, -s2, s2)
    b2 = jax.random.uniform(k4, (num_classes,), jnp.float32, -s2, s2)
    fc = (w1.T, b1[None, :], w2.T, b2[None, :])
    return {"lstm_insole": lstm_ins, "lstm_mocap": lstm_moc, "fc": fc}


def pack_params(params, d_pad):
    """Stack both modalities' LSTM weights on a leading axis of size 2."""
    ins = params["lstm_insole"]
    moc = params["lstm_mocap"]
    H = ins[0][0][1].shape[0]

    def pad_ih(w):  # (Din, 4H) -> (d_pad, 4H), zero rows for padded features
        return jnp.pad(w, ((0, d_pad - w.shape[0]), (0, 0)))

    def stack(f):
        return jnp.stack([f(ins), f(moc)], axis=0)

    lstm = [
        # layer 1 forward: W_ih^T (padded), W_hh^T, bias
        stack(lambda p: pad_ih(p[0][0][0])),
        stack(lambda p: p[0][0][1]),
        stack(lambda p: p[0][0][2]),
        # layer 1 backward
        stack(lambda p: pad_ih(p[0][1][0])),
        stack(lambda p: p[0][1][1]),
        stack(lambda p: p[0][1][2]),
        # layer 2 forward: W_ih^T split into fwd-input / bwd-input halves
        stack(lambda p: p[1][0][0][:H]),
        stack(lambda p: p[1][0][0][H:]),
        stack(lambda p: p[1][0][1]),
        stack(lambda p: p[1][0][2]),
        # layer 2 backward (recurrent weight unused for last-step output)
        stack(lambda p: p[1][1][0][:H]),
        stack(lambda p: p[1][1][0][H:]),
        stack(lambda p: p[1][1][2]),
    ]

    w1_t, b1, w2_t, b2 = params["fc"]
    fc = (w1_t[:2 * H], w1_t[2 * H:], b1, w2_t, b2)
    return {"lstm": lstm, "fc": fc}


# ---------------------------------------------------------------------------
# Pure-JAX reference (PyTorch semantics) for the sanity check
# ---------------------------------------------------------------------------

def _ref_lstm_dir(x_tbd, w_ih_t, w_hh_t, b, reverse):
    T, B, _ = x_tbd.shape
    H = w_hh_t.shape[0]
    xs = x_tbd[::-1] if reverse else x_tbd

    def step(carry, x_t):
        h, c = carry
        gates = x_t @ w_ih_t + h @ w_hh_t + b
        i = jax.nn.sigmoid(gates[:, :H])
        f = jax.nn.sigmoid(gates[:, H:2 * H])
        g = jnp.tanh(gates[:, 2 * H:3 * H])
        o = jax.nn.sigmoid(gates[:, 3 * H:])
        c_new = f * c + i * g
        h_new = o * jnp.tanh(c_new)
        return (h_new, c_new), h_new

    init = (jnp.zeros((B, H), jnp.float32), jnp.zeros((B, H), jnp.float32))
    _, hs = jax.lax.scan(step, init, xs)
    return hs[::-1] if reverse else hs


def _ref_forward(x_insole, x_mocap, params):
    def bidir(x_btd, layers):
        x = jnp.transpose(x_btd, (1, 0, 2))
        for (fwd, bwd) in layers:
            h_f = _ref_lstm_dir(x, *fwd, reverse=False)
            h_b = _ref_lstm_dir(x, *bwd, reverse=True)
            x = jnp.concatenate([h_f, h_b], axis=-1)
        return x

    a = bidir(x_insole, params["lstm_insole"])[-1]
    b = bidir(x_mocap, params["lstm_mocap"])[-1]
    combined = jnp.concatenate([a, b], axis=1)
    w1_t, b1, w2_t, b2 = params["fc"]
    h = jnp.maximum(combined @ w1_t + b1, 0.0)
    return h @ w2_t + b2


# ---------------------------------------------------------------------------
# Main
# ---------------------------------------------------------------------------

if __name__ == "__main__":
    # Small shapes consistent with the module signature.
    B, T = 2, 8
    INSOLE_IN, MOCAP_IN = 8, 12
    HIDDEN, NUM_CLASSES = 32, 13

    key = jax.random.PRNGKey(0)
    key, kx1, kx2, kp = jax.random.split(key, 4)
    x_insole = jax.random.normal(kx1, (B, T, INSOLE_IN), jnp.float32)
    x_mocap = jax.random.normal(kx2, (B, T, MOCAP_IN), jnp.float32)

    params = init_params(kp, INSOLE_IN, MOCAP_IN, HIDDEN, NUM_CLASSES)
    packed = pack_params(params, d_pad=max(INSOLE_IN, MOCAP_IN))

    fwd = jax.jit(classifier_forward)
    logits = jax.block_until_ready(fwd(x_insole, x_mocap, packed))
    assert logits.shape == (B, NUM_CLASSES)

    # Numerical sanity check vs. pure-JAX reference.
    ref = jax.block_until_ready(_ref_forward(x_insole, x_mocap, params))
    if not np.allclose(np.asarray(logits), np.asarray(ref), atol=5e-2, rtol=5e-2):
        raise RuntimeError("Pallas kernel output deviates from reference")

    print("KERNEL_OK")
</pallas_src>

<mosaic_0001>
module attributes {stable_mosaic.version = 11 : i64} {
  func.func @_mlp_kernel(%arg0: memref<2x2x64xf32, #tpu.memory_space<vmem>>, %arg1: memref<64x256xf32, #tpu.memory_space<vmem>>, %arg2: memref<64x256xf32, #tpu.memory_space<vmem>>, %arg3: memref<1x256xf32, #tpu.memory_space<vmem>>, %arg4: memref<256x13xf32, #tpu.memory_space<vmem>>, %arg5: memref<1x13xf32, #tpu.memory_space<vmem>>, %arg6: memref<2x13xf32, #tpu.memory_space<vmem>>) attributes {dimension_semantics = [], scalar_prefetch = 0 : i64, scratch_operands = 0 : i64, tpu.core_type = #tpu.core_type<tc>} {
    %c0 = arith.constant 0 : index
    %c0_0 = arith.constant 0 : index
    %c0_1 = arith.constant 0 : index
    %0 = vector.load %arg0[%c0, %c0_0, %c0_1] : memref<2x2x64xf32, #tpu.memory_space<vmem>>, vector<1x2x64xf32>
    %1 = vector.shape_cast %0 : vector<1x2x64xf32> to vector<2x64xf32>
    %c0_2 = arith.constant 0 : index
    %c0_3 = arith.constant 0 : index
    %2 = vector.load %arg1[%c0_2, %c0_3] : memref<64x256xf32, #tpu.memory_space<vmem>>, vector<64x256xf32>
    %cst = arith.constant dense<0.000000e+00> : vector<2x256xf32>
    %3 = tpu.matmul %1, %2, %cst {dimension_numbers = #tpu.dot_dimension_numbers<[1], [0], [0], [1], [0, 0, 1, 1], [], []>} : vector<2x64xf32>, vector<64x256xf32>, vector<2x256xf32> -> vector<2x256xf32>
    %c1 = arith.constant 1 : index
    %c0_4 = arith.constant 0 : index
    %c0_5 = arith.constant 0 : index
    %4 = vector.load %arg0[%c1, %c0_4, %c0_5] : memref<2x2x64xf32, #tpu.memory_space<vmem>>, vector<1x2x64xf32>
    %5 = vector.shape_cast %4 : vector<1x2x64xf32> to vector<2x64xf32>
    %c0_6 = arith.constant 0 : index
    %c0_7 = arith.constant 0 : index
    %6 = vector.load %arg2[%c0_6, %c0_7] : memref<64x256xf32, #tpu.memory_space<vmem>>, vector<64x256xf32>
    %cst_8 = arith.constant dense<0.000000e+00> : vector<2x256xf32>
    %7 = tpu.matmul %5, %6, %cst_8 {dimension_numbers = #tpu.dot_dimension_numbers<[1], [0], [0], [1], [0, 0, 1, 1], [], []>} : vector<2x64xf32>, vector<64x256xf32>, vector<2x256xf32> -> vector<2x256xf32>
    %8 = arith.addf %3, %7 : vector<2x256xf32>
    %c0_9 = arith.constant 0 : index
    %c0_10 = arith.constant 0 : index
    %9 = vector.load %arg3[%c0_9, %c0_10] : memref<1x256xf32, #tpu.memory_space<vmem>>, vector<1x256xf32>
    %10 = vector.broadcast %9 : vector<1x256xf32> to vector<2x256xf32>
    %11 = arith.addf %8, %10 : vector<2x256xf32>
    %cst_11 = arith.constant 0.000000e+00 : f32
    %12 = vector.broadcast %cst_11 : f32 to vector<2x256xf32>
    %13 = arith.maximumf %11, %12 : vector<2x256xf32>
    %c0_12 = arith.constant 0 : index
    %c0_13 = arith.constant 0 : index
    %14 = vector.load %arg4[%c0_12, %c0_13] : memref<256x13xf32, #tpu.memory_space<vmem>>, vector<256x13xf32>
    %cst_14 = arith.constant dense<0.000000e+00> : vector<2x13xf32>
    %15 = tpu.matmul %13, %14, %cst_14 {dimension_numbers = #tpu.dot_dimension_numbers<[1], [0], [0], [1], [0, 0, 1, 1], [], []>} : vector<2x256xf32>, vector<256x13xf32>, vector<2x13xf32> -> vector<2x13xf32>
    %c0_15 = arith.constant 0 : index
    %c0_16 = arith.constant 0 : index
    %16 = vector.load %arg5[%c0_15, %c0_16] : memref<1x13xf32, #tpu.memory_space<vmem>>, vector<1x13xf32>
    %17 = vector.broadcast %16 : vector<1x13xf32> to vector<2x13xf32>
    %18 = arith.addf %15, %17 : vector<2x13xf32>
    %c0_17 = arith.constant 0 : index
    %c0_18 = arith.constant 0 : index
    %19 = vector.load %arg6[%c0_17, %c0_18] : memref<2x13xf32, #tpu.memory_space<vmem>>, vector<2x13xf32>
    tpu.vector_store %arg6[%c0_17, %c0_18], %18 {strides = array<i32>} : memref<2x13xf32, #tpu.memory_space<vmem>>, vector<2x13xf32>,
    return
  }
}

module attributes {stable_mosaic.version = 11 : i64} {
  func.func @_fused_lstm_kernel(%arg0: i32, %arg1: memref<1x8x2x12xf32, #tpu.memory_space<vmem>>, %arg2: memref<1x12x128xf32, #tpu.memory_space<vmem>>, %arg3: memref<1x32x128xf32, #tpu.memory_space<vmem>>, %arg4: memref<1x1x128xf32, #tpu.memory_space<vmem>>, %arg5: memref<1x12x128xf32, #tpu.memory_space<vmem>>, %arg6: memref<1x32x128xf32, #tpu.memory_space<vmem>>, %arg7: memref<1x1x128xf32, #tpu.memory_space<vmem>>, %arg8: memref<1x32x128xf32, #tpu.memory_space<vmem>>, %arg9: memref<1x32x128xf32, #tpu.memory_space<vmem>>, %arg10: memref<1x32x128xf32, #tpu.memory_space<vmem>>, %arg11: memref<1x1x128xf32, #tpu.memory_space<vmem>>, %arg12: memref<1x32x128xf32, #tpu.memory_space<vmem>>, %arg13: memref<1x32x128xf32, #tpu.memory_space<vmem>>, %arg14: memref<1x1x128xf32, #tpu.memory_space<vmem>>, %arg15: memref<1x2x64xf32, #tpu.memory_space<vmem>>) attributes {dimension_semantics = [#tpu.dimension_semantics<parallel>], iteration_bounds = array<i64: 2>, scalar_prefetch = 0 : i64, scratch_operands = 0 : i64, tpu.core_type = #tpu.core_type<tc>, window_params = [{transform_indices = @transform_0, window_bounds = array<i64: 1, 8, 2, 12>}, {transform_indices = @transform_1, window_bounds = array<i64: 1, 12, 128>}, {transform_indices = @transform_2, window_bounds = array<i64: 1, 32, 128>}, {transform_indices = @transform_3, window_bounds = array<i64: 1, 1, 128>}, {transform_indices = @transform_4, window_bounds = array<i64: 1, 12, 128>}, {transform_indices = @transform_5, window_bounds = array<i64: 1, 32, 128>}, {transform_indices = @transform_6, window_bounds = array<i64: 1, 1, 128>}, {transform_indices = @transform_7, window_bounds = array<i64: 1, 32, 128>}, {transform_indices = @transform_8, window_bounds = array<i64: 1, 32, 128>}, {transform_indices = @transform_9, window_bounds = array<i64: 1, 32, 128>}, {transform_indices = @transform_10, window_bounds = array<i64: 1, 1, 128>}, {transform_indices = @transform_11, window_bounds = array<i64: 1, 32, 128>}, {transform_indices = @transform_12, window_bounds = array<i64: 1, 32, 128>}, {transform_indices = @transform_13, window_bounds = array<i64: 1, 1, 128>}, {transform_indices = @transform_14, window_bounds = array<i64: 1, 2, 64>}]} {
    %c0 = arith.constant 0 : index
    %c0_0 = arith.constant 0 : index
    %c0_1 = arith.constant 0 : index
    %0 = vector.load %arg2[%c0, %c0_0, %c0_1] : memref<1x12x128xf32, #tpu.memory_space<vmem>>, vector<1x12x128xf32>
    %1 = vector.shape_cast %0 : vector<1x12x128xf32> to vector<12x128xf32>
    %c0_2 = arith.constant 0 : index
    %c0_3 = arith.constant 0 : index
    %c0_4 = arith.constant 0 : index
    %2 = vector.load %arg3[%c0_2, %c0_3, %c0_4] : memref<1x32x128xf32, #tpu.memory_space<vmem>>, vector<1x32x128xf32>
    %3 = vector.shape_cast %2 : vector<1x32x128xf32> to vector<32x128xf32>
    %c0_5 = arith.constant 0 : index
    %c0_6 = arith.constant 0 : index
    %c0_7 = arith.constant 0 : index
    %4 = vector.load %arg5[%c0_5, %c0_6, %c0_7] : memref<1x12x128xf32, #tpu.memory_space<vmem>>, vector<1x12x128xf32>
    %5 = vector.shape_cast %4 : vector<1x12x128xf32> to vector<12x128xf32>
    %c0_8 = arith.constant 0 : index
    %c0_9 = arith.constant 0 : index
    %c0_10 = arith.constant 0 : index
    %6 = vector.load %arg6[%c0_8, %c0_9, %c0_10] : memref<1x32x128xf32, #tpu.memory_space<vmem>>, vector<1x32x128xf32>
    %7 = vector.shape_cast %6 : vector<1x32x128xf32> to vector<32x128xf32>
    %c0_11 = arith.constant 0 : index
    %c0_12 = arith.constant 0 : index
    %c0_13 = arith.constant 0 : index
    %8 = vector.load %arg8[%c0_11, %c0_12, %c0_13] : memref<1x32x128xf32, #tpu.memory_space<vmem>>, vector<1x32x128xf32>
    %9 = vector.shape_cast %8 : vector<1x32x128xf32> to vector<32x128xf32>
    %c0_14 = arith.constant 0 : index
    %c0_15 = arith.constant 0 : index
    %c0_16 = arith.constant 0 : index
    %10 = vector.load %arg9[%c0_14, %c0_15, %c0_16] : memref<1x32x128xf32, #tpu.memory_space<vmem>>, vector<1x32x128xf32>
    %11 = vector.shape_cast %10 : vector<1x32x128xf32> to vector<32x128xf32>
    %c0_17 = arith.constant 0 : index
    %c0_18 = arith.constant 0 : index
    %c0_19 = arith.constant 0 : index
    %12 = vector.load %arg10[%c0_17, %c0_18, %c0_19] : memref<1x32x128xf32, #tpu.memory_space<vmem>>, vector<1x32x128xf32>
    %13 = vector.shape_cast %12 : vector<1x32x128xf32> to vector<32x128xf32>
    %c0_20 = arith.constant 0 : index
    %c0_21 = arith.constant 0 : index
    %c0_22 = arith.constant 0 : index
    %14 = vector.load %arg12[%c0_20, %c0_21, %c0_22] : memref<1x32x128xf32, #tpu.memory_space<vmem>>, vector<1x32x128xf32>
    %15 = vector.shape_cast %14 : vector<1x32x128xf32> to vector<32x128xf32>
    %c0_23 = arith.constant 0 : index
    %c0_24 = arith.constant 0 : index
    %c0_25 = arith.constant 0 : index
    %16 = vector.load %arg13[%c0_23, %c0_24, %c0_25] : memref<1x32x128xf32, #tpu.memory_space<vmem>>, vector<1x32x128xf32>
    %17 = vector.shape_cast %16 : vector<1x32x128xf32> to vector<32x128xf32>
    %c0_26 = arith.constant 0 : index
    %c0_27 = arith.constant 0 : index
    %c0_28 = arith.constant 0 : index
    %18 = vector.load %arg4[%c0_26, %c0_27, %c0_28] : memref<1x1x128xf32, #tpu.memory_space<vmem>>, vector<1x1x128xf32>
    %19 = vector.shape_cast %18 : vector<1x1x128xf32> to vector<1x128xf32>
    %20 = vector.shape_cast %19 : vector<1x128xf32> to vector<1x128xf32>
    %21 = vector.broadcast %20 : vector<1x128xf32> to vector<2x128xf32>
    %c0_29 = arith.constant 0 : index
    %c0_30 = arith.constant 0 : index
    %c0_31 = arith.constant 0 : index
    %22 = vector.load %arg7[%c0_29, %c0_30, %c0_31] : memref<1x1x128xf32, #tpu.memory_space<vmem>>, vector<1x1x128xf32>
    %23 = vector.shape_cast %22 : vector<1x1x128xf32> to vector<1x128xf32>
    %24 = vector.shape_cast %23 : vector<1x128xf32> to vector<1x128xf32>
    %25 = vector.broadcast %24 : vector<1x128xf32> to vector<2x128xf32>
    %c0_32 = arith.constant 0 : index
    %c0_33 = arith.constant 0 : index
    %c0_34 = arith.constant 0 : index
    %26 = vector.load %arg11[%c0_32, %c0_33, %c0_34] : memref<1x1x128xf32, #tpu.memory_space<vmem>>, vector<1x1x128xf32>
    %27 = vector.shape_cast %26 : vector<1x1x128xf32> to vector<1x128xf32>
    %28 = vector.shape_cast %27 : vector<1x128xf32> to vector<1x128xf32>
    %29 = vector.broadcast %28 : vector<1x128xf32> to vector<2x128xf32>
    %c0_35 = arith.constant 0 : index
    %c0_36 = arith.constant 0 : index
    %c0_37 = arith.constant 0 : index
    %30 = vector.load %arg14[%c0_35, %c0_36, %c0_37] : memref<1x1x128xf32, #tpu.memory_space<vmem>>, vector<1x1x128xf32>
    %31 = vector.shape_cast %30 : vector<1x1x128xf32> to vector<1x128xf32>
    %32 = vector.shape_cast %31 : vector<1x128xf32> to vector<1x128xf32>
    %33 = vector.broadcast %32 : vector<1x128xf32> to vector<2x128xf32>
    %cst = arith.constant 0.000000e+00 : f32
    %34 = vector.broadcast %cst : f32 to vector<2x32xf32>
    %c0_38 = arith.constant 0 : index
    %c0_39 = arith.constant 0 : index
    %c0_40 = arith.constant 0 : index
    %c0_41 = arith.constant 0 : index
    %35 = vector.load %arg1[%c0_38, %c0_39, %c0_40, %c0_41] : memref<1x8x2x12xf32, #tpu.memory_space<vmem>>, vector<1x1x2x12xf32>
    %36 = vector.shape_cast %35 : vector<1x1x2x12xf32> to vector<2x12xf32>
    %cst_42 = arith.constant dense<0.000000e+00> : vector<2x128xf32>
    %37 = tpu.matmul %36, %1, %cst_42 {dimension_numbers = #tpu.dot_dimension_numbers<[1], [0], [0], [1], [0, 0, 1, 1], [], []>} : vector<2x12xf32>, vector<12x128xf32>, vector<2x128xf32> -> vector<2x128xf32>
    %cst_43 = arith.constant dense<0.000000e+00> : vector<2x128xf32>
    %38 = tpu.matmul %34, %3, %cst_43 {dimension_numbers = #tpu.dot_dimension_numbers<[1], [0], [0], [1], [0, 0, 1, 1], [], []>} : vector<2x32xf32>, vector<32x128xf32>, vector<2x128xf32> -> vector<2x128xf32>
    %39 = arith.addf %37, %38 : vector<2x128xf32>
    %40 = arith.addf %39, %21 : vector<2x128xf32>
    %41 = arith.negf %40 : vector<2x128xf32>
    %42 = math.exp %41 : vector<2x128xf32>
    %cst_44 = arith.constant 1.000000e+00 : f32
    %43 = vector.broadcast %cst_44 : f32 to vector<2x128xf32>
    %44 = arith.addf %43, %42 : vector<2x128xf32>
    %45 = arith.divf %43, %44 : vector<2x128xf32>
    %46 = math.tanh %40 : vector<2x128xf32>
    %47 = vector.extract_strided_slice %45 {offsets = [0, 0], sizes = [2, 32], strides = [1, 1]} : vector<2x128xf32> to vector<2x32xf32>
    %48 = vector.extract_strided_slice %45 {offsets = [0, 32], sizes = [2, 32], strides = [1, 1]} : vector<2x128xf32> to vector<2x32xf32>
    %49 = vector.extract_strided_slice %46 {offsets = [0, 64], sizes = [2, 32], strides = [1, 1]} : vector<2x128xf32> to vector<2x32xf32>
    %50 = vector.extract_strided_slice %45 {offsets = [0, 96], sizes = [2, 32], strides = [1, 1]} : vector<2x128xf32> to vector<2x32xf32>
    %51 = arith.mulf %48, %34 : vector<2x32xf32>
    %52 = arith.mulf %47, %49 : vector<2x32xf32>
    %53 = arith.addf %51, %52 : vector<2x32xf32>
    %54 = math.tanh %53 : vector<2x32xf32>
    %55 = arith.mulf %50, %54 : vector<2x32xf32>
    %c0_45 = arith.constant 0 : index
    %c1 = arith.constant 1 : index
    %c0_46 = arith.constant 0 : index
    %c0_47 = arith.constant 0 : index
    %56 = vector.load %arg1[%c0_45, %c1, %c0_46, %c0_47] : memref<1x8x2x12xf32, #tpu.memory_space<vmem>>, vector<1x1x2x12xf32>
    %57 = vector.shape_cast %56 : vector<1x1x2x12xf32> to vector<2x12xf32>
    %cst_48 = arith.constant dense<0.000000e+00> : vector<2x128xf32>
    %58 = tpu.matmul %57, %1, %cst_48 {dimension_numbers = #tpu.dot_dimension_numbers<[1], [0], [0], [1], [0, 0, 1, 1], [], []>} : vector<2x12xf32>, vector<12x128xf32>, vector<2x128xf32> -> vector<2x128xf32>
    %cst_49 = arith.constant dense<0.000000e+00> : vector<2x128xf32>
    %59 = tpu.matmul %55, %3, %cst_49 {dimension_numbers = #tpu.dot_dimension_numbers<[1], [0], [0], [1], [0, 0, 1, 1], [], []>} : vector<2x32xf32>, vector<32x128xf32>, vector<2x128xf32> -> vector<2x128xf32>
    %60 = arith.addf %58, %59 : vector<2x128xf32>
    %61 = arith.addf %60, %21 : vector<2x128xf32>
    %62 = arith.negf %61 : vector<2x128xf32>
    %63 = math.exp %62 : vector<2x128xf32>
    %cst_50 = arith.constant 1.000000e+00 : f32
    %64 = vector.broadcast %cst_50 : f32 to vector<2x128xf32>
    %65 = arith.addf %64, %63 : vector<2x128xf32>
    %66 = arith.divf %64, %65 : vector<2x128xf32>
    %67 = math.tanh %61 : vector<2x128xf32>
    %68 = vector.extract_strided_slice %66 {offsets = [0, 0], sizes = [2, 32], strides = [1, 1]} : vector<2x128xf32> to vector<2x32xf32>
    %69 = vector.extract_strided_slice %66 {offsets = [0, 32], sizes = [2, 32], strides = [1, 1]} : vector<2x128xf32> to vector<2x32xf32>
    %70 = vector.extract_strided_slice %67 {offsets = [0, 64], sizes = [2, 32], strides = [1, 1]} : vector<2x128xf32> to vector<2x32xf32>
    %71 = vector.extract_strided_slice %66 {offsets = [0, 96], sizes = [2, 32], strides = [1, 1]} : vector<2x128xf32> to vector<2x32xf32>
    %72 = arith.mulf %69, %53 : vector<2x32xf32>
    %73 = arith.mulf %68, %70 : vector<2x32xf32>
    %74 = arith.addf %72, %73 : vector<2x32xf32>
    %75 = math.tanh %74 : vector<2x32xf32>
    %76 = arith.mulf %71, %75 : vector<2x32xf32>
    %c0_51 = arith.constant 0 : index
    %c2 = arith.constant 2 : index
    %c0_52 = arith.constant 0 : index
    %c0_53 = arith.constant 0 : index
    %77 = vector.load %arg1[%c0_51, %c2, %c0_52, %c0_53] : memref<1x8x2x12xf32, #tpu.memory_space<vmem>>, vector<1x1x2x12xf32>
    %78 = vector.shape_cast %77 : vector<1x1x2x12xf32> to vector<2x12xf32>
    %cst_54 = arith.constant dense<0.000000e+00> : vector<2x128xf32>
    %79 = tpu.matmul %78, %1, %cst_54 {dimension_numbers = #tpu.dot_dimension_numbers<[1], [0], [0], [1], [0, 0, 1, 1], [], []>} : vector<2x12xf32>, vector<12x128xf32>, vector<2x128xf32> -> vector<2x128xf32>
    %cst_55 = arith.constant dense<0.000000e+00> : vector<2x128xf32>
    %80 = tpu.matmul %76, %3, %cst_55 {dimension_numbers = #tpu.dot_dimension_numbers<[1], [0], [0], [1], [0, 0, 1, 1], [], []>} : vector<2x32xf32>, vector<32x128xf32>, vector<2x128xf32> -> vector<2x128xf32>
    %81 = arith.addf %79, %80 : vector<2x128xf32>
    %82 = arith.addf %81, %21 : vector<2x128xf32>
    %83 = arith.negf %82 : vector<2x128xf32>
    %84 = math.exp %83 : vector<2x128xf32>
    %cst_56 = arith.constant 1.000000e+00 : f32
    %85 = vector.broadcast %cst_56 : f32 to vector<2x128xf32>
    %86 = arith.addf %85, %84 : vector<2x128xf32>
    %87 = arith.divf %85, %86 : vector<2x128xf32>
    %88 = math.tanh %82 : vector<2x128xf32>
    %89 = vector.extract_strided_slice %87 {offsets = [0, 0], sizes = [2, 32], strides = [1, 1]} : vector<2x128xf32> to vector<2x32xf32>
    %90 = vector.extract_strided_slice %87 {offsets = [0, 32], sizes = [2, 32], strides = [1, 1]} : vector<2x128xf32> to vector<2x32xf32>
    %91 = vector.extract_strided_slice %88 {offsets = [0, 64], sizes = [2, 32], strides = [1, 1]} : vector<2x128xf32> to vector<2x32xf32>
    %92 = vector.extract_strided_slice %87 {offsets = [0, 96], sizes = [2, 32], strides = [1, 1]} : vector<2x128xf32> to vector<2x32xf32>
    %93 = arith.mulf %90, %74 : vector<2x32xf32>
    %94 = arith.mulf %89, %91 : vector<2x32xf32>
    %95 = arith.addf %93, %94 : vector<2x32xf32>
    %96 = math.tanh %95 : vector<2x32xf32>
    %97 = arith.mulf %92, %96 : vector<2x32xf32>
    %c0_57 = arith.constant 0 : index
    %c3 = arith.constant 3 : index
    %c0_58 = arith.constant 0 : index
    %c0_59 = arith.constant 0 : index
    %98 = vector.load %arg1[%c0_57, %c3, %c0_58, %c0_59] : memref<1x8x2x12xf32, #tpu.memory_space<vmem>>, vector<1x1x2x12xf32>
    %99 = vector.shape_cast %98 : vector<1x1x2x12xf32> to vector<2x12xf32>
    %cst_60 = arith.constant dense<0.000000e+00> : vector<2x128xf32>
    %100 = tpu.matmul %99, %1, %cst_60 {dimension_numbers = #tpu.dot_dimension_numbers<[1], [0], [0], [1], [0, 0, 1, 1], [], []>} : vector<2x12xf32>, vector<12x128xf32>, vector<2x128xf32> -> vector<2x128xf32>
    %cst_61 = arith.constant dense<0.000000e+00> : vector<2x128xf32>
    %101 = tpu.matmul %97, %3, %cst_61 {dimension_numbers = #tpu.dot_dimension_numbers<[1], [0], [0], [1], [0, 0, 1, 1], [], []>} : vector<2x32xf32>, vector<32x128xf32>, vector<2x128xf32> -> vector<2x128xf32>
    %102 = arith.addf %100, %101 : vector<2x128xf32>
    %103 = arith.addf %102, %21 : vector<2x128xf32>
    %104 = arith.negf %103 : vector<2x128xf32>
    %105 = math.exp %104 : vector<2x128xf32>
    %cst_62 = arith.constant 1.000000e+00 : f32
    %106 = vector.broadcast %cst_62 : f32 to vector<2x128xf32>
    %107 = arith.addf %106, %105 : vector<2x128xf32>
    %108 = arith.divf %106, %107 : vector<2x128xf32>
    %109 = math.tanh %103 : vector<2x128xf32>
    %110 = vector.extract_strided_slice %108 {offsets = [0, 0], sizes = [2, 32], strides = [1, 1]} : vector<2x128xf32> to vector<2x32xf32>
    %111 = vector.extract_strided_slice %108 {offsets = [0, 32], sizes = [2, 32], strides = [1, 1]} : vector<2x128xf32> to vector<2x32xf32>
    %112 = vector.extract_strided_slice %109 {offsets = [0, 64], sizes = [2, 32], strides = [1, 1]} : vector<2x128xf32> to vector<2x32xf32>
    %113 = vector.extract_strided_slice %108 {offsets = [0, 96], sizes = [2, 32], strides = [1, 1]} : vector<2x128xf32> to vector<2x32xf32>
    %114 = arith.mulf %111, %95 : vector<2x32xf32>
    %115 = arith.mulf %110, %112 : vector<2x32xf32>
    %116 = arith.addf %114, %115 : vector<2x32xf32>
    %117 = math.tanh %116 : vector<2x32xf32>
    %118 = arith.mulf %113, %117 : vector<2x32xf32>
    %c0_63 = arith.constant 0 : index
    %c4 = arith.constant 4 : index
    %c0_64 = arith.constant 0 : index
    %c0_65 = arith.constant 0 : index
    %119 = vector.load %arg1[%c0_63, %c4, %c0_64, %c0_65] : memref<1x8x2x12xf32, #tpu.memory_space<vmem>>, vector<1x1x2x12xf32>
    %120 = vector.shape_cast %119 : vector<1x1x2x12xf32> to vector<2x12xf32>
    %cst_66 = arith.constant dense<0.000000e+00> : vector<2x128xf32>
    %121 = tpu.matmul %120, %1, %cst_66 {dimension_numbers = #tpu.dot_dimension_numbers<[1], [0], [0], [1], [0, 0, 1, 1], [], []>} : vector<2x12xf32>, vector<12x128xf32>, vector<2x128xf32> -> vector<2x128xf32>
    %cst_67 = arith.constant dense<0.000000e+00> : vector<2x128xf32>
    %122 = tpu.matmul %118, %3, %cst_67 {dimension_numbers = #tpu.dot_dimension_numbers<[1], [0], [0], [1], [0, 0, 1, 1], [], []>} : vector<2x32xf32>, vector<32x128xf32>, vector<2x128xf32> -> vector<2x128xf32>
    %123 = arith.addf %121, %122 : vector<2x128xf32>
    %124 = arith.addf %123, %21 : vector<2x128xf32>
    %125 = arith.negf %124 : vector<2x128xf32>
    %126 = math.exp %125 : vector<2x128xf32>
    %cst_68 = arith.constant 1.000000e+00 : f32
    %127 = vector.broadcast %cst_68 : f32 to vector<2x128xf32>
    %128 = arith.addf %127, %126 : vector<2x128xf32>
    %129 = arith.divf %127, %128 : vector<2x128xf32>
    %130 = math.tanh %124 : vector<2x128xf32>
    %131 = vector.extract_strided_slice %129 {offsets = [0, 0], sizes = [2, 32], strides = [1, 1]} : vector<2x128xf32> to vector<2x32xf32>
    %132 = vector.extract_strided_slice %129 {offsets = [0, 32], sizes = [2, 32], strides = [1, 1]} : vector<2x128xf32> to vector<2x32xf32>
    %133 = vector.extract_strided_slice %130 {offsets = [0, 64], sizes = [2, 32], strides = [1, 1]} : vector<2x128xf32> to vector<2x32xf32>
    %134 = vector.extract_strided_slice %129 {offsets = [0, 96], sizes = [2, 32], strides = [1, 1]} : vector<2x128xf32> to vector<2x32xf32>
    %135 = arith.mulf %132, %116 : vector<2x32xf32>
    %136 = arith.mulf %131, %133 : vector<2x32xf32>
    %137 = arith.addf %135, %136 : vector<2x32xf32>
    %138 = math.tanh %137 : vector<2x32xf32>
    %139 = arith.mulf %134, %138 : vector<2x32xf32>
    %c0_69 = arith.constant 0 : index
    %c5 = arith.constant 5 : index
    %c0_70 = arith.constant 0 : index
    %c0_71 = arith.constant 0 : index
    %140 = vector.load %arg1[%c0_69, %c5, %c0_70, %c0_71] : memref<1x8x2x12xf32, #tpu.memory_space<vmem>>, vector<1x1x2x12xf32>
    %141 = vector.shape_cast %140 : vector<1x1x2x12xf32> to vector<2x12xf32>
    %cst_72 = arith.constant dense<0.000000e+00> : vector<2x128xf32>
    %142 = tpu.matmul %141, %1, %cst_72 {dimension_numbers = #tpu.dot_dimension_numbers<[1], [0], [0], [1], [0, 0, 1, 1], [], []>} : vector<2x12xf32>, vector<12x128xf32>, vector<2x128xf32> -> vector<2x128xf32>
    %cst_73 = arith.constant dense<0.000000e+00> : vector<2x128xf32>
    %143 = tpu.matmul %139, %3, %cst_73 {dimension_numbers = #tpu.dot_dimension_numbers<[1], [0], [0], [1], [0, 0, 1, 1], [], []>} : vector<2x32xf32>, vector<32x128xf32>, vector<2x128xf32> -> vector<2x128xf32>
    %144 = arith.addf %142, %143 : vector<2x128xf32>
    %145 = arith.addf %144, %21 : vector<2x128xf32>
    %146 = arith.negf %145 : vector<2x128xf32>
    %147 = math.exp %146 : vector<2x128xf32>
    %cst_74 = arith.constant 1.000000e+00 : f32
    %148 = vector.broadcast %cst_74 : f32 to vector<2x128xf32>
    %149 = arith.addf %148, %147 : vector<2x128xf32>
    %150 = arith.divf %148, %149 : vector<2x128xf32>
    %151 = math.tanh %145 : vector<2x128xf32>
    %152 = vector.extract_strided_slice %150 {offsets = [0, 0], sizes = [2, 32], strides = [1, 1]} : vector<2x128xf32> to vector<2x32xf32>
    %153 = vector.extract_strided_slice %150 {offsets = [0, 32], sizes = [2, 32], strides = [1, 1]} : vector<2x128xf32> to vector<2x32xf32>
    %154 = vector.extract_strided_slice %151 {offsets = [0, 64], sizes = [2, 32], strides = [1, 1]} : vector<2x128xf32> to vector<2x32xf32>
    %155 = vector.extract_strided_slice %150 {offsets = [0, 96], sizes = [2, 32], strides = [1, 1]} : vector<2x128xf32> to vector<2x32xf32>
    %156 = arith.mulf %153, %137 : vector<2x32xf32>
    %157 = arith.mulf %152, %154 : vector<2x32xf32>
    %158 = arith.addf %156, %157 : vector<2x32xf32>
    %159 = math.tanh %158 : vector<2x32xf32>
    %160 = arith.mulf %155, %159 : vector<2x32xf32>
    %c0_75 = arith.constant 0 : index
    %c6 = arith.constant 6 : index
    %c0_76 = arith.constant 0 : index
    %c0_77 = arith.constant 0 : index
    %161 = vector.load %arg1[%c0_75, %c6, %c0_76, %c0_77] : memref<1x8x2x12xf32, #tpu.memory_space<vmem>>, vector<1x1x2x12xf32>
    %162 = vector.shape_cast %161 : vector<1x1x2x12xf32> to vector<2x12xf32>
    %cst_78 = arith.constant dense<0.000000e+00> : vector<2x128xf32>
    %163 = tpu.matmul %162, %1, %cst_78 {dimension_numbers = #tpu.dot_dimension_numbers<[1], [0], [0], [1], [0, 0, 1, 1], [], []>} : vector<2x12xf32>, vector<12x128xf32>, vector<2x128xf32> -> vector<2x128xf32>
    %cst_79 = arith.constant dense<0.000000e+00> : vector<2x128xf32>
    %164 = tpu.matmul %160, %3, %cst_79 {dimension_numbers = #tpu.dot_dimension_numbers<[1], [0], [0], [1], [0, 0, 1, 1], [], []>} : vector<2x32xf32>, vector<32x128xf32>, vector<2x128xf32> -> vector<2x128xf32>
    %165 = arith.addf %163, %164 : vector<2x128xf32>
    %166 = arith.addf %165, %21 : vector<2x128xf32>
    %167 = arith.negf %166 : vector<2x128xf32>
    %168 = math.exp %167 : vector<2x128xf32>
    %cst_80 = arith.constant 1.000000e+00 : f32
    %169 = vector.broadcast %cst_80 : f32 to vector<2x128xf32>
    %170 = arith.addf %169, %168 : vector<2x128xf32>
    %171 = arith.divf %169, %170 : vector<2x128xf32>
    %172 = math.tanh %166 : vector<2x128xf32>
    %173 = vector.extract_strided_slice %171 {offsets = [0, 0], sizes = [2, 32], strides = [1, 1]} : vector<2x128xf32> to vector<2x32xf32>
    %174 = vector.extract_strided_slice %171 {offsets = [0, 32], sizes = [2, 32], strides = [1, 1]} : vector<2x128xf32> to vector<2x32xf32>
    %175 = vector.extract_strided_slice %172 {offsets = [0, 64], sizes = [2, 32], strides = [1, 1]} : vector<2x128xf32> to vector<2x32xf32>
    %176 = vector.extract_strided_slice %171 {offsets = [0, 96], sizes = [2, 32], strides = [1, 1]} : vector<2x128xf32> to vector<2x32xf32>
    %177 = arith.mulf %174, %158 : vector<2x32xf32>
    %178 = arith.mulf %173, %175 : vector<2x32xf32>
    %179 = arith.addf %177, %178 : vector<2x32xf32>
    %180 = math.tanh %179 : vector<2x32xf32>
    %181 = arith.mulf %176, %180 : vector<2x32xf32>
    %c0_81 = arith.constant 0 : index
    %c7 = arith.constant 7 : index
    %c0_82 = arith.constant 0 : index
    %c0_83 = arith.constant 0 : index
    %182 = vector.load %arg1[%c0_81, %c7, %c0_82, %c0_83] : memref<1x8x2x12xf32, #tpu.memory_space<vmem>>, vector<1x1x2x12xf32>
    %183 = vector.shape_cast %182 : vector<1x1x2x12xf32> to vector<2x12xf32>
    %cst_84 = arith.constant dense<0.000000e+00> : vector<2x128xf32>
    %184 = tpu.matmul %183, %1, %cst_84 {dimension_numbers = #tpu.dot_dimension_numbers<[1], [0], [0], [1], [0, 0, 1, 1], [], []>} : vector<2x12xf32>, vector<12x128xf32>, vector<2x128xf32> -> vector<2x128xf32>
    %cst_85 = arith.constant dense<0.000000e+00> : vector<2x128xf32>
    %185 = tpu.matmul %181, %3, %cst_85 {dimension_numbers = #tpu.dot_dimension_numbers<[1], [0], [0], [1], [0, 0, 1, 1], [], []>} : vector<2x32xf32>, vector<32x128xf32>, vector<2x128xf32> -> vector<2x128xf32>
    %186 = arith.addf %184, %185 : vector<2x128xf32>
    %187 = arith.addf %186, %21 : vector<2x128xf32>
    %188 = arith.negf %187 : vector<2x128xf32>
    %189 = math.exp %188 : vector<2x128xf32>
    %cst_86 = arith.constant 1.000000e+00 : f32
    %190 = vector.broadcast %cst_86 : f32 to vector<2x128xf32>
    %191 = arith.addf %190, %189 : vector<2x128xf32>
    %192 = arith.divf %190, %191 : vector<2x128xf32>
    %193 = math.tanh %187 : vector<2x128xf32>
    %194 = vector.extract_strided_slice %192 {offsets = [0, 0], sizes = [2, 32], strides = [1, 1]} : vector<2x128xf32> to vector<2x32xf32>
    %195 = vector.extract_strided_slice %192 {offsets = [0, 32], sizes = [2, 32], strides = [1, 1]} : vector<2x128xf32> to vector<2x32xf32>
    %196 = vector.extract_strided_slice %193 {offsets = [0, 64], sizes = [2, 32], strides = [1, 1]} : vector<2x128xf32> to vector<2x32xf32>
    %197 = vector.extract_strided_slice %192 {offsets = [0, 96], sizes = [2, 32], strides = [1, 1]} : vector<2x128xf32> to vector<2x32xf32>
    %198 = arith.mulf %195, %179 : vector<2x32xf32>
    %199 = arith.mulf %194, %196 : vector<2x32xf32>
    %200 = arith.addf %198, %199 : vector<2x32xf32>
    %201 = math.tanh %200 : vector<2x32xf32>
    %202 = arith.mulf %197, %201 : vector<2x32xf32>
    %c0_87 = arith.constant 0 : index
    %c7_88 = arith.constant 7 : index
    %c0_89 = arith.constant 0 : index
    %c0_90 = arith.constant 0 : index
    %203 = vector.load %arg1[%c0_87, %c7_88, %c0_89, %c0_90] : memref<1x8x2x12xf32, #tpu.memory_space<vmem>>, vector<1x1x2x12xf32>
    %204 = vector.shape_cast %203 : vector<1x1x2x12xf32> to vector<2x12xf32>
    %cst_91 = arith.constant dense<0.000000e+00> : vector<2x128xf32>
    %205 = tpu.matmul %204, %5, %cst_91 {dimension_numbers = #tpu.dot_dimension_numbers<[1], [0], [0], [1], [0, 0, 1, 1], [], []>} : vector<2x12xf32>, vector<12x128xf32>, vector<2x128xf32> -> vector<2x128xf32>
    %cst_92 = arith.constant dense<0.000000e+00> : vector<2x128xf32>
    %206 = tpu.matmul %34, %7, %cst_92 {dimension_numbers = #tpu.dot_dimension_numbers<[1], [0], [0], [1], [0, 0, 1, 1], [], []>} : vector<2x32xf32>, vector<32x128xf32>, vector<2x128xf32> -> vector<2x128xf32>
    %207 = arith.addf %205, %206 : vector<2x128xf32>
    %208 = arith.addf %207, %25 : vector<2x128xf32>
    %209 = arith.negf %208 : vector<2x128xf32>
    %210 = math.exp %209 : vector<2x128xf32>
    %cst_93 = arith.constant 1.000000e+00 : f32
    %211 = vector.broadcast %cst_93 : f32 to vector<2x128xf32>
    %212 = arith.addf %211, %210 : vector<2x128xf32>
    %213 = arith.divf %211, %212 : vector<2x128xf32>
    %214 = math.tanh %208 : vector<2x128xf32>
    %215 = vector.extract_strided_slice %213 {offsets = [0, 0], sizes = [2, 32], strides = [1, 1]} : vector<2x128xf32> to vector<2x32xf32>
    %216 = vector.extract_strided_slice %213 {offsets = [0, 32], sizes = [2, 32], strides = [1, 1]} : vector<2x128xf32> to vector<2x32xf32>
    %217 = vector.extract_strided_slice %214 {offsets = [0, 64], sizes = [2, 32], strides = [1, 1]} : vector<2x128xf32> to vector<2x32xf32>
    %218 = vector.extract_strided_slice %213 {offsets = [0, 96], sizes = [2, 32], strides = [1, 1]} : vector<2x128xf32> to vector<2x32xf32>
    %219 = arith.mulf %216, %34 : vector<2x32xf32>
    %220 = arith.mulf %215, %217 : vector<2x32xf32>
    %221 = arith.addf %219, %220 : vector<2x32xf32>
    %222 = math.tanh %221 : vector<2x32xf32>
    %223 = arith.mulf %218, %222 : vector<2x32xf32>
    %c0_94 = arith.constant 0 : index
    %c6_95 = arith.constant 6 : index
    %c0_96 = arith.constant 0 : index
    %c0_97 = arith.constant 0 : index
    %224 = vector.load %arg1[%c0_94, %c6_95, %c0_96, %c0_97] : memref<1x8x2x12xf32, #tpu.memory_space<vmem>>, vector<1x1x2x12xf32>
    %225 = vector.shape_cast %224 : vector<1x1x2x12xf32> to vector<2x12xf32>
    %cst_98 = arith.constant dense<0.000000e+00> : vector<2x128xf32>
    %226 = tpu.matmul %225, %5, %cst_98 {dimension_numbers = #tpu.dot_dimension_numbers<[1], [0], [0], [1], [0, 0, 1, 1], [], []>} : vector<2x12xf32>, vector<12x128xf32>, vector<2x128xf32> -> vector<2x128xf32>
    %cst_99 = arith.constant dense<0.000000e+00> : vector<2x128xf32>
    %227 = tpu.matmul %223, %7, %cst_99 {dimension_numbers = #tpu.dot_dimension_numbers<[1], [0], [0], [1], [0, 0, 1, 1], [], []>} : vector<2x32xf32>, vector<32x128xf32>, vector<2x128xf32> -> vector<2x128xf32>
    %228 = arith.addf %226, %227 : vector<2x128xf32>
    %229 = arith.addf %228, %25 : vector<2x128xf32>
    %230 = arith.negf %229 : vector<2x128xf32>
    %231 = math.exp %230 : vector<2x128xf32>
    %cst_100 = arith.constant 1.000000e+00 : f32
    %232 = vector.broadcast %cst_100 : f32 to vector<2x128xf32>
    %233 = arith.addf %232, %231 : vector<2x128xf32>
    %234 = arith.divf %232, %233 : vector<2x128xf32>
    %235 = math.tanh %229 : vector<2x128xf32>
    %236 = vector.extract_strided_slice %234 {offsets = [0, 0], sizes = [2, 32], strides = [1, 1]} : vector<2x128xf32> to vector<2x32xf32>
    %237 = vector.extract_strided_slice %234 {offsets = [0, 32], sizes = [2, 32], strides = [1, 1]} : vector<2x128xf32> to vector<2x32xf32>
    %238 = vector.extract_strided_slice %235 {offsets = [0, 64], sizes = [2, 32], strides = [1, 1]} : vector<2x128xf32> to vector<2x32xf32>
    %239 = vector.extract_strided_slice %234 {offsets = [0, 96], sizes = [2, 32], strides = [1, 1]} : vector<2x128xf32> to vector<2x32xf32>
    %240 = arith.mulf %237, %221 : vector<2x32xf32>
    %241 = arith.mulf %236, %238 : vector<2x32xf32>
    %242 = arith.addf %240, %241 : vector<2x32xf32>
    %243 = math.tanh %242 : vector<2x32xf32>
    %244 = arith.mulf %239, %243 : vector<2x32xf32>
    %c0_101 = arith.constant 0 : index
    %c5_102 = arith.constant 5 : index
    %c0_103 = arith.constant 0 : index
    %c0_104 = arith.constant 0 : index
    %245 = vector.load %arg1[%c0_101, %c5_102, %c0_103, %c0_104] : memref<1x8x2x12xf32, #tpu.memory_space<vmem>>, vector<1x1x2x12xf32>
    %246 = vector.shape_cast %245 : vector<1x1x2x12xf32> to vector<2x12xf32>
    %cst_105 = arith.constant dense<0.000000e+00> : vector<2x128xf32>
    %247 = tpu.matmul %246, %5, %cst_105 {dimension_numbers = #tpu.dot_dimension_numbers<[1], [0], [0], [1], [0, 0, 1, 1], [], []>} : vector<2x12xf32>, vector<12x128xf32>, vector<2x128xf32> -> vector<2x128xf32>
    %cst_106 = arith.constant dense<0.000000e+00> : vector<2x128xf32>
    %248 = tpu.matmul %244, %7, %cst_106 {dimension_numbers = #tpu.dot_dimension_numbers<[1], [0], [0], [1], [0, 0, 1, 1], [], []>} : vector<2x32xf32>, vector<32x128xf32>, vector<2x128xf32> -> vector<2x128xf32>
    %249 = arith.addf %247, %248 : vector<2x128xf32>
    %250 = arith.addf %249, %25 : vector<2x128xf32>
    %251 = arith.negf %250 : vector<2x128xf32>
    %252 = math.exp %251 : vector<2x128xf32>
    %cst_107 = arith.constant 1.000000e+00 : f32
    %253 = vector.broadcast %cst_107 : f32 to vector<2x128xf32>
    %254 = arith.addf %253, %252 : vector<2x128xf32>
    %255 = arith.divf %253, %254 : vector<2x128xf32>
    %256 = math.tanh %250 : vector<2x128xf32>
    %257 = vector.extract_strided_slice %255 {offsets = [0, 0], sizes = [2, 32], strides = [1, 1]} : vector<2x128xf32> to vector<2x32xf32>
    %258 = vector.extract_strided_slice %255 {offsets = [0, 32], sizes = [2, 32], strides = [1, 1]} : vector<2x128xf32> to vector<2x32xf32>
    %259 = vector.extract_strided_slice %256 {offsets = [0, 64], sizes = [2, 32], strides = [1, 1]} : vector<2x128xf32> to vector<2x32xf32>
    %260 = vector.extract_strided_slice %255 {offsets = [0, 96], sizes = [2, 32], strides = [1, 1]} : vector<2x128xf32> to vector<2x32xf32>
    %261 = arith.mulf %258, %242 : vector<2x32xf32>
    %262 = arith.mulf %257, %259 : vector<2x32xf32>
    %263 = arith.addf %261, %262 : vector<2x32xf32>
    %264 = math.tanh %263 : vector<2x32xf32>
    %265 = arith.mulf %260, %264 : vector<2x32xf32>
    %c0_108 = arith.constant 0 : index
    %c4_109 = arith.constant 4 : index
    %c0_110 = arith.constant 0 : index
    %c0_111 = arith.constant 0 : index
    %266 = vector.load %arg1[%c0_108, %c4_109, %c0_110, %c0_111] : memref<1x8x2x12xf32, #tpu.memory_space<vmem>>, vector<1x1x2x12xf32>
    %267 = vector.shape_cast %266 : vector<1x1x2x12xf32> to vector<2x12xf32>
    %cst_112 = arith.constant dense<0.000000e+00> : vector<2x128xf32>
    %268 = tpu.matmul %267, %5, %cst_112 {dimension_numbers = #tpu.dot_dimension_numbers<[1], [0], [0], [1], [0, 0, 1, 1], [], []>} : vector<2x12xf32>, vector<12x128xf32>, vector<2x128xf32> -> vector<2x128xf32>
    %cst_113 = arith.constant dense<0.000000e+00> : vector<2x128xf32>
    %269 = tpu.matmul %265, %7, %cst_113 {dimension_numbers = #tpu.dot_dimension_numbers<[1], [0], [0], [1], [0, 0, 1, 1], [], []>} : vector<2x32xf32>, vector<32x128xf32>, vector<2x128xf32> -> vector<2x128xf32>
    %270 = arith.addf %268, %269 : vector<2x128xf32>
    %271 = arith.addf %270, %25 : vector<2x128xf32>
    %272 = arith.negf %271 : vector<2x128xf32>
    %273 = math.exp %272 : vector<2x128xf32>
    %cst_114 = arith.constant 1.000000e+00 : f32
    %274 = vector.broadcast %cst_114 : f32 to vector<2x128xf32>
    %275 = arith.addf %274, %273 : vector<2x128xf32>
    %276 = arith.divf %274, %275 : vector<2x128xf32>
    %277 = math.tanh %271 : vector<2x128xf32>
    %278 = vector.extract_strided_slice %276 {offsets = [0, 0], sizes = [2, 32], strides = [1, 1]} : vector<2x128xf32> to vector<2x32xf32>
    %279 = vector.extract_strided_slice %276 {offsets = [0, 32], sizes = [2, 32], strides = [1, 1]} : vector<2x128xf32> to vector<2x32xf32>
    %280 = vector.extract_strided_slice %277 {offsets = [0, 64], sizes = [2, 32], strides = [1, 1]} : vector<2x128xf32> to vector<2x32xf32>
    %281 = vector.extract_strided_slice %276 {offsets = [0, 96], sizes = [2, 32], strides = [1, 1]} : vector<2x128xf32> to vector<2x32xf32>
    %282 = arith.mulf %279, %263 : vector<2x32xf32>
    %283 = arith.mulf %278, %280 : vector<2x32xf32>
    %284 = arith.addf %282, %283 : vector<2x32xf32>
    %285 = math.tanh %284 : vector<2x32xf32>
    %286 = arith.mulf %281, %285 : vector<2x32xf32>
    %c0_115 = arith.constant 0 : index
    %c3_116 = arith.constant 3 : index
    %c0_117 = arith.constant 0 : index
    %c0_118 = arith.constant 0 : index
    %287 = vector.load %arg1[%c0_115, %c3_116, %c0_117, %c0_118] : memref<1x8x2x12xf32, #tpu.memory_space<vmem>>, vector<1x1x2x12xf32>
    %288 = vector.shape_cast %287 : vector<1x1x2x12xf32> to vector<2x12xf32>
    %cst_119 = arith.constant dense<0.000000e+00> : vector<2x128xf32>
    %289 = tpu.matmul %288, %5, %cst_119 {dimension_numbers = #tpu.dot_dimension_numbers<[1], [0], [0], [1], [0, 0, 1, 1], [], []>} : vector<2x12xf32>, vector<12x128xf32>, vector<2x128xf32> -> vector<2x128xf32>
    %cst_120 = arith.constant dense<0.000000e+00> : vector<2x128xf32>
    %290 = tpu.matmul %286, %7, %cst_120 {dimension_numbers = #tpu.dot_dimension_numbers<[1], [0], [0], [1], [0, 0, 1, 1], [], []>} : vector<2x32xf32>, vector<32x128xf32>, vector<2x128xf32> -> vector<2x128xf32>
    %291 = arith.addf %289, %290 : vector<2x128xf32>
    %292 = arith.addf %291, %25 : vector<2x128xf32>
    %293 = arith.negf %292 : vector<2x128xf32>
    %294 = math.exp %293 : vector<2x128xf32>
    %cst_121 = arith.constant 1.000000e+00 : f32
    %295 = vector.broadcast %cst_121 : f32 to vector<2x128xf32>
    %296 = arith.addf %295, %294 : vector<2x128xf32>
    %297 = arith.divf %295, %296 : vector<2x128xf32>
    %298 = math.tanh %292 : vector<2x128xf32>
    %299 = vector.extract_strided_slice %297 {offsets = [0, 0], sizes = [2, 32], strides = [1, 1]} : vector<2x128xf32> to vector<2x32xf32>
    %300 = vector.extract_strided_slice %297 {offsets = [0, 32], sizes = [2, 32], strides = [1, 1]} : vector<2x128xf32> to vector<2x32xf32>
    %301 = vector.extract_strided_slice %298 {offsets = [0, 64], sizes = [2, 32], strides = [1, 1]} : vector<2x128xf32> to vector<2x32xf32>
    %302 = vector.extract_strided_slice %297 {offsets = [0, 96], sizes = [2, 32], strides = [1, 1]} : vector<2x128xf32> to vector<2x32xf32>
    %303 = arith.mulf %300, %284 : vector<2x32xf32>
    %304 = arith.mulf %299, %301 : vector<2x32xf32>
    %305 = arith.addf %303, %304 : vector<2x32xf32>
    %306 = math.tanh %305 : vector<2x32xf32>
    %307 = arith.mulf %302, %306 : vector<2x32xf32>
    %c0_122 = arith.constant 0 : index
    %c2_123 = arith.constant 2 : index
    %c0_124 = arith.constant 0 : index
    %c0_125 = arith.constant 0 : index
    %308 = vector.load %arg1[%c0_122, %c2_123, %c0_124, %c0_125] : memref<1x8x2x12xf32, #tpu.memory_space<vmem>>, vector<1x1x2x12xf32>
    %309 = vector.shape_cast %308 : vector<1x1x2x12xf32> to vector<2x12xf32>
    %cst_126 = arith.constant dense<0.000000e+00> : vector<2x128xf32>
    %310 = tpu.matmul %309, %5, %cst_126 {dimension_numbers = #tpu.dot_dimension_numbers<[1], [0], [0], [1], [0, 0, 1, 1], [], []>} : vector<2x12xf32>, vector<12x128xf32>, vector<2x128xf32> -> vector<2x128xf32>
    %cst_127 = arith.constant dense<0.000000e+00> : vector<2x128xf32>
    %311 = tpu.matmul %307, %7, %cst_127 {dimension_numbers = #tpu.dot_dimension_numbers<[1], [0], [0], [1], [0, 0, 1, 1], [], []>} : vector<2x32xf32>, vector<32x128xf32>, vector<2x128xf32> -> vector<2x128xf32>
    %312 = arith.addf %310, %311 : vector<2x128xf32>
    %313 = arith.addf %312, %25 : vector<2x128xf32>
    %314 = arith.negf %313 : vector<2x128xf32>
    %315 = math.exp %314 : vector<2x128xf32>
    %cst_128 = arith.constant 1.000000e+00 : f32
    %316 = vector.broadcast %cst_128 : f32 to vector<2x128xf32>
    %317 = arith.addf %316, %315 : vector<2x128xf32>
    %318 = arith.divf %316, %317 : vector<2x128xf32>
    %319 = math.tanh %313 : vector<2x128xf32>
    %320 = vector.extract_strided_slice %318 {offsets = [0, 0], sizes = [2, 32], strides = [1, 1]} : vector<2x128xf32> to vector<2x32xf32>
    %321 = vector.extract_strided_slice %318 {offsets = [0, 32], sizes = [2, 32], strides = [1, 1]} : vector<2x128xf32> to vector<2x32xf32>
    %322 = vector.extract_strided_slice %319 {offsets = [0, 64], sizes = [2, 32], strides = [1, 1]} : vector<2x128xf32> to vector<2x32xf32>
    %323 = vector.extract_strided_slice %318 {offsets = [0, 96], sizes = [2, 32], strides = [1, 1]} : vector<2x128xf32> to vector<2x32xf32>
    %324 = arith.mulf %321, %305 : vector<2x32xf32>
    %325 = arith.mulf %320, %322 : vector<2x32xf32>
    %326 = arith.addf %324, %325 : vector<2x32xf32>
    %327 = math.tanh %326 : vector<2x32xf32>
    %328 = arith.mulf %323, %327 : vector<2x32xf32>
    %c0_129 = arith.constant 0 : index
    %c1_130 = arith.constant 1 : index
    %c0_131 = arith.constant 0 : index
    %c0_132 = arith.constant 0 : index
    %329 = vector.load %arg1[%c0_129, %c1_130, %c0_131, %c0_132] : memref<1x8x2x12xf32, #tpu.memory_space<vmem>>, vector<1x1x2x12xf32>
    %330 = vector.shape_cast %329 : vector<1x1x2x12xf32> to vector<2x12xf32>
    %cst_133 = arith.constant dense<0.000000e+00> : vector<2x128xf32>
    %331 = tpu.matmul %330, %5, %cst_133 {dimension_numbers = #tpu.dot_dimension_numbers<[1], [0], [0], [1], [0, 0, 1, 1], [], []>} : vector<2x12xf32>, vector<12x128xf32>, vector<2x128xf32> -> vector<2x128xf32>
    %cst_134 = arith.constant dense<0.000000e+00> : vector<2x128xf32>
    %332 = tpu.matmul %328, %7, %cst_134 {dimension_numbers = #tpu.dot_dimension_numbers<[1], [0], [0], [1], [0, 0, 1, 1], [], []>} : vector<2x32xf32>, vector<32x128xf32>, vector<2x128xf32> -> vector<2x128xf32>
    %333 = arith.addf %331, %332 : vector<2x128xf32>
    %334 = arith.addf %333, %25 : vector<2x128xf32>
    %335 = arith.negf %334 : vector<2x128xf32>
    %336 = math.exp %335 : vector<2x128xf32>
    %cst_135 = arith.constant 1.000000e+00 : f32
    %337 = vector.broadcast %cst_135 : f32 to vector<2x128xf32>
    %338 = arith.addf %337, %336 : vector<2x128xf32>
    %339 = arith.divf %337, %338 : vector<2x128xf32>
    %340 = math.tanh %334 : vector<2x128xf32>
    %341 = vector.extract_strided_slice %339 {offsets = [0, 0], sizes = [2, 32], strides = [1, 1]} : vector<2x128xf32> to vector<2x32xf32>
    %342 = vector.extract_strided_slice %339 {offsets = [0, 32], sizes = [2, 32], strides = [1, 1]} : vector<2x128xf32> to vector<2x32xf32>
    %343 = vector.extract_strided_slice %340 {offsets = [0, 64], sizes = [2, 32], strides = [1, 1]} : vector<2x128xf32> to vector<2x32xf32>
    %344 = vector.extract_strided_slice %339 {offsets = [0, 96], sizes = [2, 32], strides = [1, 1]} : vector<2x128xf32> to vector<2x32xf32>
    %345 = arith.mulf %342, %326 : vector<2x32xf32>
    %346 = arith.mulf %341, %343 : vector<2x32xf32>
    %347 = arith.addf %345, %346 : vector<2x32xf32>
    %348 = math.tanh %347 : vector<2x32xf32>
    %349 = arith.mulf %344, %348 : vector<2x32xf32>
    %c0_136 = arith.constant 0 : index
    %c0_137 = arith.constant 0 : index
    %c0_138 = arith.constant 0 : index
    %c0_139 = arith.constant 0 : index
    %350 = vector.load %arg1[%c0_136, %c0_137, %c0_138, %c0_139] : memref<1x8x2x12xf32, #tpu.memory_space<vmem>>, vector<1x1x2x12xf32>
    %351 = vector.shape_cast %350 : vector<1x1x2x12xf32> to vector<2x12xf32>
    %cst_140 = arith.constant dense<0.000000e+00> : vector<2x128xf32>
    %352 = tpu.matmul %351, %5, %cst_140 {dimension_numbers = #tpu.dot_dimension_numbers<[1], [0], [0], [1], [0, 0, 1, 1], [], []>} : vector<2x12xf32>, vector<12x128xf32>, vector<2x128xf32> -> vector<2x128xf32>
    %cst_141 = arith.constant dense<0.000000e+00> : vector<2x128xf32>
    %353 = tpu.matmul %349, %7, %cst_141 {dimension_numbers = #tpu.dot_dimension_numbers<[1], [0], [0], [1], [0, 0, 1, 1], [], []>} : vector<2x32xf32>, vector<32x128xf32>, vector<2x128xf32> -> vector<2x128xf32>
    %354 = arith.addf %352, %353 : vector<2x128xf32>
    %355 = arith.addf %354, %25 : vector<2x128xf32>
    %356 = arith.negf %355 : vector<2x128xf32>
    %357 = math.exp %356 : vector<2x128xf32>
    %cst_142 = arith.constant 1.000000e+00 : f32
    %358 = vector.broadcast %cst_142 : f32 to vector<2x128xf32>
    %359 = arith.addf %358, %357 : vector<2x128xf32>
    %360 = arith.divf %358, %359 : vector<2x128xf32>
    %361 = math.tanh %355 : vector<2x128xf32>
    %362 = vector.extract_strided_slice %360 {offsets = [0, 0], sizes = [2, 32], strides = [1, 1]} : vector<2x128xf32> to vector<2x32xf32>
    %363 = vector.extract_strided_slice %360 {offsets = [0, 32], sizes = [2, 32], strides = [1, 1]} : vector<2x128xf32> to vector<2x32xf32>
    %364 = vector.extract_strided_slice %361 {offsets = [0, 64], sizes = [2, 32], strides = [1, 1]} : vector<2x128xf32> to vector<2x32xf32>
    %365 = vector.extract_strided_slice %360 {offsets = [0, 96], sizes = [2, 32], strides = [1, 1]} : vector<2x128xf32> to vector<2x32xf32>
    %366 = arith.mulf %363, %347 : vector<2x32xf32>
    %367 = arith.mulf %362, %364 : vector<2x32xf32>
    %368 = arith.addf %366, %367 : vector<2x32xf32>
    %369 = math.tanh %368 : vector<2x32xf32>
    %370 = arith.mulf %365, %369 : vector<2x32xf32>
    %cst_143 = arith.constant dense<0.000000e+00> : vector<2x128xf32>
    %371 = tpu.matmul %55, %9, %cst_143 {dimension_numbers = #tpu.dot_dimension_numbers<[1], [0], [0], [1], [0, 0, 1, 1], [], []>} : vector<2x32xf32>, vector<32x128xf32>, vector<2x128xf32> -> vector<2x128xf32>
    %cst_144 = arith.constant dense<0.000000e+00> : vector<2x128xf32>
    %372 = tpu.matmul %370, %11, %cst_144 {dimension_numbers = #tpu.dot_dimension_numbers<[1], [0], [0], [1], [0, 0, 1, 1], [], []>} : vector<2x32xf32>, vector<32x128xf32>, vector<2x128xf32> -> vector<2x128xf32>
    %373 = arith.addf %371, %372 : vector<2x128xf32>
    %cst_145 = arith.constant dense<0.000000e+00> : vector<2x128xf32>
    %374 = tpu.matmul %34, %13, %cst_145 {dimension_numbers = #tpu.dot_dimension_numbers<[1], [0], [0], [1], [0, 0, 1, 1], [], []>} : vector<2x32xf32>, vector<32x128xf32>, vector<2x128xf32> -> vector<2x128xf32>
    %375 = arith.addf %373, %374 : vector<2x128xf32>
    %376 = arith.addf %375, %29 : vector<2x128xf32>
    %377 = arith.negf %376 : vector<2x128xf32>
    %378 = math.exp %377 : vector<2x128xf32>
    %cst_146 = arith.constant 1.000000e+00 : f32
    %379 = vector.broadcast %cst_146 : f32 to vector<2x128xf32>
    %380 = arith.addf %379, %378 : vector<2x128xf32>
    %381 = arith.divf %379, %380 : vector<2x128xf32>
    %382 = math.tanh %376 : vector<2x128xf32>
    %383 = vector.extract_strided_slice %381 {offsets = [0, 0], sizes = [2, 32], strides = [1, 1]} : vector<2x128xf32> to vector<2x32xf32>
    %384 = vector.extract_strided_slice %381 {offsets = [0, 32], sizes = [2, 32], strides = [1, 1]} : vector<2x128xf32> to vector<2x32xf32>
    %385 = vector.extract_strided_slice %382 {offsets = [0, 64], sizes = [2, 32], strides = [1, 1]} : vector<2x128xf32> to vector<2x32xf32>
    %386 = vector.extract_strided_slice %381 {offsets = [0, 96], sizes = [2, 32], strides = [1, 1]} : vector<2x128xf32> to vector<2x32xf32>
    %387 = arith.mulf %384, %34 : vector<2x32xf32>
    %388 = arith.mulf %383, %385 : vector<2x32xf32>
    %389 = arith.addf %387, %388 : vector<2x32xf32>
    %390 = math.tanh %389 : vector<2x32xf32>
    %391 = arith.mulf %386, %390 : vector<2x32xf32>
    %cst_147 = arith.constant dense<0.000000e+00> : vector<2x128xf32>
    %392 = tpu.matmul %76, %9, %cst_147 {dimension_numbers = #tpu.dot_dimension_numbers<[1], [0], [0], [1], [0, 0, 1, 1], [], []>} : vector<2x32xf32>, vector<32x128xf32>, vector<2x128xf32> -> vector<2x128xf32>
    %cst_148 = arith.constant dense<0.000000e+00> : vector<2x128xf32>
    %393 = tpu.matmul %349, %11, %cst_148 {dimension_numbers = #tpu.dot_dimension_numbers<[1], [0], [0], [1], [0, 0, 1, 1], [], []>} : vector<2x32xf32>, vector<32x128xf32>, vector<2x128xf32> -> vector<2x128xf32>
    %394 = arith.addf %392, %393 : vector<2x128xf32>
    %cst_149 = arith.constant dense<0.000000e+00> : vector<2x128xf32>
    %395 = tpu.matmul %391, %13, %cst_149 {dimension_numbers = #tpu.dot_dimension_numbers<[1], [0], [0], [1], [0, 0, 1, 1], [], []>} : vector<2x32xf32>, vector<32x128xf32>, vector<2x128xf32> -> vector<2x128xf32>
    %396 = arith.addf %394, %395 : vector<2x128xf32>
    %397 = arith.addf %396, %29 : vector<2x128xf32>
    %398 = arith.negf %397 : vector<2x128xf32>
    %399 = math.exp %398 : vector<2x128xf32>
    %cst_150 = arith.constant 1.000000e+00 : f32
    %400 = vector.broadcast %cst_150 : f32 to vector<2x128xf32>
    %401 = arith.addf %400, %399 : vector<2x128xf32>
    %402 = arith.divf %400, %401 : vector<2x128xf32>
    %403 = math.tanh %397 : vector<2x128xf32>
    %404 = vector.extract_strided_slice %402 {offsets = [0, 0], sizes = [2, 32], strides = [1, 1]} : vector<2x128xf32> to vector<2x32xf32>
    %405 = vector.extract_strided_slice %402 {offsets = [0, 32], sizes = [2, 32], strides = [1, 1]} : vector<2x128xf32> to vector<2x32xf32>
    %406 = vector.extract_strided_slice %403 {offsets = [0, 64], sizes = [2, 32], strides = [1, 1]} : vector<2x128xf32> to vector<2x32xf32>
    %407 = vector.extract_strided_slice %402 {offsets = [0, 96], sizes = [2, 32], strides = [1, 1]} : vector<2x128xf32> to vector<2x32xf32>
    %408 = arith.mulf %405, %389 : vector<2x32xf32>
    %409 = arith.mulf %404, %406 : vector<2x32xf32>
    %410 = arith.addf %408, %409 : vector<2x32xf32>
    %411 = math.tanh %410 : vector<2x32xf32>
    %412 = arith.mulf %407, %411 : vector<2x32xf32>
    %cst_151 = arith.constant dense<0.000000e+00> : vector<2x128xf32>
    %413 = tpu.matmul %97, %9, %cst_151 {dimension_numbers = #tpu.dot_dimension_numbers<[1], [0], [0], [1], [0, 0, 1, 1], [], []>} : vector<2x32xf32>, vector<32x128xf32>, vector<2x128xf32> -> vector<2x128xf32>
    %cst_152 = arith.constant dense<0.000000e+00> : vector<2x128xf32>
    %414 = tpu.matmul %328, %11, %cst_152 {dimension_numbers = #tpu.dot_dimension_numbers<[1], [0], [0], [1], [0, 0, 1, 1], [], []>} : vector<2x32xf32>, vector<32x128xf32>, vector<2x128xf32> -> vector<2x128xf32>
    %415 = arith.addf %413, %414 : vector<2x128xf32>
    %cst_153 = arith.constant dense<0.000000e+00> : vector<2x128xf32>
    %416 = tpu.matmul %412, %13, %cst_153 {dimension_numbers = #tpu.dot_dimension_numbers<[1], [0], [0], [1], [0, 0, 1, 1], [], []>} : vector<2x32xf32>, vector<32x128xf32>, vector<2x128xf32> -> vector<2x128xf32>
    %417 = arith.addf %415, %416 : vector<2x128xf32>
    %418 = arith.addf %417, %29 : vector<2x128xf32>
    %419 = arith.negf %418 : vector<2x128xf32>
    %420 = math.exp %419 : vector<2x128xf32>
    %cst_154 = arith.constant 1.000000e+00 : f32
    %421 = vector.broadcast %cst_154 : f32 to vector<2x128xf32>
    %422 = arith.addf %421, %420 : vector<2x128xf32>
    %423 = arith.divf %421, %422 : vector<2x128xf32>
    %424 = math.tanh %418 : vector<2x128xf32>
    %425 = vector.extract_strided_slice %423 {offsets = [0, 0], sizes = [2, 32], strides = [1, 1]} : vector<2x128xf32> to vector<2x32xf32>
    %426 = vector.extract_strided_slice %423 {offsets = [0, 32], sizes = [2, 32], strides = [1, 1]} : vector<2x128xf32> to vector<2x32xf32>
    %427 = vector.extract_strided_slice %424 {offsets = [0, 64], sizes = [2, 32], strides = [1, 1]} : vector<2x128xf32> to vector<2x32xf32>
    %428 = vector.extract_strided_slice %423 {offsets = [0, 96], sizes = [2, 32], strides = [1, 1]} : vector<2x128xf32> to vector<2x32xf32>
    %429 = arith.mulf %426, %410 : vector<2x32xf32>
    %430 = arith.mulf %425, %427 : vector<2x32xf32>
    %431 = arith.addf %429, %430 : vector<2x32xf32>
    %432 = math.tanh %431 : vector<2x32xf32>
    %433 = arith.mulf %428, %432 : vector<2x32xf32>
    %cst_155 = arith.constant dense<0.000000e+00> : vector<2x128xf32>
    %434 = tpu.matmul %118, %9, %cst_155 {dimension_numbers = #tpu.dot_dimension_numbers<[1], [0], [0], [1], [0, 0, 1, 1], [], []>} : vector<2x32xf32>, vector<32x128xf32>, vector<2x128xf32> -> vector<2x128xf32>
    %cst_156 = arith.constant dense<0.000000e+00> : vector<2x128xf32>
    %435 = tpu.matmul %307, %11, %cst_156 {dimension_numbers = #tpu.dot_dimension_numbers<[1], [0], [0], [1], [0, 0, 1, 1], [], []>} : vector<2x32xf32>, vector<32x128xf32>, vector<2x128xf32> -> vector<2x128xf32>
    %436 = arith.addf %434, %435 : vector<2x128xf32>
    %cst_157 = arith.constant dense<0.000000e+00> : vector<2x128xf32>
    %437 = tpu.matmul %433, %13, %cst_157 {dimension_numbers = #tpu.dot_dimension_numbers<[1], [0], [0], [1], [0, 0, 1, 1], [], []>} : vector<2x32xf32>, vector<32x128xf32>, vector<2x128xf32> -> vector<2x128xf32>
    %438 = arith.addf %436, %437 : vector<2x128xf32>
    %439 = arith.addf %438, %29 : vector<2x128xf32>
    %440 = arith.negf %439 : vector<2x128xf32>
    %441 = math.exp %440 : vector<2x128xf32>
    %cst_158 = arith.constant 1.000000e+00 : f32
    %442 = vector.broadcast %cst_158 : f32 to vector<2x128xf32>
    %443 = arith.addf %442, %441 : vector<2x128xf32>
    %444 = arith.divf %442, %443 : vector<2x128xf32>
    %445 = math.tanh %439 : vector<2x128xf32>
    %446 = vector.extract_strided_slice %444 {offsets = [0, 0], sizes = [2, 32], strides = [1, 1]} : vector<2x128xf32> to vector<2x32xf32>
    %447 = vector.extract_strided_slice %444 {offsets = [0, 32], sizes = [2, 32], strides = [1, 1]} : vector<2x128xf32> to vector<2x32xf32>
    %448 = vector.extract_strided_slice %445 {offsets = [0, 64], sizes = [2, 32], strides = [1, 1]} : vector<2x128xf32> to vector<2x32xf32>
    %449 = vector.extract_strided_slice %444 {offsets = [0, 96], sizes = [2, 32], strides = [1, 1]} : vector<2x128xf32> to vector<2x32xf32>
    %450 = arith.mulf %447, %431 : vector<2x32xf32>
    %451 = arith.mulf %446, %448 : vector<2x32xf32>
    %452 = arith.addf %450, %451 : vector<2x32xf32>
    %453 = math.tanh %452 : vector<2x32xf32>
    %454 = arith.mulf %449, %453 : vector<2x32xf32>
    %cst_159 = arith.constant dense<0.000000e+00> : vector<2x128xf32>
    %455 = tpu.matmul %139, %9, %cst_159 {dimension_numbers = #tpu.dot_dimension_numbers<[1], [0], [0], [1], [0, 0, 1, 1], [], []>} : vector<2x32xf32>, vector<32x128xf32>, vector<2x128xf32> -> vector<2x128xf32>
    %cst_160 = arith.constant dense<0.000000e+00> : vector<2x128xf32>
    %456 = tpu.matmul %286, %11, %cst_160 {dimension_numbers = #tpu.dot_dimension_numbers<[1], [0], [0], [1], [0, 0, 1, 1], [], []>} : vector<2x32xf32>, vector<32x128xf32>, vector<2x128xf32> -> vector<2x128xf32>
    %457 = arith.addf %455, %456 : vector<2x128xf32>
    %cst_161 = arith.constant dense<0.000000e+00> : vector<2x128xf32>
    %458 = tpu.matmul %454, %13, %cst_161 {dimension_numbers = #tpu.dot_dimension_numbers<[1], [0], [0], [1], [0, 0, 1, 1], [], []>} : vector<2x32xf32>, vector<32x128xf32>, vector<2x128xf32> -> vector<2x128xf32>
    %459 = arith.addf %457, %458 : vector<2x128xf32>
    %460 = arith.addf %459, %29 : vector<2x128xf32>
    %461 = arith.negf %460 : vector<2x128xf32>
    %462 = math.exp %461 : vector<2x128xf32>
    %cst_162 = arith.constant 1.000000e+00 : f32
    %463 = vector.broadcast %cst_162 : f32 to vector<2x128xf32>
    %464 = arith.addf %463, %462 : vector<2x128xf32>
    %465 = arith.divf %463, %464 : vector<2x128xf32>
    %466 = math.tanh %460 : vector<2x128xf32>
    %467 = vector.extract_strided_slice %465 {offsets = [0, 0], sizes = [2, 32], strides = [1, 1]} : vector<2x128xf32> to vector<2x32xf32>
    %468 = vector.extract_strided_slice %465 {offsets = [0, 32], sizes = [2, 32], strides = [1, 1]} : vector<2x128xf32> to vector<2x32xf32>
    %469 = vector.extract_strided_slice %466 {offsets = [0, 64], sizes = [2, 32], strides = [1, 1]} : vector<2x128xf32> to vector<2x32xf32>
    %470 = vector.extract_strided_slice %465 {offsets = [0, 96], sizes = [2, 32], strides = [1, 1]} : vector<2x128xf32> to vector<2x32xf32>
    %471 = arith.mulf %468, %452 : vector<2x32xf32>
    %472 = arith.mulf %467, %469 : vector<2x32xf32>
    %473 = arith.addf %471, %472 : vector<2x32xf32>
    %474 = math.tanh %473 : vector<2x32xf32>
    %475 = arith.mulf %470, %474 : vector<2x32xf32>
    %cst_163 = arith.constant dense<0.000000e+00> : vector<2x128xf32>
    %476 = tpu.matmul %160, %9, %cst_163 {dimension_numbers = #tpu.dot_dimension_numbers<[1], [0], [0], [1], [0, 0, 1, 1], [], []>} : vector<2x32xf32>, vector<32x128xf32>, vector<2x128xf32> -> vector<2x128xf32>
    %cst_164 = arith.constant dense<0.000000e+00> : vector<2x128xf32>
    %477 = tpu.matmul %265, %11, %cst_164 {dimension_numbers = #tpu.dot_dimension_numbers<[1], [0], [0], [1], [0, 0, 1, 1], [], []>} : vector<2x32xf32>, vector<32x128xf32>, vector<2x128xf32> -> vector<2x128xf32>
    %478 = arith.addf %476, %477 : vector<2x128xf32>
    %cst_165 = arith.constant dense<0.000000e+00> : vector<2x128xf32>
    %479 = tpu.matmul %475, %13, %cst_165 {dimension_numbers = #tpu.dot_dimension_numbers<[1], [0], [0], [1], [0, 0, 1, 1], [], []>} : vector<2x32xf32>, vector<32x128xf32>, vector<2x128xf32> -> vector<2x128xf32>
    %480 = arith.addf %478, %479 : vector<2x128xf32>
    %481 = arith.addf %480, %29 : vector<2x128xf32>
    %482 = arith.negf %481 : vector<2x128xf32>
    %483 = math.exp %482 : vector<2x128xf32>
    %cst_166 = arith.constant 1.000000e+00 : f32
    %484 = vector.broadcast %cst_166 : f32 to vector<2x128xf32>
    %485 = arith.addf %484, %483 : vector<2x128xf32>
    %486 = arith.divf %484, %485 : vector<2x128xf32>
    %487 = math.tanh %481 : vector<2x128xf32>
    %488 = vector.extract_strided_slice %486 {offsets = [0, 0], sizes = [2, 32], strides = [1, 1]} : vector<2x128xf32> to vector<2x32xf32>
    %489 = vector.extract_strided_slice %486 {offsets = [0, 32], sizes = [2, 32], strides = [1, 1]} : vector<2x128xf32> to vector<2x32xf32>
    %490 = vector.extract_strided_slice %487 {offsets = [0, 64], sizes = [2, 32], strides = [1, 1]} : vector<2x128xf32> to vector<2x32xf32>
    %491 = vector.extract_strided_slice %486 {offsets = [0, 96], sizes = [2, 32], strides = [1, 1]} : vector<2x128xf32> to vector<2x32xf32>
    %492 = arith.mulf %489, %473 : vector<2x32xf32>
    %493 = arith.mulf %488, %490 : vector<2x32xf32>
    %494 = arith.addf %492, %493 : vector<2x32xf32>
    %495 = math.tanh %494 : vector<2x32xf32>
    %496 = arith.mulf %491, %495 : vector<2x32xf32>
    %cst_167 = arith.constant dense<0.000000e+00> : vector<2x128xf32>
    %497 = tpu.matmul %181, %9, %cst_167 {dimension_numbers = #tpu.dot_dimension_numbers<[1], [0], [0], [1], [0, 0, 1, 1], [], []>} : vector<2x32xf32>, vector<32x128xf32>, vector<2x128xf32> -> vector<2x128xf32>
    %cst_168 = arith.constant dense<0.000000e+00> : vector<2x128xf32>
    %498 = tpu.matmul %244, %11, %cst_168 {dimension_numbers = #tpu.dot_dimension_numbers<[1], [0], [0], [1], [0, 0, 1, 1], [], []>} : vector<2x32xf32>, vector<32x128xf32>, vector<2x128xf32> -> vector<2x128xf32>
    %499 = arith.addf %497, %498 : vector<2x128xf32>
    %cst_169 = arith.constant dense<0.000000e+00> : vector<2x128xf32>
    %500 = tpu.matmul %496, %13, %cst_169 {dimension_numbers = #tpu.dot_dimension_numbers<[1], [0], [0], [1], [0, 0, 1, 1], [], []>} : vector<2x32xf32>, vector<32x128xf32>, vector<2x128xf32> -> vector<2x128xf32>
    %501 = arith.addf %499, %500 : vector<2x128xf32>
    %502 = arith.addf %501, %29 : vector<2x128xf32>
    %503 = arith.negf %502 : vector<2x128xf32>
    %504 = math.exp %503 : vector<2x128xf32>
    %cst_170 = arith.constant 1.000000e+00 : f32
    %505 = vector.broadcast %cst_170 : f32 to vector<2x128xf32>
    %506 = arith.addf %505, %504 : vector<2x128xf32>
    %507 = arith.divf %505, %506 : vector<2x128xf32>
    %508 = math.tanh %502 : vector<2x128xf32>
    %509 = vector.extract_strided_slice %507 {offsets = [0, 0], sizes = [2, 32], strides = [1, 1]} : vector<2x128xf32> to vector<2x32xf32>
    %510 = vector.extract_strided_slice %507 {offsets = [0, 32], sizes = [2, 32], strides = [1, 1]} : vector<2x128xf32> to vector<2x32xf32>
    %511 = vector.extract_strided_slice %508 {offsets = [0, 64], sizes = [2, 32], strides = [1, 1]} : vector<2x128xf32> to vector<2x32xf32>
    %512 = vector.extract_strided_slice %507 {offsets = [0, 96], sizes = [2, 32], strides = [1, 1]} : vector<2x128xf32> to vector<2x32xf32>
    %513 = arith.mulf %510, %494 : vector<2x32xf32>
    %514 = arith.mulf %509, %511 : vector<2x32xf32>
    %515 = arith.addf %513, %514 : vector<2x32xf32>
    %516 = math.tanh %515 : vector<2x32xf32>
    %517 = arith.mulf %512, %516 : vector<2x32xf32>
    %cst_171 = arith.constant dense<0.000000e+00> : vector<2x128xf32>
    %518 = tpu.matmul %202, %9, %cst_171 {dimension_numbers = #tpu.dot_dimension_numbers<[1], [0], [0], [1], [0, 0, 1, 1], [], []>} : vector<2x32xf32>, vector<32x128xf32>, vector<2x128xf32> -> vector<2x128xf32>
    %cst_172 = arith.constant dense<0.000000e+00> : vector<2x128xf32>
    %519 = tpu.matmul %223, %11, %cst_172 {dimension_numbers = #tpu.dot_dimension_numbers<[1], [0], [0], [1], [0, 0, 1, 1], [], []>} : vector<2x32xf32>, vector<32x128xf32>, vector<2x128xf32> -> vector<2x128xf32>
    %520 = arith.addf %518, %519 : vector<2x128xf32>
    %cst_173 = arith.constant dense<0.000000e+00> : vector<2x128xf32>
    %521 = tpu.matmul %517, %13, %cst_173 {dimension_numbers = #tpu.dot_dimension_numbers<[1], [0], [0], [1], [0, 0, 1, 1], [], []>} : vector<2x32xf32>, vector<32x128xf32>, vector<2x128xf32> -> vector<2x128xf32>
    %522 = arith.addf %520, %521 : vector<2x128xf32>
    %523 = arith.addf %522, %29 : vector<2x128xf32>
    %524 = arith.negf %523 : vector<2x128xf32>
    %525 = math.exp %524 : vector<2x128xf32>
    %cst_174 = arith.constant 1.000000e+00 : f32
    %526 = vector.broadcast %cst_174 : f32 to vector<2x128xf32>
    %527 = arith.addf %526, %525 : vector<2x128xf32>
    %528 = arith.divf %526, %527 : vector<2x128xf32>
    %529 = math.tanh %523 : vector<2x128xf32>
    %530 = vector.extract_strided_slice %528 {offsets = [0, 0], sizes = [2, 32], strides = [1, 1]} : vector<2x128xf32> to vector<2x32xf32>
    %531 = vector.extract_strided_slice %528 {offsets = [0, 32], sizes = [2, 32], strides = [1, 1]} : vector<2x128xf32> to vector<2x32xf32>
    %532 = vector.extract_strided_slice %529 {offsets = [0, 64], sizes = [2, 32], strides = [1, 1]} : vector<2x128xf32> to vector<2x32xf32>
    %533 = vector.extract_strided_slice %528 {offsets = [0, 96], sizes = [2, 32], strides = [1, 1]} : vector<2x128xf32> to vector<2x32xf32>
    %534 = arith.mulf %531, %515 : vector<2x32xf32>
    %535 = arith.mulf %530, %532 : vector<2x32xf32>
    %536 = arith.addf %534, %535 : vector<2x32xf32>
    %537 = math.tanh %536 : vector<2x32xf32>
    %538 = arith.mulf %533, %537 : vector<2x32xf32>
    %cst_175 = arith.constant dense<0.000000e+00> : vector<2x128xf32>
    %539 = tpu.matmul %202, %15, %cst_175 {dimension_numbers = #tpu.dot_dimension_numbers<[1], [0], [0], [1], [0, 0, 1, 1], [], []>} : vector<2x32xf32>, vector<32x128xf32>, vector<2x128xf32> -> vector<2x128xf32>
    %cst_176 = arith.constant dense<0.000000e+00> : vector<2x128xf32>
    %540 = tpu.matmul %223, %17, %cst_176 {dimension_numbers = #tpu.dot_dimension_numbers<[1], [0], [0], [1], [0, 0, 1, 1], [], []>} : vector<2x32xf32>, vector<32x128xf32>, vector<2x128xf32> -> vector<2x128xf32>
    %541 = arith.addf %539, %540 : vector<2x128xf32>
    %542 = arith.addf %541, %33 : vector<2x128xf32>
    %543 = arith.negf %542 : vector<2x128xf32>
    %544 = math.exp %543 : vector<2x128xf32>
    %cst_177 = arith.constant 1.000000e+00 : f32
    %545 = vector.broadcast %cst_177 : f32 to vector<2x128xf32>
    %546 = arith.addf %545, %544 : vector<2x128xf32>
    %547 = arith.divf %545, %546 : vector<2x128xf32>
    %548 = math.tanh %542 : vector<2x128xf32>
    %549 = vector.extract_strided_slice %547 {offsets = [0, 0], sizes = [2, 32], strides = [1, 1]} : vector<2x128xf32> to vector<2x32xf32>
    %550 = vector.extract_strided_slice %547 {offsets = [0, 32], sizes = [2, 32], strides = [1, 1]} : vector<2x128xf32> to vector<2x32xf32>
    %551 = vector.extract_strided_slice %548 {offsets = [0, 64], sizes = [2, 32], strides = [1, 1]} : vector<2x128xf32> to vector<2x32xf32>
    %552 = vector.extract_strided_slice %547 {offsets = [0, 96], sizes = [2, 32], strides = [1, 1]} : vector<2x128xf32> to vector<2x32xf32>
    %553 = arith.mulf %550, %34 : vector<2x32xf32>
    %554 = arith.mulf %549, %551 : vector<2x32xf32>
    %555 = arith.addf %553, %554 : vector<2x32xf32>
    %556 = math.tanh %555 : vector<2x32xf32>
    %557 = arith.mulf %552, %556 : vector<2x32xf32>
    %558 = tpu.concatenate %538, %557 in 1 : vector<2x32xf32>, vector<2x32xf32> -> vector<2x64xf32>
    %c0_178 = arith.constant 0 : index
    %c0_179 = arith.constant 0 : index
    %c0_180 = arith.constant 0 : index
    %559 = vector.load %arg15[%c0_178, %c0_179, %c0_180] : memref<1x2x64xf32, #tpu.memory_space<vmem>>, vector<1x2x64xf32>
    %560 = vector.shape_cast %559 : vector<1x2x64xf32> to vector<2x64xf32>
    %561 = vector.shape_cast %558 : vector<2x64xf32> to vector<1x2x64xf32>
    tpu.vector_store %arg15[%c0_178, %c0_179, %c0_180], %561 {strides = array<i32>} : memref<1x2x64xf32, #tpu.memory_space<vmem>>, vector<1x2x64xf32>,
    return
  }
  func.func @transform_0(%arg0: i32) -> (i32, i32, i32, i32) {
    %c0_i32 = arith.constant 0 : i32
    %c0_i32_0 = arith.constant 0 : i32
    %c0_i32_1 = arith.constant 0 : i32
    %c0_i32_2 = arith.constant 0 : i32
    return %arg0, %c0_i32, %c0_i32_0, %c0_i32_1 : i32, i32, i32, i32
  }
  func.func @transform_1(%arg0: i32) -> (i32, i32, i32) {
    %c0_i32 = arith.constant 0 : i32
    %c0_i32_0 = arith.constant 0 : i32
    %c0_i32_1 = arith.constant 0 : i32
    return %arg0, %c0_i32, %c0_i32_0 : i32, i32, i32
  }
  func.func @transform_2(%arg0: i32) -> (i32, i32, i32) {
    %c0_i32 = arith.constant 0 : i32
    %c0_i32_0 = arith.constant 0 : i32
    %c0_i32_1 = arith.constant 0 : i32
    return %arg0, %c0_i32, %c0_i32_0 : i32, i32, i32
  }
  func.func @transform_3(%arg0: i32) -> (i32, i32, i32) {
    %c0_i32 = arith.constant 0 : i32
    %c0_i32_0 = arith.constant 0 : i32
    %c0_i32_1 = arith.constant 0 : i32
    return %arg0, %c0_i32, %c0_i32_0 : i32, i32, i32
  }
  func.func @transform_4(%arg0: i32) -> (i32, i32, i32) {
    %c0_i32 = arith.constant 0 : i32
    %c0_i32_0 = arith.constant 0 : i32
    %c0_i32_1 = arith.constant 0 : i32
    return %arg0, %c0_i32, %c0_i32_0 : i32, i32, i32
  }
  func.func @transform_5(%arg0: i32) -> (i32, i32, i32) {
    %c0_i32 = arith.constant 0 : i32
    %c0_i32_0 = arith.constant 0 : i32
    %c0_i32_1 = arith.constant 0 : i32
    return %arg0, %c0_i32, %c0_i32_0 : i32, i32, i32
  }
  func.func @transform_6(%arg0: i32) -> (i32, i32, i32) {
    %c0_i32 = arith.constant 0 : i32
    %c0_i32_0 = arith.constant 0 : i32
    %c0_i32_1 = arith.constant 0 : i32
    return %arg0, %c0_i32, %c0_i32_0 : i32, i32, i32
  }
  func.func @transform_7(%arg0: i32) -> (i32, i32, i32) {
    %c0_i32 = arith.constant 0 : i32
    %c0_i32_0 = arith.constant 0 : i32
    %c0_i32_1 = arith.constant 0 : i32
    return %arg0, %c0_i32, %c0_i32_0 : i32, i32, i32
  }
  func.func @transform_8(%arg0: i32) -> (i32, i32, i32) {
    %c0_i32 = arith.constant 0 : i32
    %c0_i32_0 = arith.constant 0 : i32
    %c0_i32_1 = arith.constant 0 : i32
    return %arg0, %c0_i32, %c0_i32_0 : i32, i32, i32
  }
  func.func @transform_9(%arg0: i32) -> (i32, i32, i32) {
    %c0_i32 = arith.constant 0 : i32
    %c0_i32_0 = arith.constant 0 : i32
    %c0_i32_1 = arith.constant 0 : i32
    return %arg0, %c0_i32, %c0_i32_0 : i32, i32, i32
  }
  func.func @transform_10(%arg0: i32) -> (i32, i32, i32) {
    %c0_i32 = arith.constant 0 : i32
    %c0_i32_0 = arith.constant 0 : i32
    %c0_i32_1 = arith.constant 0 : i32
    return %arg0, %c0_i32, %c0_i32_0 : i32, i32, i32
  }
  func.func @transform_11(%arg0: i32) -> (i32, i32, i32) {
    %c0_i32 = arith.constant 0 : i32
    %c0_i32_0 = arith.constant 0 : i32
    %c0_i32_1 = arith.constant 0 : i32
    return %arg0, %c0_i32, %c0_i32_0 : i32, i32, i32
  }
  func.func @transform_12(%arg0: i32) -> (i32, i32, i32) {
    %c0_i32 = arith.constant 0 : i32
    %c0_i32_0 = arith.constant 0 : i32
    %c0_i32_1 = arith.constant 0 : i32
    return %arg0, %c0_i32, %c0_i32_0 : i32, i32, i32
  }
  func.func @transform_13(%arg0: i32) -> (i32, i32, i32) {
    %c0_i32 = arith.constant 0 : i32
    %c0_i32_0 = arith.constant 0 : i32
    %c0_i32_1 = arith.constant 0 : i32
    return %arg0, %c0_i32, %c0_i32_0 : i32, i32, i32
  }
  func.func @transform_14(%arg0: i32) -> (i32, i32, i32) {
    %c0_i32 = arith.constant 0 : i32
    %c0_i32_0 = arith.constant 0 : i32
    %c0_i32_1 = arith.constant 0 : i32
    return %arg0, %c0_i32, %c0_i32_0 : i32, i32, i32
  }
}

</mosaic_0001>

<bundles_post_ra>
// kernel: classifier_forward.3
= control target key start
LH: loop header
LB: loop body
LE: loop exit
PB: predicated region body
PF: predicated region fallthrough
CT: control target
= control target key end

     0   :  { %v480_v7 = vmov 0.0   ;;  %vm59_vm0 = vcmask 523264   ;;  %s737_s0 = inlined_call_operand.vmem [shape: f32[2,2,64], index: 0, kind: input, shape index: {}]   ;;  %s738_s1 = inlined_call_operand.vmem [shape: f32[64,256], index: 1, kind: input, shape index: {}]   ;;  %s739_s2 = inlined_call_operand.vmem [shape: f32[64,256], index: 2, kind: input, shape index: {}]   ;;  %s740_s3 = inlined_call_operand.vmem [shape: f32[1,256], index: 3, kind: input, shape index: {}]   ;;  %s741_s4 = inlined_call_operand.vmem [shape: f32[256,13], index: 4, kind: input, shape index: {}]   ;;  %s742_s5 = inlined_call_operand.vmem [shape: f32[1,13], index: 5, kind: input, shape index: {}]   ;;  %s743_s6 = inlined_call_operand.hbm [shape: f32[2,13], index: 6, kind: output, shape index: {}]  }
   0x1   :  { %v44_v0 = vld [vmem:[%s739_s2 + $0x8] sm:$0xff]  ;;  %v46_v1 = vld [vmem:[%s739_s2 + $0x18] sm:$0xff]  ;;  %v43_v2 = vld [vmem:[%s739_s2] sm:$0xff]  ;;  %127 = vmatprep.mubr.f32.mxu0 %v480_v7 }
   0x2   :  { %v388_v3 = vpack.c.bf16 %v46_v1, %v44_v0  ;;  %v45_v4 = vld [vmem:[%s739_s2 + $0x10] sm:$0xff]  ;;  %v48_v5 = vld [vmem:[%s739_s2 + $0x28] sm:$0xff]  ;;  %v50_v6 = vld [vmem:[%s739_s2 + $0x38] sm:$0xff] }
   0x3   :  { %v390_v8 = vpack.c.bf16 %v45_v4, %v43_v2  ;;  %v392_v9 = vpack.c.bf16 %v50_v6, %v48_v5  ;;  %v47_v10 = vld [vmem:[%s739_s2 + $0x20] sm:$0xff]  ;;  %v49_v11 = vld [vmem:[%s739_s2 + $0x30] sm:$0xff]  ;;  %v52_v12 = vld [vmem:[%s739_s2 + $0x48] sm:$0xff] }
   0x4   :  { %389 = vmatprep.subr.bf16.mxu0 %v388_v3  ;;  %v54_v13 = vld [vmem:[%s739_s2 + $0x58] sm:$0xff]  ;;  %v394_v14 = vpack.c.bf16 %v49_v11, %v47_v10  ;;  %v51_v16 = vld [vmem:[%s739_s2 + $0x40] sm:$0xff]  ;;  %v53_v17 = vld [vmem:[%s739_s2 + $0x50] sm:$0xff] }
   0x5   :  { %391 = vmatpush1.bf16.msra.mxu0 %v390_v8  ;;  %v396_v15 = vpack.c.bf16 %v54_v13, %v52_v12  ;;  %v56_v18 = vld [vmem:[%s739_s2 + $0x68] sm:$0xff]  ;;  %v58_v19 = vld [vmem:[%s739_s2 + $0x78] sm:$0xff]  ;;  %v398_v20 = vpack.c.bf16 %v53_v17, %v51_v16  ;;  %v55_v22 = vld [vmem:[%s739_s2 + $0x60] sm:$0xff] }
   0x6   :  { %393 = vmatprep.subr.bf16.mxu0 %v392_v9  ;;  %v400_v21 = vpack.c.bf16 %v58_v19, %v56_v18  ;;  %v57_v23 = vld [vmem:[%s739_s2 + $0x70] sm:$0xff]  ;;  %v26_v24 = vld [vmem:[%s738_s1 + $0x8] sm:$0xff]  ;;  %v28_v25 = vld [vmem:[%s738_s1 + $0x18] sm:$0xff] }
   0x7   :  { %v25_v26 = vld [vmem:[%s738_s1] sm:$0xff]  ;;  %v27_v27 = vld [vmem:[%s738_s1 + $0x10] sm:$0xff]  ;;  %v241_v29 = vld [vmem:[%s741_s4 + $0x88] sm:$0xff]  ;;  %v402_v30 = vpack.c.bf16 %v57_v23, %v55_v22  ;;  %v404_v36 = vpack.c.bf16 %v28_v25, %v26_v24 }
   0x8   :  { %v240_v28 = vld [vmem:[%s741_s4 + $0x80] sm:$0xff]  ;;  %v30_v31 = vld [vmem:[%s738_s1 + $0x28] sm:$0xff]  ;;  %v242_v35 = vld [vmem:[%s741_s4 + $0x90] sm:$0xff]  ;;  %v406_v47 = vpack.c.bf16 %v27_v27, %v25_v26 }
   0x9   :  { %395 = vmatpush1.bf16.msra.mxu0 %v394_v14  ;;  %v420_v32 = vpack.c.bf16 %v241_v29, %v240_v28  ;;  %v224_v33 = vld [vmem:[%s741_s4] sm:$0xff]  ;;  %v225_v34 = vld [vmem:[%s741_s4 + $0x8] sm:$0xff]  ;;  %v243_v38 = vld [vmem:[%s741_s4 + $0x98] sm:$0xff] }
   0xa   :  { %397 = vmatprep.subr.bf16.mxu0 %v396_v15  ;;  %v422_v37 = vpack.c.bf16 %v225_v34, %v224_v33  ;;  %v226_v39 = vld [vmem:[%s741_s4 + $0x10] sm:$0xff]  ;;  %v227_v40 = vld [vmem:[%s741_s4 + $0x18] sm:$0xff]  ;;  %v424_v42 = vpack.c.bf16 %v243_v38, %v242_v35  ;;  %v244_v43 = vld [vmem:[%s741_s4 + $0xa0] sm:$0xff] }
   0xb   :  { %v32_v41 = vld [vmem:[%s738_s1 + $0x38] sm:$0xff]  ;;  %421 = vmatprep.subr.bf16.mxu1 %v420_v32  ;;  %v245_v44 = vld [vmem:[%s741_s4 + $0xa8] sm:$0xff]  ;;  %v349_v45 = vld [vmem:[%s737_s0 + $0x2] sm:$0x3]  ;;  %v426_v46 = vpack.c.bf16 %v227_v40, %v226_v39 }
   0xc   :  { %423 = vmatpush3.bf16.msra.mxu1 %v422_v37  ;;  %v29_v48 = vld [vmem:[%s738_s1 + $0x20] sm:$0xff]  ;;  %v229_v50 = vld [vmem:[%s741_s4 + $0x28] sm:$0xff]  ;;  %v408_v51 = vpack.c.bf16 %v32_v41, %v30_v31  ;;  %v31_v52 = vld [vmem:[%s738_s1 + $0x30] sm:$0xff]  ;;  %v428_v53 = vpack.c.bf16 %v245_v44, %v244_v43 }
   0xd   :  { %399 = vmatpush1.bf16.msra.mxu0 %v398_v20  ;;  %425 = vmatprep.subr.bf16.mxu1 %v424_v42  ;;  %v228_v49 = vld [vmem:[%s741_s4 + $0x20] sm:$0xff]  ;;  %v246_v54 = vld [vmem:[%s741_s4 + $0xb0] sm:$0xff]  ;;  %v247_v55 = vld [vmem:[%s741_s4 + $0xb8] sm:$0xff]  ;;  %v410_v60 = vpack.c.bf16 %v31_v52, %v29_v48 }
   0xe   :  { %401 = vmatprep.subr.bf16.mxu0 %v400_v21  ;;  %v34_v56 = vld [vmem:[%s738_s1 + $0x48] sm:$0xff]  ;;  %v36_v57 = vld [vmem:[%s738_s1 + $0x58] sm:$0xff]  ;;  %v33_v58 = vld [vmem:[%s738_s1 + $0x40] sm:$0xff]  ;;  %v430_v59 = vpack.c.bf16 %v229_v50, %v228_v49  ;;  %v432_v61 = vpack.c.bf16 %v247_v55, %v246_v54 }
   0xf   :  { %v230_v62 = vld [vmem:[%s741_s4 + $0x30] sm:$0xff]  ;;  %v231_v63 = vld [vmem:[%s741_s4 + $0x38] sm:$0xff] }
  0x10   :  { %427 = vmatpush3.bf16.msra.mxu1 %v426_v46 }
  0x11   :  { %403 = vmatpush1.bf16.msra.mxu0 %v402_v30 }
  0x12   :  { %405 = vmatprep.subr.bf16.mxu0 %v404_v36 }
  0x14   :  { %350 = vmatmul.mubr.msk.f32.vlgmr.msra.gmra.mrb[0].mxu0 %vm59_vm0, %v349_v45 }
  0x15   :  { %407 = vmatpush1.bf16.msra.mxu0 %v406_v47  ;;  %201 = vmatprep.mubr.f32.mxu0 %v480_v7 }
  0x16   :  { %11 = vsyncpa [#allocation3], 0  ;;  %409 = vmatprep.subr.bf16.mxu0 %v408_v51  ;;  %v412_v0 = vpack.c.bf16 %v36_v57, %v34_v56  ;;  %v35_v1 = vld [vmem:[%s738_s1 + $0x50] sm:$0xff]  ;;  %429 = vmatprep.subr.bf16.mxu1 %v428_v53  ;;  %v248_v2 = vld [vmem:[%s741_s4 + $0xc0] sm:$0xff]  ;;  %v434_v6 = vpack.c.bf16 %v231_v63, %v230_v62  ;;  %v210_v35 = vlaneseq  ;;  %s481_s30 = smov [#allocation2]   ;;  %vm333_vm1 = vcmask 99328  }
  0x17   :  { %v249_v3 = vld [vmem:[%s741_s4 + $0xc8] sm:$0xff]  ;;  %v40_v5 = vld [vmem:[%s738_s1 + $0x78] sm:$0xff]  ;;  %431 = vmatpush3.bf16.msra.mxu1 %v430_v59  ;;  %v414_v7 = vpack.c.bf16 %v35_v1, %v33_v58  ;;  %v37_v8 = vld [vmem:[%s738_s1 + $0x60] sm:$0xff]  ;;  %s341_s7 = sshll.u32 %s481_s30, 4  ;;  %s342_s7 = int_to_ptr.vmem [resolvable:$true] %s341_s7 }
  0x18   :  { %v38_v4 = vld [vmem:[%s738_s1 + $0x68] sm:$0xff]  ;;  %433 = vmatprep.subr.bf16.mxu1 %v432_v61  ;;  %v436_v9 = vpack.c.bf16 %v249_v3, %v248_v2  ;;  %v232_v10 = vld [vmem:[%s741_s4 + $0x40] sm:$0xff]  ;;  %v39_v13 = vld [vmem:[%s738_s1 + $0x70] sm:$0xff]  ;;  %v211_v36 = vshrl.u32 %v210_v35, 7  ;;  %p461_p1 = scmp.lt.s32.totalorder %s342_s7, %s342_s7 }
  0x19   :  { %411 = vmatpush1.bf16.msra.mxu0 %v410_v60  ;;  %v233_v11 = vld [vmem:[%s741_s4 + $0x48] sm:$0xff]  ;;  %v416_v12 = vpack.c.bf16 %v40_v5, %v38_v4  ;;  %v250_v14 = vld [vmem:[%s741_s4 + $0xd0] sm:$0xff]  ;;  %v251_v15 = vld [vmem:[%s741_s4 + $0xd8] sm:$0xff]  ;;  %v418_v17 = vpack.c.bf16 %v39_v13, %v37_v8 }
  0x1a   :  { %413 = vmatprep.subr.bf16.mxu0 %v412_v0  ;;  %v438_v16 = vpack.c.bf16 %v233_v11, %v232_v10  ;;  %v440_v18 = vpack.c.bf16 %v251_v15, %v250_v14  ;;  %v234_v19 = vld [vmem:[%s741_s4 + $0x50] sm:$0xff]  ;;  %v235_v20 = vld [vmem:[%s741_s4 + $0x58] sm:$0xff]  ;;  %v252_v21 = vld [vmem:[%s741_s4 + $0xe0] sm:$0xff]  ;;  %v212_v37 = vsub.s32 0, %v211_v36  ;;  %v216_v39 = vsub.s32 1, %v211_v36 }
  0x1b   :  { %435 = vmatpush3.bf16.msra.mxu1 %v434_v6  ;;  %v253_v22 = vld [vmem:[%s741_s4 + $0xe8] sm:$0xff]  ;;  %v442_v23 = vpack.c.bf16 %v235_v20, %v234_v19  ;;  %v24_v24 = vld [vmem:[%s737_s0] sm:$0x3]  ;;  %v254_v29 = vld [vmem:[%s741_s4 + $0xf0] sm:$0xff] }
  0x1c   :  { %437 = vmatprep.subr.bf16.mxu1 %v436_v9  ;;  %v444_v25 = vpack.c.bf16 %v253_v22, %v252_v21  ;;  %v236_v26 = vld [vmem:[%s741_s4 + $0x60] sm:$0xff]  ;;  %v237_v27 = vld [vmem:[%s741_s4 + $0x68] sm:$0xff]  ;;  %v255_v30 = vld [vmem:[%s741_s4 + $0xf8] sm:$0xff] }
  0x1d   :  { %415 = vmatpush1.bf16.msra.mxu0 %v414_v7  ;;  %v446_v28 = vpack.c.bf16 %v237_v27, %v236_v26  ;;  %v448_v31 = vpack.c.bf16 %v255_v30, %v254_v29  ;;  %v238_v32 = vld [vmem:[%s741_s4 + $0x70] sm:$0xff]  ;;  %v239_v33 = vld [vmem:[%s741_s4 + $0x78] sm:$0xff]  ;;  %v208_v38 = vld [vmem:[%s740_s3] sm:$0x3]  ;;  %s456_s3 = scalar_lea.vmem %s342_s7, 32 }
  0x1e   :  { %417 = vmatprep.subr.bf16.mxu0 %v416_v12  ;;  %v450_v34 = vpack.c.bf16 %v239_v33, %v238_v32  ;;  %v213_v40 = vrot.slane %v208_v38, %v212_v37  ;;  %v217_v41 = vrot.slane %v208_v38, %v216_v39  ;;  %v352_v49 = vld [vmem:[%s742_s5] ss:$0 sm:$0xff]  ;;  %p457_p0 = scmp.ne.s32.totalorder %s342_s7, %s456_s3  ;;  %p462_p2 = scmp.lt.s32.totalorder %s456_s3, %s456_s3 }
  0x1f   :  { %439 = vmatpush3.bf16.msra.mxu1 %v438_v16 }
  0x20   :  { %441 = vmatprep.subr.bf16.mxu1 %v440_v18  ;;  %p463_p3 = por %p462_p2, %p461_p1 }
  0x21   :  { %419 = vmatpush1.bf16.msra.mxu0 %v418_v17 }
  0x22   :  { %p464_p4 = pnand %p463_p3, %p457_p0 }
  0x23   :  { %443 = vmatpush3.bf16.msra.mxu1 %v442_v23 }
  0x24   :  { %351 = vmatmul.mubr.msk.f32.vlgmr.msra.gmra.mrb[0].mxu0 %vm59_vm0, %v24_v24  ;;  %445 = vmatprep.subr.bf16.mxu1 %v444_v25 }
  0x27   :  { %447 = vmatpush3.bf16.msra.mxu1 %v446_v28 }
  0x28   :  { %449 = vmatprep.subr.bf16.mxu1 %v448_v31 }
  0x2b   :  { %451 = vmatpush3.bf16.msra.mxu1 %v450_v34 }
  0xf7   :  { %v203_v42 = vpop.f32.mrb[0].mxu0 }
  0xf8   :  { %v220_v43 = vadd.f32 %v213_v40, %v203_v42  ;;  %v205_v44 = vpop.f32.mrb[1].mxu0 }
  0xf9   :  { %v221_v45 = vadd.f32 %v217_v41, %v205_v44 }
  0xfa   :  { %v222_v47 = vmax.f32 %v220_v43, 0.0 }
  0xfb   :  { %v223_v46 = vmax.f32 %v221_v45, 0.0 }
  0xfd   :  { %327 = vmatprep.mubr.f32.mxu1 %v223_v46 }
  0xfe   :  { %328 = vmatmul.mubr.f32.vlgmr.msra.gmra.mrb[0].mxu1 %v222_v47 }
 0x1d1   :  { %v385_v48 = vpop.f32.mrb[0].mxu1 }
 0x1d2   :  { %v386_v50 = vpop.f32.mrb[1].mxu1 }
 0x1d3   :  { %v387_v51 = vadd.f32 %v386_v50, %v385_v48 }
 0x1d5   :  { %v330_v52 = vadd.f32 %v387_v51, %v352_v49 }
 0x1d7   :  { %334 = vst.msk [vmem:[#allocation2] sm:$0x3] %vm333_vm1, %v330_v52 }
 0x1d8   :  { %467 = shalt.err (!%p464_p4)
}
 0x1d9   :  { %s468_s10 = scalar_lea.hbm %s743_s6, 32 }
 0x1da   :  { %p469_p5 = scmp.ne.s32.totalorder %s743_s6, %s468_s10  ;;  %p472_p6 = scmp.lt.u32.totalorder %s468_s10, %s743_s6 }
 0x1dc   :  { %p474_p7 = pnand %p472_p6, %p469_p5 }
 0x1de   :  { %477 = shalt.err (!%p474_p7)
}
 0x1df   :  { %344 = dma.vmem_to_hbm [thread:$0]  %s342_s7, 32, %s743_s6, [#allocation3]  }
 0x1e0   :  { %478 = dma.done.wait [#allocation3], 32  }
 0x1e1   :  { %479 = vsyncadd [#allocation3], 4294967264 }
 0x1e2   :  { %348 = vsyncpa [#allocation3], 1 }

// kernel: classifier_forward.2
= control target key start
LH: loop header
LB: loop body
LE: loop exit
PB: predicated region body
PF: predicated region fallthrough
CT: control target
= control target key end

     0   :  { %s8617_s0 = inlined_call_operand.vmem [shape: f32[2,8,2,12], index: 0, kind: input, shape index: {}]   ;;  %s8618_s1 = inlined_call_operand.vmem [shape: f32[2,12,128], index: 1, kind: input, shape index: {}]   ;;  %s8619_s2 = inlined_call_operand.vmem [shape: f32[2,32,128], index: 2, kind: input, shape index: {}]   ;;  %s8620_s3 = inlined_call_operand.hbm [shape: f32[2,1,128], index: 3, kind: input, shape index: {}]   ;;  %s8621_s4 = inlined_call_operand.vmem [shape: f32[2,12,128], index: 4, kind: input, shape index: {}]   ;;  %s8622_s5 = inlined_call_operand.vmem [shape: f32[2,32,128], index: 5, kind: input, shape index: {}]   ;;  %s8623_s6 = inlined_call_operand.vmem [shape: f32[2,1,128], index: 6, kind: input, shape index: {}]   ;;  %s8624_s7 = inlined_call_operand.vmem [shape: f32[2,32,128], index: 7, kind: input, shape index: {}]   ;;  %s8625_s8 = inlined_call_operand.vmem [shape: f32[2,32,128], index: 8, kind: input, shape index: {}]   ;;  %s8626_s9 = inlined_call_operand.vmem [shape: f32[2,32,128], index: 9, kind: input, shape index: {}]   ;;  %s8627_s10 = inlined_call_operand.vmem [shape: f32[2,1,128], index: 10, kind: input, shape index: {}]   ;;  %s8628_s11 = inlined_call_operand.hbm [shape: f32[2,32,128], index: 11, kind: input, shape index: {}]   ;;  %s8629_s12 = inlined_call_operand.hbm [shape: f32[2,32,128], index: 12, kind: input, shape index: {}]   ;;  %s8630_s13 = inlined_call_operand.vmem [shape: f32[2,1,128], index: 13, kind: input, shape index: {}]   ;;  %s8631_s14 = inlined_call_operand.vmem [shape: f32[2,2,64], index: 14, kind: output, shape index: {}]  }
   0x1   :  { %8642 = sst [smem:[#allocation12_spill]] %s8626_s9 }
   0x2   :  { %8643 = sst [smem:[#allocation13_spill]] %s8627_s10 }
   0x3   :  { %8644 = sst [smem:[#allocation14_spill]] %s8628_s11 }
   0x4   :  { %8645 = sst [smem:[#allocation15_spill]] %s8630_s13 }
   0x5   :  { %8646 = sst [smem:[#allocation16_spill]] %s8631_s14 }
   0x6   :  { %19 = vsyncpa [#allocation3], 0 }
   0x7   :  { %21 = vsyncpa [#allocation3 + $0x1], 0 }
   0x8   :  { %22 = vsyncpa [#allocation5], 0 }
   0x9   :  { %24 = vsyncpa [#allocation5 + $0x1], 0  ;;  %s7689_s29 = smov 0   ;;  %s7691_s30 = smov 0  }
   0xa   :  { %s7693_s15 = smov 0   ;;  %s7695_s16 = smov 0  }
   0xb LB: > { %8647 = sst [smem:[#allocation9_spill]] %s7597_s15  ;;  %s7708_s17 = sadd.s32 4294967295, %s7601_s16   ;;  %s7601_s16 = sphi %s7695_s16, %s8668_s16   ;;  %s7597_s15 = sphi %s7693_s15, %s8670_s15   ;;  %s7593_s30 = sphi %s7691_s30, %s8672_s30   ;;  %s7589_s29 = sphi %s7689_s29, %s8671_s29  }
   0xc   : > { %s7711_s18 = sadd.s32 1, %s7601_s16   ;;  %s115_s20 = sadd.s32 1, %s7597_s15 }
   0xd   : > { %8648 = sst [smem:[#allocation10_spill]] %s7711_s18  ;;  %s112_s19 = ssub.s32 %s7601_s16, %s7711_s18 }
   0xe   : > { %p113_p0 = scmp.eq.s32.totalorder %s112_s19, 0  ;;  %p122_p1 = scmp.ne.s32.totalorder %s7597_s15, %s7593_s30 }
   0xf   : > { %p123_p2 = scmp.eq.s32.totalorder %s7601_s16, 0  ;;  %p128_p3 = scmp.ne.s32.totalorder %s7593_s30, %s7589_s29 }
  0x10   : > { %s7721_s21 = scalar_select %p113_p0, %s7597_s15, %s115_s20  }
  0x11   : > { %p124_p4 = por %p123_p2, %p122_p1  ;;  %p129_p5 = scmp.eq.s32.totalorder %s7708_s17, 0 }
  0x12   : > { %8649 = sst [smem:[#allocation11_spill]] %s7721_s21  ;;  %p7230_p6 = scmp.lt.s32.totalorder %s7601_s16, 2 }
  0x13   : > { %p7725_p7 = por %p129_p5, %p128_p3  ;;  %s7730_s23 = sand.u32 1, %s7597_s15  }
  0x14   : > { %p7732_p8 = pnand %p7230_p6, %p124_p4  ;;  %s531_s25 = sand.u32 1, %s7601_s16  }
  0x15   : > { %s8650_s22 = scalar_select %p7725_p7, 1, 0 }
  0x16   : > { %s8651_s24 = scalar_select %p7732_p8, 1, 0 }
  0x17   : > { %s8635_s26 = sshll.u32 %s7730_s23, 5  ;;  %s8636_s27 = sshll.u32 %s7601_s16, 9 }
  0x18   : > { %s535_s28 = scalar_lea.vmem [#allocation4], %s8635_s26  ;;  %s8652_s11 = sld [smem:[#allocation14_spill]] }
  0x19   : > { %s542_s29 = sshll.u32 %s535_s28, 4  ;;  %s7750_s15 = scalar_lea.sflag [#allocation5], %s531_s25  ;;  %s7748_s29 = int_to_ptr.vmem [resolvable:$true] %s542_s29 }
  0x1a   : > { %p7756_p10 = pneg %p7732_p8 }
  0x1e   : > { %s7746_s21 = scalar_lea.hbm %s8652_s11, %s8636_s27  ;;  %s7478_s20 = scalar_lea.hbm %s8652_s11, 1024 }
  0x1f   : > { %s7473_s18 = scalar_lea.hbm %s7746_s21, 512  ;;  %p7479_p13 = scmp.lt.u32.totalorder %s7746_s21, %s8652_s11 }
  0x20   : > { %p7474_p9 = scmp.ne.s32.totalorder %s7746_s21, %s7473_s18  ;;  %p7480_p0 = scmp.lt.u32.totalorder %s7478_s20, %s7473_s18 }
  0x21   : > { %p7482_p2 = scmp.lt.u32.totalorder %s7473_s18, %s7746_s21 }
  0x22   : > { %p7476_p11 = pnand %p7756_p10, %p7474_p9  ;;  %p7481_p1 = por %p7480_p0, %p7479_p13 }
  0x24   : > { %p7477_p12 = pneg %p7476_p11  ;;  %p7483_p3 = por %p7482_p2, %p7481_p1 }
  0x26   : > { %p7484_p4 = pnand %p7483_p3, %p7477_p12 }
  0x28   : > { %7487 = shalt.err (!%p7484_p4)
}
  0x29   : > { %s7488_s25 = scalar_lea.vmem %s7748_s29, 512  ;;  %s7603_s28 = smov [#allocation4]  }
  0x2a   : > { %p7489_p5 = scmp.ne.s32.totalorder %s7748_s29, %s7488_s25  ;;  %s7493_s19 = sshll.u32 %s7603_s28, 4  ;;  %s7494_s19 = int_to_ptr.vmem [resolvable:$false] %s7493_s19 }
  0x2b   : > { %s7495_s14 = scalar_lea.vmem %s7494_s19, 1024  ;;  %p7496_p11 = scmp.lt.s32.totalorder %s7748_s29, %s7494_s19 }
  0x2c   : > { %p7491_p6 = pnand %p7489_p5, %p7756_p10  ;;  %p7497_p7 = scmp.lt.s32.totalorder %s7495_s14, %s7488_s25 }
  0x2e   : > { %p7492_p9 = pneg %p7491_p6  ;;  %p7498_p13 = por %p7497_p7, %p7496_p11 }
  0x30   : > { %p7499_p0 = pnand %p7498_p13, %p7492_p9 }
  0x32   : > { %7502 = shalt.err (!%p7499_p0)
}
  0x33   : > { %s8638_s18 = smov 128   ;;  %s8639_s27 = smov 8  }
  0x34   : > { %7226 = dma.hbm_to_vmem [thread:$0]  (!%p7732_p8), %s7746_s21, 512, %s7748_s29, %s7750_s15, %s8638_s18, %s8638_s18, %s8639_s27  }
  0x35   : > { %s8654_s20 = sshll.u32 %s7601_s16, 9  ;;  %s8655_s14 = sshll.u32 %s7730_s23, 5 }
  0x36   : > { %s7788_s19 = scalar_lea.hbm %s8629_s12, %s8654_s20  ;;  %s556_s11 = scalar_lea.vmem [#allocation6], %s8655_s14 }
  0x37   : > { %s563_s13 = sshll.u32 %s556_s11, 4  ;;  %p5927_p7 = scmp.ge.s32.totalorder %s7601_s16, 1  ;;  %s7793_s13 = int_to_ptr.vmem [resolvable:$true] %s563_s13 }
  0x38   : > { %p577_p12 = scmp.lt.s32.totalorder %s7601_s16, 3  ;;  %s5920_s9 = sshll.u32 %s7601_s16, 4 }
  0x39   : > { %s7804_s18 = scalar_lea.hbm %s8620_s3, %s5920_s9  ;;  %s465_s20 = scalar_lea.vmem [#allocation2], %s7730_s23 }
  0x3a   : > { %p7796_p1 = pnand %p5927_p7, %p577_p12  ;;  %s472_s11 = sshll.u32 %s465_s20, 4  ;;  %s473_s11 = int_to_ptr.vmem [resolvable:$true] %s472_s11 }
  0x3b   : > { %s463_s25 = scalar_lea.sflag [#allocation3], %s7730_s23  ;;  %s7503_s28 = scalar_lea.hbm %s7804_s18, 16 }
  0x3c   : > { %s8656_s10 = scalar_select %p7796_p1, 1, 0 }
  0x3d   : > { %p7504_p2 = scmp.ne.s32.totalorder %s7804_s18, %s7503_s28  ;;  %s7508_s27 = scalar_lea.hbm %s8620_s3, 32 }
  0x3e   : > { %p7509_p5 = scmp.lt.u32.totalorder %s7804_s18, %s8620_s3  ;;  %p7510_p6 = scmp.lt.u32.totalorder %s7508_s27, %s7503_s28 }
  0x3f   : > { %p7506_p3 = pnand %p7504_p2, %p7756_p10  ;;  %p7512_p11 = scmp.lt.u32.totalorder %s7503_s28, %s7804_s18 }
  0x40   : > { %p7511_p9 = por %p7510_p6, %p7509_p5 }
  0x41   : > { %p7507_p4 = pneg %p7506_p3 }
  0x42   : > { %p7513_p13 = por %p7512_p11, %p7511_p9 }
  0x44   : > { %p7514_p0 = pnand %p7513_p13, %p7507_p4 }
  0x46   : > { %7517 = shalt.err (!%p7514_p0)
}
  0x47   : > { %s7518_s23 = scalar_lea.vmem %s473_s11, 16  ;;  %s7606_s29 = smov [#allocation2]  }
  0x48   : > { %p7519_p7 = scmp.ne.s32.totalorder %s473_s11, %s7518_s23  ;;  %s7523_s20 = sshll.u32 %s7606_s29, 4  ;;  %s7524_s20 = int_to_ptr.vmem [resolvable:$false] %s7523_s20 }
  0x49   : > { %s7525_s14 = scalar_lea.vmem %s7524_s20, 32  ;;  %p7526_p3 = scmp.lt.s32.totalorder %s473_s11, %s7524_s20 }
  0x4a   : > { %p7521_p12 = pnand %p7519_p7, %p7756_p10  ;;  %p7527_p1 = scmp.lt.s32.totalorder %s7525_s14, %s7518_s23 }
  0x4c   : > { %p7522_p2 = pneg %p7521_p12  ;;  %p7528_p8 = por %p7527_p1, %p7526_p3 }
  0x4e   : > { %p7529_p5 = pnand %p7528_p8, %p7522_p2 }
  0x50   : > { %7532 = shalt.err (!%p7529_p5)
}
  0x51   : > { %p8657_p6 = scmp.ne.s32.totalorder %s8651_s24, 0  ;;  %s7533_s27 = scalar_lea.hbm %s7788_s19, 512 }
  0x52   : > { %p7534_p4 = scmp.ne.s32.totalorder %s7788_s19, %s7533_s27  ;;  %s7538_s21 = scalar_lea.hbm %s8629_s12, 1024 }
  0x53   : > { %7223 = dma.hbm_to_vmem [thread:$0]  (!%p8657_p6), %s7804_s18, 16, %s473_s11, %s463_s25  }
  0x54   : > { %p7536_p9 = pnand %p7534_p4, %p7756_p10  ;;  %p7539_p8 = scmp.lt.u32.totalorder %s7788_s19, %s8629_s12 }
  0x55   : > { %p7540_p1 = scmp.lt.u32.totalorder %s7538_s21, %s7533_s27  ;;  %p7542_p0 = scmp.lt.u32.totalorder %s7533_s27, %s7788_s19 }
  0x56   : > { %p7537_p11 = pneg %p7536_p9 }
  0x57   : > { %p7541_p13 = por %p7540_p1, %p7539_p8 }
  0x59   : > { %p7543_p7 = por %p7542_p0, %p7541_p13 }
  0x5b   : > { %p7544_p12 = pnand %p7543_p7, %p7537_p11 }
  0x5d   : > { %7547 = shalt.err (!%p7544_p12)
}
  0x5e   : > { %s7548_s18 = scalar_lea.vmem %s7793_s13, 512  ;;  %s7607_s11 = smov [#allocation6]  }
  0x5f   : > { %p7549_p2 = scmp.ne.s32.totalorder %s7793_s13, %s7548_s18  ;;  %s7553_s25 = sshll.u32 %s7607_s11, 4  ;;  %s7554_s25 = int_to_ptr.vmem [resolvable:$false] %s7553_s25 }
  0x60   : > { %s7555_s29 = scalar_lea.vmem %s7554_s25, 1024  ;;  %p7556_p4 = scmp.lt.s32.totalorder %s7793_s13, %s7554_s25 }
  0x61   : > { %p7551_p3 = pnand %p7549_p2, %p7756_p10  ;;  %p7557_p9 = scmp.lt.s32.totalorder %s7555_s29, %s7548_s18 }
  0x63   : > { %p7552_p5 = pneg %p7551_p3  ;;  %p7558_p8 = por %p7557_p9, %p7556_p4 }
  0x65   : > { %p7559_p1 = pnand %p7558_p8, %p7552_p5 }
  0x67   : > { %7562 = shalt.err (!%p7559_p1)
}
  0x68   : > { %s8658_s20 = smov 8   ;;  %s8659_s14 = smov 128  }
  0x69   : > { %7229 = dma.hbm_to_vmem [thread:$0]  (!%p8657_p6), %s7788_s19, 512, %s7793_s13, %s7750_s15, %s8659_s14, %s8659_s14, %s8658_s20  }
  0x6a   : > { %p8660_p10 = scmp.ne.s32.totalorder %s8656_s10, 0 }
  0x6b   : > { %s7853_s26 = sand.u32 (!%p8660_p10), 1, %s7593_s30   ;;  %p8661_p11 = scmp.ne.s32.totalorder (!%p8660_p10), %s8650_s22, 0 }
  0x6c   : > { %581 = sbr.rel (%p8660_p10) target bundleno = 16348 (0x3fdc), region = 76  ;;  %s584_s27 = scalar_lea.sflag (!%p8660_p10), [#allocation3], %s7853_s26 }
  0x6d   : > { %s586_s28 = scalar_lea.vmem (!%p8660_p10), [#allocation2], %s7853_s26 }
  0x73   : > { %7580 = dma.done.wait (%p8661_p11), %s584_s27, 16  }
  0x74   : > { %7582 = vsyncadd (%p8661_p11), %s584_s27, 4294967280  ;;  %s591_s13 = sand.u32 1, %s7708_s17   ;;  %s5928_s10 = sshll.u32 %s7853_s26, 5 }
  0x75   : > { %s592_s15 = scalar_lea.sflag [#allocation5], %s591_s13  ;;  %s7865_s24 = scalar_lea.vmem [#allocation4], %s5928_s10 }
  0x76   : > { %7584 = dma.done.wait (%p8661_p11), %s592_s15, 1024  }
  0x77   : > { %7586 = vsyncadd (%p8661_p11), %s592_s15, 4294966272  ;;  %p706_p6 = scmp.lt.s32.totalorder %s7708_s17, 1  ;;  %v7608_v0 = vmov 0.0|0.0   ;;  %vm7609_vm0 = vmmov 0   ;;  %v7610_v1 = vmov 0.0   ;;  %vm898_vm1 = vcmask 1043456  }
  0x78   : > { %6898 = vmatprep.subr.bf16.mxu0 %v7608_v0  ;;  %6904 = vmatprep.subr.bf16.mxu1 %v7608_v0  ;;  %vm7611_vm2 = vmmov 1   ;;  %vm894_vm4 = vcmask 97280   ;;  %v7936_v15 = vld [vmem:[%s586_s28] ss:$0 sm:$0xff]  ;;  %s7612_s14 = smov 64   ;;  %s7613_s27 = smov 32  }
  0x79   : > { %s8674_s17 = smov (!%p706_p6, %s7708_s17), 1  ;;  %6339 = vmatprep.mubr.msk.f32.mxu1 %vm7609_vm0, %v7610_v1  ;;  %6332 = vmatprep.mubr.msk.f32.mxu0 %vm7609_vm0, %v7610_v1  ;;  %vm7895_vm3 = vmpackc.low %vm898_vm1, %vm7611_vm2  ;;  %vm820_vm5 = vcmask 261120   ;;  %vm5687_vm6 = vcmask 517120  }
  0x7a   : > { %s7882_s22 = sshll.u32 %s8674_s17, 5  ;;  %s7885_s19 = sshll.u32 %s8674_s17, 4 }
  0x7b   : > { %s720_s9 = scalar_lea.vmem %s8619_s2, %s7882_s22  ;;  %s715_s11 = scalar_lea.vmem %s8618_s1, %s7885_s19 }
  0x7c   : > { %v761_v3 = vld [vmem:[%s720_s9] sm:$0xff]  ;;  %v762_v4 = vld [vmem:[%s720_s9 + $0x8] sm:$0xff]  ;;  %v763_v8 = vld [vmem:[%s720_s9 + $0x10] sm:$0xff]  ;;  %s7905_s20 = scalar_lea.vmem %s8617_s0, %s7885_s19  ;;  %s730_s16 = scalar_lea.vmem %s8622_s5, %s7882_s22 }
  0x7d   : > { %v759_v5 = vld [vmem:[%s715_s11] sm:$0xff]  ;;  %v7899_v6 = vpack.c.bf16 %v762_v4, %v761_v3  ;;  %v760_v7 = vld [vmem:[%s715_s11 + $0x8] sm:$0xf]  ;;  %v764_v9 = vld [vmem:[%s720_s9 + $0x18] sm:$0xff]  ;;  %s725_s23 = scalar_lea.vmem %s8621_s4, %s7885_s19  ;;  %s733_s11 = scalar_lea.vmem %s8623_s6, %s8674_s17 }
  0x7e   : > { %v7907_v10 = vpack.c.bf16 %v760_v7, %v759_v5  ;;  %v7910_v11 = vpack.c.bf16 %v764_v9, %v763_v8  ;;  %v819_v12 = vld [vmem:[%s7905_s20] sm:$0x3]  ;;  %v7942_v30 = vld [vmem:[%s7905_s20 + $0x2] sm:$0x3]  ;;  %v7968_v51 = vld [vmem:[%s7905_s20 + $0x4] sm:$0x3] }
  0x7f   : > { %6900 = vmatpush3.bf16.msra.mxu0 %v7899_v6 }
  0x80   : > { %6901 = vmatprep.subr.bf16.mxu0 %v7608_v0  ;;  %6907 = vmatpush3.bf16.msk.msra.mxu1 %vm7895_vm3, %v7907_v10 }
  0x81   : > { %6908 = vmatprep.subr.bf16.mxu1 %v7608_v0 }
  0x83   : > { %6903 = vmatpush3.bf16.msra.mxu0 %v7910_v11  ;;  %6340 = vmatmul.mubr.msk.f32.vlgmr.msra.gmra.mrb[0].mxu1 %vm894_vm4, %v819_v12 }
  0x84   : > { %6910 = vmatpush3.bf16.msra.mxu1 %v7899_v6  ;;  %6914 = vmatprep.subr.bf16.mxu0 %v7608_v0 }
  0x85   : > { %6911 = vmatprep.subr.bf16.mxu1 %v7608_v0  ;;  %6350 = vmatprep.mubr.msk.f32.mxu1 %vm7609_vm0, %v7610_v1 }
  0x86   : > { %6333 = vmatmul.mubr.f32.vlgmr.msra.gmra.mrb[0].mxu0 %v7610_v1 }
  0x87   : > { %6917 = vmatpush3.bf16.msk.msra.mxu0 %vm7895_vm3, %v7907_v10  ;;  %6357 = vmatprep.mubr.msk.f32.mxu0 %vm7609_vm0, %v7610_v1 }
  0x88   : > { %6913 = vmatpush3.bf16.msra.mxu1 %v7910_v11  ;;  %6918 = vmatprep.subr.bf16.mxu0 %v7608_v0 }
  0x89   : > { %6924 = vmatprep.subr.bf16.mxu1 %v7608_v0 }
  0x8a   : > { %6358 = vmatmul.mubr.msk.f32.vlgmr.msra.gmra.mrb[2].mxu0 %vm894_vm4, %v7942_v30 }
  0x8b   : > { %6920 = vmatpush3.bf16.msra.mxu0 %v7899_v6  ;;  %6368 = vmatprep.mubr.msk.f32.mxu0 %vm7609_vm0, %v7610_v1 }
  0x8c   : > { %6921 = vmatprep.subr.bf16.mxu0 %v7608_v0 }
  0x8f   : > { %6923 = vmatpush3.bf16.msra.mxu0 %v7910_v11 }
  0x90   : > { %6934 = vmatprep.subr.bf16.mxu0 %v7608_v0 }
 0x156   : > { %v968_v13 = vpop.f32.mrb[0].mxu1 }
 0x157   : > { %v6341_v14 = vpop.f32.mrb[1].mxu1 }
 0x158   : > { %v7994_v14 = vld [vmem:[%s7905_s20 + $0x6] sm:$0x3] }
 0x159   : > { %v890_v16 = vpop.f32.mrb[0].mxu0 }
 0x15a   : > { %v969_v17 = vadd.f32 %v968_v13, %v890_v16  ;;  %v6334_v18 = vpop.f32.mrb[1].mxu0 }
 0x15c   : > { %v972_v19 = vadd.f32 %v7936_v15, %v969_v17 }
 0x15d   : > { %v1143_v34 = vpop.f32.mrb[2].mxu0 }
 0x15e   : > { %7271 = vtanh.f32 %v972_v19  ;;  %v5953_v21 = vmul.f32 -1.442695, %v972_v19  ;;  %v6359_v35 = vpop.f32.mrb[3].mxu0 }
 0x160   : > { %7273 = vpow2.f32 %v5953_v21 }
 0x168   : > { %v7272_v20 = vpop.eup %7271 }
 0x169   : > { %982 = vrot.lane.b32.xlu0 %v7272_v20, %s7612_s14 }
 0x16a   : > { %v7274_v22 = vpop.eup %7273 }
 0x16b   : > { %v976_v23 = vadd.f32 1.0, %v7274_v22 }
 0x16d   : > { %7275 = vrcp.f32 %v976_v23 }
 0x177   : > { %v7276_v24 = vpop.eup %7275 }
 0x178   : > { %v980_v27 = vmul.f32 0.0, %v7276_v24 }
 0x1db   : > { %v983_v25 = vpop.permute.xlu0 %982 }
 0x1dc   : > { %v985_v26 = vmul.f32 %v7276_v24, %v983_v25 }
 0x1de   : > { %987 = vrot.lane.b32.xlu0 %v985_v26, %s7613_s27 }
 0x250   : > { %v988_v28 = vpop.permute.xlu0 %987 }
 0x251   : > { %v990_v29 = vadd.f32 %v988_v28, %v980_v27 }
 0x253   : > { %7277 = vtanh.f32 %v990_v29 }
 0x25d   : > { %v7278_v31 = vpop.eup %7277 }
 0x25e   : > { %993 = vrot.lane.b32.xlu1 %v7278_v31, %s7612_s14 }
 0x2d0   : > { %v994_v32 = vpop.permute.xlu1 %993 }
 0x2d1   : > { %v996_v33 = vmul.f32 %v7276_v24, %v994_v32 }
 0x2d3   : > { %1000 = vrot.lane.b32.xlu1 %v996_v33, %s7613_s27 }
 0x345   : > { %v7954_v36 = vpop.permute.xlu1 %1000 }
 0x346   : > { %6351 = vmatmul.mubr.msk.f32.vlgmr.msra.gmra.mrb[2].mxu1 %vm820_vm5, %v7954_v36 }
 0x347   : > { %6927 = vmatpush3.bf16.msk.msra.mxu1 %vm7895_vm3, %v7907_v10  ;;  %6375 = vmatprep.mubr.msk.f32.mxu1 %vm7609_vm0, %v7610_v1 }
 0x348   : > { %6928 = vmatprep.subr.bf16.mxu1 %v7608_v0 }
 0x34a   : > { %6376 = vmatmul.mubr.msk.f32.vlgmr.msra.gmra.mrb[4].mxu1 %vm894_vm4, %v7968_v51 }
 0x34b   : > { %6930 = vmatpush3.bf16.msra.mxu1 %v7899_v6  ;;  %6386 = vmatprep.mubr.msk.f32.mxu1 %vm7609_vm0, %v7610_v1 }
 0x34c   : > { %6931 = vmatprep.subr.bf16.mxu1 %v7608_v0 }
 0x34f   : > { %6933 = vmatpush3.bf16.msra.mxu1 %v7910_v11 }
 0x350   : > { %6944 = vmatprep.subr.bf16.mxu1 %v7608_v0 }
 0x419   : > { %v1070_v37 = vpop.f32.mrb[2].mxu1 }
 0x41a   : > { %v1144_v38 = vadd.f32 %v1143_v34, %v1070_v37  ;;  %v6352_v39 = vpop.f32.mrb[3].mxu1 }
 0x41c   : > { %v1147_v40 = vadd.f32 %v7936_v15, %v1144_v38  ;;  %v8020_v38 = vld [vmem:[%s7905_s20 + $0x8] sm:$0x3] }
 0x41d   : > { %v1318_v55 = vpop.f32.mrb[4].mxu1 }
 0x41e   : > { %7279 = vtanh.f32 %v1147_v40  ;;  %v5958_v42 = vmul.f32 -1.442695, %v1147_v40  ;;  %v6377_v56 = vpop.f32.mrb[5].mxu1 }
 0x420   : > { %7281 = vpow2.f32 %v5958_v42 }
 0x428   : > { %v7280_v41 = vpop.eup %7279 }
 0x429   : > { %1157 = vrot.lane.b32.xlu0 %v7280_v41, %s7612_s14 }
 0x42a   : > { %v7282_v43 = vpop.eup %7281 }
 0x42b   : > { %v1151_v44 = vadd.f32 1.0, %v7282_v43 }
 0x42d   : > { %7283 = vrcp.f32 %v1151_v44 }
 0x437   : > { %v7284_v45 = vpop.eup %7283 }
 0x438   : > { %v1155_v48 = vmul.f32 %v7284_v45, %v990_v29 }
 0x49b   : > { %v1158_v46 = vpop.permute.xlu0 %1157 }
 0x49c   : > { %v1160_v47 = vmul.f32 %v7284_v45, %v1158_v46 }
 0x49e   : > { %1162 = vrot.lane.b32.xlu1 %v1160_v47, %s7613_s27 }
 0x510   : > { %v1163_v49 = vpop.permute.xlu1 %1162 }
 0x511   : > { %v1165_v50 = vadd.f32 %v1163_v49, %v1155_v48 }
 0x513   : > { %7285 = vtanh.f32 %v1165_v50 }
 0x51d   : > { %v7286_v52 = vpop.eup %7285 }
 0x51e   : > { %1168 = vrot.lane.b32.xlu0 %v7286_v52, %s7612_s14 }
 0x590   : > { %v1169_v53 = vpop.permute.xlu0 %1168 }
 0x591   : > { %v1171_v54 = vmul.f32 %v7284_v45, %v1169_v53 }
 0x593   : > { %1175 = vrot.lane.b32.xlu1 %v1171_v54, %s7613_s27 }
 0x605   : > { %v7980_v57 = vpop.permute.xlu1 %1175 }
 0x606   : > { %6369 = vmatmul.mubr.msk.f32.vlgmr.msra.gmra.mrb[4].mxu0 %vm820_vm5, %v7980_v57 }
 0x607   : > { %6937 = vmatpush3.bf16.msk.msra.mxu0 %vm7895_vm3, %v7907_v10  ;;  %6393 = vmatprep.mubr.msk.f32.mxu0 %vm7609_vm0, %v7610_v1 }
 0x608   : > { %6938 = vmatprep.subr.bf16.mxu0 %v7608_v0 }
 0x60a   : > { %6394 = vmatmul.mubr.msk.f32.vlgmr.msra.gmra.mrb[6].mxu0 %vm894_vm4, %v7994_v14 }
 0x60b   : > { %6940 = vmatpush3.bf16.msra.mxu0 %v7899_v6  ;;  %6404 = vmatprep.mubr.msk.f32.mxu0 %vm7609_vm0, %v7610_v1 }
 0x60c   : > { %6941 = vmatprep.subr.bf16.mxu0 %v7608_v0 }
 0x60f   : > { %6943 = vmatpush3.bf16.msra.mxu0 %v7910_v11 }
 0x610   : > { %6954 = vmatprep.subr.bf16.mxu0 %v7608_v0 }
 0x6d9   : > { %v1245_v58 = vpop.f32.mrb[4].mxu0 }
 0x6da   : > { %v1319_v59 = vadd.f32 %v1318_v55, %v1245_v58  ;;  %v6370_v60 = vpop.f32.mrb[5].mxu0 }
 0x6dc   : > { %v1322_v61 = vadd.f32 %v7936_v15, %v1319_v59 }
 0x6dd   : > { %v1493_v19 = vpop.f32.mrb[6].mxu0 }
 0x6de   : > { %7287 = vtanh.f32 %v1322_v61  ;;  %v5963_v63 = vmul.f32 -1.442695, %v1322_v61  ;;  %v6395_v20 = vpop.f32.mrb[7].mxu0  ;;  %v8046_v61 = vld [vmem:[%s7905_s20 + $0xa] sm:$0x3] }
 0x6e0   : > { %7289 = vpow2.f32 %v5963_v63 }
 0x6e8   : > { %v7288_v62 = vpop.eup %7287 }
 0x6e9   : > { %1332 = vrot.lane.b32.xlu0 %v7288_v62, %s7612_s14 }
 0x6ea   : > { %v7290_v3 = vpop.eup %7289 }
 0x6eb   : > { %v1326_v4 = vadd.f32 1.0, %v7290_v3 }
 0x6ed   : > { %7291 = vrcp.f32 %v1326_v4 }
 0x6f7   : > { %v7292_v5 = vpop.eup %7291 }
 0x6f8   : > { %v1330_v9 = vmul.f32 %v7292_v5, %v1165_v50 }
 0x75b   : > { %v1333_v7 = vpop.permute.xlu0 %1332 }
 0x75c   : > { %v1335_v8 = vmul.f32 %v7292_v5, %v1333_v7 }
 0x75e   : > { %1337 = vrot.lane.b32.xlu1 %v1335_v8, %s7613_s27 }
 0x7d0   : > { %v1338_v12 = vpop.permute.xlu1 %1337 }
 0x7d1   : > { %v1340_v13 = vadd.f32 %v1338_v12, %v1330_v9 }
 0x7d3   : > { %7293 = vtanh.f32 %v1340_v13 }
 0x7dd   : > { %v7294_v16 = vpop.eup %7293 }
 0x7de   : > { %1343 = vrot.lane.b32.xlu0 %v7294_v16, %s7612_s14 }
 0x850   : > { %v1344_v17 = vpop.permute.xlu0 %1343 }
 0x851   : > { %v1346_v18 = vmul.f32 %v7292_v5, %v1344_v17 }
 0x853   : > { %1350 = vrot.lane.b32.xlu1 %v1346_v18, %s7613_s27 }
 0x8c5   : > { %v8006_v21 = vpop.permute.xlu1 %1350 }
 0x8c6   : > { %6387 = vmatmul.mubr.msk.f32.vlgmr.msra.gmra.mrb[6].mxu1 %vm820_vm5, %v8006_v21 }
 0x8c7   : > { %6947 = vmatpush3.bf16.msk.msra.mxu1 %vm7895_vm3, %v7907_v10  ;;  %6411 = vmatprep.mubr.msk.f32.mxu1 %vm7609_vm0, %v7610_v1 }
 0x8c8   : > { %6948 = vmatprep.subr.bf16.mxu1 %v7608_v0 }
 0x8ca   : > { %6412 = vmatmul.mubr.msk.f32.vlgmr.msra.gmra.mrb[8].mxu1 %vm894_vm4, %v8020_v38 }
 0x8cb   : > { %6950 = vmatpush3.bf16.msra.mxu1 %v7899_v6  ;;  %6422 = vmatprep.mubr.msk.f32.mxu1 %vm7609_vm0, %v7610_v1 }
 0x8cc   : > { %6951 = vmatprep.subr.bf16.mxu1 %v7608_v0 }
 0x8cf   : > { %6953 = vmatpush3.bf16.msra.mxu1 %v7910_v11 }
 0x8d0   : > { %6964 = vmatprep.subr.bf16.mxu1 %v7608_v0 }
 0x999   : > { %v1420_v22 = vpop.f32.mrb[6].mxu1 }
 0x99a   : > { %v1494_v23 = vadd.f32 %v1493_v19, %v1420_v22  ;;  %v6388_v24 = vpop.f32.mrb[7].mxu1 }
 0x99c   : > { %v1497_v25 = vadd.f32 %v7936_v15, %v1494_v23 }
 0x99d   : > { %v1668_v42 = vpop.f32.mrb[8].mxu1 }
 0x99e   : > { %7295 = vtanh.f32 %v1497_v25  ;;  %v5968_v27 = vmul.f32 -1.442695, %v1497_v25  ;;  %v6413_v43 = vpop.f32.mrb[9].mxu1 }
 0x9a0   : > { %7297 = vpow2.f32 %v5968_v27  ;;  %v8072_v27 = vld [vmem:[%s7905_s20 + $0xc] sm:$0x3] }
 0x9a8   : > { %v7296_v26 = vpop.eup %7295 }
 0x9a9   : > { %1507 = vrot.lane.b32.xlu0 %v7296_v26, %s7612_s14 }
 0x9aa   : > { %v7298_v28 = vpop.eup %7297 }
 0x9ab   : > { %v1501_v29 = vadd.f32 1.0, %v7298_v28 }
 0x9ad   : > { %7299 = vrcp.f32 %v1501_v29 }
 0x9b7   : > { %v7300_v31 = vpop.eup %7299 }
 0x9b8   : > { %v1505_v34 = vmul.f32 %v7300_v31, %v1340_v13 }
 0xa1b   : > { %v1508_v32 = vpop.permute.xlu0 %1507 }
 0xa1c   : > { %v1510_v33 = vmul.f32 %v7300_v31, %v1508_v32 }
 0xa1e   : > { %1512 = vrot.lane.b32.xlu1 %v1510_v33, %s7613_s27 }
 0xa90   : > { %v1513_v35 = vpop.permute.xlu1 %1512 }
 0xa91   : > { %v1515_v37 = vadd.f32 %v1513_v35, %v1505_v34 }
 0xa93   : > { %7301 = vtanh.f32 %v1515_v37 }
 0xa9d   : > { %v7302_v39 = vpop.eup %7301 }
 0xa9e   : > { %1518 = vrot.lane.b32.xlu0 %v7302_v39, %s7612_s14 }
 0xb10   : > { %v1519_v40 = vpop.permute.xlu0 %1518 }
 0xb11   : > { %v1521_v41 = vmul.f32 %v7300_v31, %v1519_v40 }
 0xb13   : > { %1525 = vrot.lane.b32.xlu1 %v1521_v41, %s7613_s27 }
 0xb85   : > { %v8032_v44 = vpop.permute.xlu1 %1525 }
 0xb86   : > { %6405 = vmatmul.mubr.msk.f32.vlgmr.msra.gmra.mrb[8].mxu0 %vm820_vm5, %v8032_v44 }
 0xb87   : > { %6957 = vmatpush3.bf16.msk.msra.mxu0 %vm7895_vm3, %v7907_v10  ;;  %6429 = vmatprep.mubr.msk.f32.mxu0 %vm7609_vm0, %v7610_v1 }
 0xb88   : > { %6958 = vmatprep.subr.bf16.mxu0 %v7608_v0 }
 0xb8a   : > { %6430 = vmatmul.mubr.msk.f32.vlgmr.msra.gmra.mrb[10].mxu0 %vm894_vm4, %v8046_v61 }
 0xb8b   : > { %6960 = vmatpush3.bf16.msra.mxu0 %v7899_v6  ;;  %6440 = vmatprep.mubr.msk.f32.mxu0 %vm7609_vm0, %v7610_v1 }
 0xb8c   : > { %6961 = vmatprep.subr.bf16.mxu0 %v7608_v0 }
 0xb8f   : > { %6963 = vmatpush3.bf16.msra.mxu0 %v7910_v11 }
 0xb90   : > { %6974 = vmatprep.subr.bf16.mxu0 %v7608_v0 }
 0xc59   : > { %v1595_v45 = vpop.f32.mrb[8].mxu0 }
 0xc5a   : > { %v1669_v46 = vadd.f32 %v1668_v42, %v1595_v45  ;;  %v6406_v47 = vpop.f32.mrb[9].mxu0 }
 0xc5c   : > { %v1672_v48 = vadd.f32 %v7936_v15, %v1669_v46 }
 0xc5d   : > { %v1843_v4 = vpop.f32.mrb[10].mxu0 }
 0xc5e   : > { %7303 = vtanh.f32 %v1672_v48  ;;  %v5973_v50 = vmul.f32 -1.442695, %v1672_v48  ;;  %v6431_v5 = vpop.f32.mrb[11].mxu0  ;;  %v5984_v48 = vld [vmem:[%s7905_s20 + $0xe] sm:$0x3] }
 0xc60   : > { %7305 = vpow2.f32 %v5973_v50  ;;  %v768_v50 = vld [vmem:[%s730_s16 + $0x8] sm:$0xff] }
 0xc68   : > { %v7304_v49 = vpop.eup %7303 }
 0xc69   : > { %1682 = vrot.lane.b32.xlu0 %v7304_v49, %s7612_s14  ;;  %v767_v49 = vld [vmem:[%s730_s16] sm:$0xff] }
 0xc6a   : > { %v7306_v52 = vpop.eup %7305 }
 0xc6b   : > { %v1676_v53 = vadd.f32 1.0, %v7306_v52  ;;  %v8106_v52 = vpack.c.bf16 %v768_v50, %v767_v49 }
 0xc6d   : > { %7307 = vrcp.f32 %v1676_v53 }
 0xc77   : > { %v7308_v54 = vpop.eup %7307 }
 0xc78   : > { %v1680_v58 = vmul.f32 %v7308_v54, %v1515_v37 }
 0xcdb   : > { %v1683_v55 = vpop.permute.xlu0 %1682 }
 0xcdc   : > { %v1685_v56 = vmul.f32 %v7308_v54, %v1683_v55  ;;  %v770_v55 = vld [vmem:[%s730_s16 + $0x18] sm:$0xff] }
 0xcde   : > { %1687 = vrot.lane.b32.xlu1 %v1685_v56, %s7613_s27 }
 0xd50   : > { %v1688_v59 = vpop.permute.xlu1 %1687 }
 0xd51   : > { %v1690_v60 = vadd.f32 %v1688_v59, %v1680_v58  ;;  %v765_v58 = vld [vmem:[%s725_s23] sm:$0xff]  ;;  %v766_v59 = vld [vmem:[%s725_s23 + $0x8] sm:$0xf]  ;;  %s8664_s23 = sld [smem:[#allocation12_spill]] }
 0xd53   : > { %7309 = vtanh.f32 %v1690_v60 }
 0xd57   : > { %s748_s19 = scalar_lea.vmem %s8664_s23, %s7882_s22 }
 0xd5d   : > { %v7310_v62 = vpop.eup %7309 }
 0xd5e   : > { %1693 = vrot.lane.b32.xlu0 %v7310_v62, %s7612_s14 }
 0xdd0   : > { %v1694_v63 = vpop.permute.xlu0 %1693 }
 0xdd1   : > { %v1696_v3 = vmul.f32 %v7308_v54, %v1694_v63  ;;  %v769_v54 = vld [vmem:[%s730_s16 + $0x10] sm:$0xff]  ;;  %s738_s16 = scalar_lea.vmem %s8624_s7, %s7882_s22 }
 0xdd2   : > { %v8117_v56 = vpack.c.bf16 %v770_v55, %v769_v54 }
 0xdd3   : > { %1700 = vrot.lane.b32.xlu1 %v1696_v3, %s7613_s27 }
 0xe45   : > { %v8058_v7 = vpop.permute.xlu1 %1700 }
 0xe46   : > { %6423 = vmatmul.mubr.msk.f32.vlgmr.msra.gmra.mrb[10].mxu1 %vm820_vm5, %v8058_v7 }
 0xe47   : > { %6967 = vmatpush3.bf16.msk.msra.mxu1 %vm7895_vm3, %v7907_v10  ;;  %6447 = vmatprep.mubr.msk.f32.mxu1 %vm7609_vm0, %v7610_v1 }
 0xe48   : > { %6968 = vmatprep.subr.bf16.mxu1 %v7608_v0 }
 0xe4a   : > { %6448 = vmatmul.mubr.msk.f32.vlgmr.msra.gmra.mrb[12].mxu1 %vm894_vm4, %v8072_v27 }
 0xe4b   : > { %6970 = vmatpush3.bf16.msra.mxu1 %v7899_v6  ;;  %6458 = vmatprep.mubr.msk.f32.mxu1 %vm7609_vm0, %v7610_v1 }
 0xe4c   : > { %6971 = vmatprep.subr.bf16.mxu1 %v7608_v0 }
 0xe4f   : > { %6973 = vmatpush3.bf16.msra.mxu1 %v7910_v11 }
 0xe50   : > { %6984 = vmatprep.subr.bf16.mxu1 %v7608_v0 }
 0xf19   : > { %v1770_v8 = vpop.f32.mrb[10].mxu1 }
 0xf1a   : > { %v1844_v9 = vadd.f32 %v1843_v4, %v1770_v8  ;;  %v6424_v12 = vpop.f32.mrb[11].mxu1 }
 0xf1c   : > { %v1847_v13 = vadd.f32 %v7936_v15, %v1844_v9 }
 0xf1d   : > { %v2018_v32 = vpop.f32.mrb[12].mxu1 }
 0xf1e   : > { %7311 = vtanh.f32 %v1847_v13  ;;  %v5978_v17 = vmul.f32 -1.442695, %v1847_v13  ;;  %v6449_v33 = vpop.f32.mrb[13].mxu1 }
 0xf20   : > { %7313 = vpow2.f32 %v5978_v17  ;;  %v8162_v17 = vld [vmem:[%s733_s11] ss:$0 sm:$0xff]  ;;  %s8665_s11 = sld [smem:[#allocation13_spill]] }
 0xf26   : > { %s751_s25 = scalar_lea.vmem %s8665_s11, %s8674_s17 }
 0xf28   : > { %v7312_v16 = vpop.eup %7311 }
 0xf29   : > { %1857 = vrot.lane.b32.xlu0 %v7312_v16, %s7612_s14 }
 0xf2a   : > { %v7314_v18 = vpop.eup %7313 }
 0xf2b   : > { %v1851_v19 = vadd.f32 1.0, %v7314_v18 }
 0xf2d   : > { %7315 = vrcp.f32 %v1851_v19 }
 0xf37   : > { %v7316_v20 = vpop.eup %7315 }
 0xf38   : > { %v1855_v24 = vmul.f32 %v7316_v20, %v1690_v60  ;;  %v8121_v60 = vpack.c.bf16 %v766_v59, %v765_v58 }
 0xf9b   : > { %v1858_v22 = vpop.permute.xlu0 %1857 }
 0xf9c   : > { %v1860_v23 = vmul.f32 %v7316_v20, %v1858_v22 }
 0xf9e   : > { %1862 = vrot.lane.b32.xlu1 %v1860_v23, %s7613_s27 }
0x1010   : > { %v1863_v25 = vpop.permute.xlu1 %1862 }
0x1011   : > { %v1865_v26 = vadd.f32 %v1863_v25, %v1855_v24 }
0x1013   : > { %7317 = vtanh.f32 %v1865_v26 }
0x101d   : > { %v7318_v28 = vpop.eup %7317 }
0x101e   : > { %1868 = vrot.lane.b32.xlu0 %v7318_v28, %s7612_s14 }
0x1090   : > { %v1869_v29 = vpop.permute.xlu0 %1868 }
0x1091   : > { %v1871_v31 = vmul.f32 %v7316_v20, %v1869_v29 }
0x1093   : > { %1875 = vrot.lane.b32.xlu1 %v1871_v31, %s7613_s27 }
0x1105   : > { %v8084_v34 = vpop.permute.xlu1 %1875 }
0x1106   : > { %6441 = vmatmul.mubr.msk.f32.vlgmr.msra.gmra.mrb[12].mxu0 %vm820_vm5, %v8084_v34 }
0x1107   : > { %6977 = vmatpush3.bf16.msk.msra.mxu0 %vm7895_vm3, %v7907_v10  ;;  %6465 = vmatprep.mubr.msk.f32.mxu0 %vm7609_vm0, %v7610_v1 }
0x1108   : > { %6978 = vmatprep.subr.bf16.mxu0 %v7608_v0 }
0x110a   : > { %6466 = vmatmul.mubr.msk.f32.vlgmr.msra.gmra.mrb[14].mxu0 %vm894_vm4, %v5984_v48 }
0x110b   : > { %6476 = vmatprep.mubr.msk.f32.mxu0 %vm7609_vm0, %v7610_v1  ;;  %6980 = vmatpush3.bf16.msra.mxu0 %v8106_v52 }
0x110c   : > { %6981 = vmatprep.subr.bf16.mxu0 %v7608_v0 }
0x110f   : > { %6983 = vmatpush3.bf16.msra.mxu0 %v8117_v56 }
0x1110   : > { %6994 = vmatprep.subr.bf16.mxu0 %v7608_v0 }
0x1112   : > { %6477 = vmatmul.mubr.f32.vlgmr.msra.gmra.mrb[16].mxu0 %v7610_v1 }
0x1113   : > { %6997 = vmatpush3.bf16.msk.msra.mxu0 %vm7895_vm3, %v8121_v60  ;;  %6501 = vmatprep.mubr.msk.f32.mxu0 %vm7609_vm0, %v7610_v1 }
0x1114   : > { %6998 = vmatprep.subr.bf16.mxu0 %v7608_v0 }
0x1116   : > { %6502 = vmatmul.mubr.msk.f32.vlgmr.msra.gmra.mrb[18].mxu0 %vm894_vm4, %v8072_v27 }
0x1117   : > { %7000 = vmatpush3.bf16.msra.mxu0 %v8106_v52  ;;  %6512 = vmatprep.mubr.msk.f32.mxu0 %vm7609_vm0, %v7610_v1 }
0x1118   : > { %7001 = vmatprep.subr.bf16.mxu0 %v7608_v0 }
0x111b   : > { %7003 = vmatpush3.bf16.msra.mxu0 %v8117_v56 }
0x111c   : > { %7014 = vmatprep.subr.bf16.mxu0 %v7608_v0 }
0x11d9   : > { %v1945_v6 = vpop.f32.mrb[12].mxu0 }
0x11da   : > { %v2019_v11 = vadd.f32 %v2018_v32, %v1945_v6  ;;  %v6442_v35 = vpop.f32.mrb[13].mxu0 }
0x11dc   : > { %v2022_v37 = vadd.f32 %v7936_v15, %v2019_v11 }
0x11dd   : > { %v2193_v3 = vpop.f32.mrb[14].mxu0 }
0x11de   : > { %7319 = vtanh.f32 %v2022_v37  ;;  %v5983_v40 = vmul.f32 -1.442695, %v2022_v37  ;;  %v6467_v4 = vpop.f32.mrb[15].mxu0 }
0x11e0   : > { %7321 = vpow2.f32 %v5983_v40 }
0x11e5   : > { %v2288_v8 = vpop.f32.mrb[16].mxu0 }
0x11e6   : > { %v6478_v9 = vpop.f32.mrb[17].mxu0 }
0x11e8   : > { %v7320_v39 = vpop.eup %7319 }
0x11e9   : > { %2032 = vrot.lane.b32.xlu0 %v7320_v39, %s7612_s14  ;;  %v2531_v11 = vpop.f32.mrb[18].mxu0 }
0x11ea   : > { %v7322_v41 = vpop.eup %7321  ;;  %v6503_v35 = vpop.f32.mrb[19].mxu0 }
0x11eb   : > { %v2026_v10 = vadd.f32 1.0, %v7322_v41 }
0x11ed   : > { %7323 = vrcp.f32 %v2026_v10 }
0x11f7   : > { %v7324_v42 = vpop.eup %7323 }
0x11f8   : > { %v2030_v46 = vmul.f32 %v7324_v42, %v1865_v26 }
0x125b   : > { %v2033_v43 = vpop.permute.xlu0 %2032 }
0x125c   : > { %v2035_v45 = vmul.f32 %v7324_v42, %v2033_v43 }
0x125e   : > { %2037 = vrot.lane.b32.xlu1 %v2035_v45, %s7613_s27 }
0x12d0   : > { %v2038_v47 = vpop.permute.xlu1 %2037 }
0x12d1   : > { %v8097_v15 = vadd.f32 %v2038_v47, %v2030_v46 }
0x12d3   : > { %7325 = vtanh.f32 %v8097_v15 }
0x12dd   : > { %v7326_v53 = vpop.eup %7325 }
0x12de   : > { %2043 = vrot.lane.b32.xlu0 %v7326_v53, %s7612_s14 }
0x1350   : > { %v2044_v62 = vpop.permute.xlu0 %2043 }
0x1351   : > { %v2046_v63 = vmul.f32 %v7324_v42, %v2044_v62 }
0x1353   : > { %2050 = vrot.lane.b32.xlu1 %v2046_v63, %s7613_s27 }
0x13c5   : > { %v8139_v5 = vpop.permute.xlu1 %2050 }
0x13c6   : > { %6459 = vmatmul.mubr.msk.f32.vlgmr.msra.gmra.mrb[14].mxu1 %vm820_vm5, %v8139_v5 }
0x13c7   : > { %6987 = vmatpush3.bf16.msk.msra.mxu1 %vm7895_vm3, %v8121_v60  ;;  %6483 = vmatprep.mubr.msk.f32.mxu1 %vm7609_vm0, %v7610_v1 }
0x13c8   : > { %6988 = vmatprep.subr.bf16.mxu1 %v7608_v0 }
0x13ca   : > { %6484 = vmatmul.mubr.msk.f32.vlgmr.msra.gmra.mrb[16].mxu1 %vm894_vm4, %v5984_v48 }
0x13cb   : > { %6990 = vmatpush3.bf16.msra.mxu1 %v8106_v52  ;;  %6494 = vmatprep.mubr.msk.f32.mxu1 %vm7609_vm0, %v7610_v1 }
0x13cc   : > { %6991 = vmatprep.subr.bf16.mxu1 %v7608_v0 }
0x13cf   : > { %6993 = vmatpush3.bf16.msra.mxu1 %v8117_v56 }
0x13d0   : > { %7004 = vmatprep.subr.bf16.mxu1 %v7608_v0 }
0x1499   : > { %v2120_v12 = vpop.f32.mrb[14].mxu1 }
0x149a   : > { %v8156_v13 = vadd.f32 %v2193_v3, %v2120_v12  ;;  %v6460_v16 = vpop.f32.mrb[15].mxu1 }
0x149d   : > { %v2361_v18 = vpop.f32.mrb[16].mxu1 }
0x149e   : > { %v2362_v19 = vadd.f32 %v2361_v18, %v2288_v8  ;;  %v6485_v20 = vpop.f32.mrb[17].mxu1 }
0x14a0   : > { %v2365_v22 = vadd.f32 %v8162_v17, %v2362_v19 }
0x14a2   : > { %7327 = vtanh.f32 %v2365_v22  ;;  %v5991_v24 = vmul.f32 -1.442695, %v2365_v22 }
0x14a4   : > { %7329 = vpow2.f32 %v5991_v24 }
0x14ac   : > { %v7328_v23 = vpop.eup %7327 }
0x14ad   : > { %2375 = vrot.lane.b32.xlu0 %v7328_v23, %s7612_s14 }
0x14ae   : > { %v7330_v25 = vpop.eup %7329 }
0x14af   : > { %v2369_v26 = vadd.f32 1.0, %v7330_v25 }
0x14b1   : > { %7331 = vrcp.f32 %v2369_v26 }
0x14bb   : > { %v7332_v27 = vpop.eup %7331 }
0x14bc   : > { %v2373_v31 = vmul.f32 0.0, %v7332_v27 }
0x151f   : > { %v2376_v28 = vpop.permute.xlu0 %2375 }
0x1520   : > { %v2378_v29 = vmul.f32 %v7332_v27, %v2376_v28 }
0x1522   : > { %2380 = vrot.lane.b32.xlu1 %v2378_v29, %s7613_s27 }
0x1594   : > { %v2381_v32 = vpop.permute.xlu1 %2380 }
0x1595   : > { %v2383_v33 = vadd.f32 %v2381_v32, %v2373_v31 }
0x1597   : > { %7333 = vtanh.f32 %v2383_v33 }
0x15a1   : > { %v7334_v6 = vpop.eup %7333 }
0x15a2   : > { %2386 = vrot.lane.b32.xlu0 %v7334_v6, %s7612_s14 }
0x1614   : > { %v2387_v37 = vpop.permute.xlu0 %2386 }
0x1615   : > { %v2389_v39 = vmul.f32 %v7332_v27, %v2387_v37 }
0x1617   : > { %2391 = vrot.lane.b32.xlu1 %v2389_v39, %s7613_s27 }
0x1689   : > { %v8169_v40 = vpop.permute.xlu1 %2391 }
0x168a   : > { %6495 = vmatmul.mubr.msk.f32.vlgmr.msra.gmra.mrb[18].mxu1 %vm820_vm5, %v8169_v40 }
0x168b   : > { %7007 = vmatpush3.bf16.msk.msra.mxu1 %vm7895_vm3, %v8121_v60  ;;  %6519 = vmatprep.mubr.msk.f32.mxu1 %vm7609_vm0, %v7610_v1 }
0x168c   : > { %7008 = vmatprep.subr.bf16.mxu1 %v7608_v0 }
0x168e   : > { %6520 = vmatmul.mubr.msk.f32.vlgmr.msra.gmra.mrb[20].mxu1 %vm894_vm4, %v8046_v61 }
0x168f   : > { %7010 = vmatpush3.bf16.msra.mxu1 %v8106_v52  ;;  %6530 = vmatprep.mubr.msk.f32.mxu1 %vm7609_vm0, %v7610_v1 }
0x1690   : > { %7011 = vmatprep.subr.bf16.mxu1 %v7608_v0 }
0x1693   : > { %7013 = vmatpush3.bf16.msra.mxu1 %v8117_v56 }
0x1694   : > { %7024 = vmatprep.subr.bf16.mxu1 %v7608_v0 }
0x175d   : > { %v2461_v41 = vpop.f32.mrb[18].mxu1 }
0x175e   : > { %v2532_v10 = vadd.f32 %v2531_v11, %v2461_v41  ;;  %v6496_v42 = vpop.f32.mrb[19].mxu1 }
0x1760   : > { %v2535_v43 = vadd.f32 %v8162_v17, %v2532_v10 }
0x1761   : > { %v2701_v59 = vpop.f32.mrb[20].mxu1 }
0x1762   : > { %7335 = vtanh.f32 %v2535_v43  ;;  %v5995_v61 = vmul.f32 -1.442695, %v2535_v43  ;;  %v6521_v62 = vpop.f32.mrb[21].mxu1 }
0x1764   : > { %7337 = vpow2.f32 %v5995_v61 }
0x176c   : > { %v7336_v45 = vpop.eup %7335 }
0x176d   : > { %2545 = vrot.lane.b32.xlu0 %v7336_v45, %s7612_s14 }
0x176e   : > { %v7338_v46 = vpop.eup %7337 }
0x176f   : > { %v2539_v47 = vadd.f32 1.0, %v7338_v46 }
0x1771   : > { %7339 = vrcp.f32 %v2539_v47 }
0x177b   : > { %v7340_v48 = vpop.eup %7339 }
0x177c   : > { %v2543_v53 = vmul.f32 %v7340_v48, %v2383_v33 }
0x17df   : > { %v2546_v49 = vpop.permute.xlu0 %2545 }
0x17e0   : > { %v2548_v50 = vmul.f32 %v7340_v48, %v2546_v49 }
0x17e2   : > { %2550 = vrot.lane.b32.xlu1 %v2548_v50, %s7613_s27 }
0x1854   : > { %v2551_v54 = vpop.permute.xlu1 %2550 }
0x1855   : > { %v2553_v55 = vadd.f32 %v2551_v54, %v2543_v53 }
0x1857   : > { %7341 = vtanh.f32 %v2553_v55 }
0x1861   : > { %v7342_v58 = vpop.eup %7341 }
0x1862   : > { %2556 = vrot.lane.b32.xlu0 %v7342_v58, %s7612_s14 }
0x18d4   : > { %v2557_v63 = vpop.permute.xlu0 %2556 }
0x18d5   : > { %v2559_v3 = vmul.f32 %v7340_v48, %v2557_v63 }
0x18d7   : > { %2561 = vrot.lane.b32.xlu1 %v2559_v3, %s7613_s27 }
0x1949   : > { %v8192_v4 = vpop.permute.xlu1 %2561 }
0x194a   : > { %6513 = vmatmul.mubr.msk.f32.vlgmr.msra.gmra.mrb[20].mxu0 %vm820_vm5, %v8192_v4 }
0x194b   : > { %7017 = vmatpush3.bf16.msk.msra.mxu0 %vm7895_vm3, %v8121_v60  ;;  %6537 = vmatprep.mubr.msk.f32.mxu0 %vm7609_vm0, %v7610_v1 }
0x194c   : > { %7018 = vmatprep.subr.bf16.mxu0 %v7608_v0 }
0x194e   : > { %6538 = vmatmul.mubr.msk.f32.vlgmr.msra.gmra.mrb[22].mxu0 %vm894_vm4, %v8020_v38 }
0x194f   : > { %7020 = vmatpush3.bf16.msra.mxu0 %v8106_v52  ;;  %6548 = vmatprep.mubr.msk.f32.mxu0 %vm7609_vm0, %v7610_v1 }
0x1950   : > { %7021 = vmatprep.subr.bf16.mxu0 %v7608_v0 }
0x1953   : > { %7023 = vmatpush3.bf16.msra.mxu0 %v8117_v56 }
0x1954   : > { %7034 = vmatprep.subr.bf16.mxu0 %v7608_v0 }
0x1a1d   : > { %v2631_v8 = vpop.f32.mrb[20].mxu0 }
0x1a1e   : > { %v2702_v9 = vadd.f32 %v2701_v59, %v2631_v8  ;;  %v6514_v12 = vpop.f32.mrb[21].mxu0 }
0x1a20   : > { %v2705_v16 = vadd.f32 %v8162_v17, %v2702_v9 }
0x1a21   : > { %v2871_v29 = vpop.f32.mrb[22].mxu0 }
0x1a22   : > { %7343 = vtanh.f32 %v2705_v16  ;;  %v5999_v38 = vmul.f32 -1.442695, %v2705_v16  ;;  %v6539_v31 = vpop.f32.mrb[23].mxu0 }
0x1a24   : > { %7345 = vpow2.f32 %v5999_v38 }
0x1a2c   : > { %v7344_v18 = vpop.eup %7343 }
0x1a2d   : > { %2715 = vrot.lane.b32.xlu0 %v7344_v18, %s7612_s14 }
0x1a2e   : > { %v7346_v19 = vpop.eup %7345 }
0x1a2f   : > { %v2709_v20 = vadd.f32 1.0, %v7346_v19 }
0x1a31   : > { %7347 = vrcp.f32 %v2709_v20 }
0x1a3b   : > { %v7348_v22 = vpop.eup %7347 }
0x1a3c   : > { %v2713_v25 = vmul.f32 %v7348_v22, %v2553_v55 }
0x1a9f   : > { %v2716_v23 = vpop.permute.xlu0 %2715 }
0x1aa0   : > { %v2718_v24 = vmul.f32 %v7348_v22, %v2716_v23 }
0x1aa2   : > { %2720 = vrot.lane.b32.xlu1 %v2718_v24, %s7613_s27 }
0x1b14   : > { %v2721_v26 = vpop.permute.xlu1 %2720 }
0x1b15   : > { %v2723_v27 = vadd.f32 %v2721_v26, %v2713_v25 }
0x1b17   : > { %7349 = vtanh.f32 %v2723_v27 }
0x1b21   : > { %v7350_v28 = vpop.eup %7349 }
0x1b22   : > { %2726 = vrot.lane.b32.xlu0 %v7350_v28, %s7612_s14 }
0x1b94   : > { %v2727_v32 = vpop.permute.xlu0 %2726 }
0x1b95   : > { %v2729_v33 = vmul.f32 %v7348_v22, %v2727_v32 }
0x1b97   : > { %2731 = vrot.lane.b32.xlu1 %v2729_v33, %s7613_s27 }
0x1c09   : > { %v8215_v6 = vpop.permute.xlu1 %2731 }
0x1c0a   : > { %6531 = vmatmul.mubr.msk.f32.vlgmr.msra.gmra.mrb[22].mxu1 %vm820_vm5, %v8215_v6 }
0x1c0b   : > { %7027 = vmatpush3.bf16.msk.msra.mxu1 %vm7895_vm3, %v8121_v60  ;;  %6555 = vmatprep.mubr.msk.f32.mxu1 %vm7609_vm0, %v7610_v1 }
0x1c0c   : > { %7028 = vmatprep.subr.bf16.mxu1 %v7608_v0 }
0x1c0e   : > { %6556 = vmatmul.mubr.msk.f32.vlgmr.msra.gmra.mrb[24].mxu1 %vm894_vm4, %v7994_v14 }
0x1c0f   : > { %7030 = vmatpush3.bf16.msra.mxu1 %v8106_v52  ;;  %6566 = vmatprep.mubr.msk.f32.mxu1 %vm7609_vm0, %v7610_v1 }
0x1c10   : > { %7031 = vmatprep.subr.bf16.mxu1 %v7608_v0 }
0x1c13   : > { %7033 = vmatpush3.bf16.msra.mxu1 %v8117_v56 }
0x1c14   : > { %7044 = vmatprep.subr.bf16.mxu1 %v7608_v0 }
0x1cdd   : > { %v2801_v11 = vpop.f32.mrb[22].mxu1 }
0x1cde   : > { %v2872_v35 = vadd.f32 %v2871_v29, %v2801_v11  ;;  %v6532_v37 = vpop.f32.mrb[23].mxu1 }
0x1ce0   : > { %v2875_v39 = vadd.f32 %v8162_v17, %v2872_v35 }
0x1ce1   : > { %v3041_v50 = vpop.f32.mrb[24].mxu1 }
0x1ce2   : > { %7351 = vtanh.f32 %v2875_v39  ;;  %v6003_v14 = vmul.f32 -1.442695, %v2875_v39  ;;  %v6557_v53 = vpop.f32.mrb[25].mxu1 }
0x1ce4   : > { %7353 = vpow2.f32 %v6003_v14 }
0x1cec   : > { %v7352_v41 = vpop.eup %7351 }
0x1ced   : > { %2885 = vrot.lane.b32.xlu0 %v7352_v41, %s7612_s14 }
0x1cee   : > { %v7354_v10 = vpop.eup %7353 }
0x1cef   : > { %v2879_v42 = vadd.f32 1.0, %v7354_v10 }
0x1cf1   : > { %7355 = vrcp.f32 %v2879_v42 }
0x1cfb   : > { %v7356_v43 = vpop.eup %7355 }
0x1cfc   : > { %v2883_v46 = vmul.f32 %v7356_v43, %v2723_v27 }
0x1d5f   : > { %v2886_v45 = vpop.permute.xlu0 %2885 }
0x1d60   : > { %v2888_v61 = vmul.f32 %v7356_v43, %v2886_v45 }
0x1d62   : > { %2890 = vrot.lane.b32.xlu1 %v2888_v61, %s7613_s27 }
0x1dd4   : > { %v2891_v47 = vpop.permute.xlu1 %2890 }
0x1dd5   : > { %v2893_v48 = vadd.f32 %v2891_v47, %v2883_v46 }
0x1dd7   : > { %7357 = vtanh.f32 %v2893_v48 }
0x1de1   : > { %v7358_v49 = vpop.eup %7357 }
0x1de2   : > { %2896 = vrot.lane.b32.xlu0 %v7358_v49, %s7612_s14 }
0x1e54   : > { %v2897_v54 = vpop.permute.xlu0 %2896 }
0x1e55   : > { %v2899_v55 = vmul.f32 %v7356_v43, %v2897_v54 }
0x1e57   : > { %2901 = vrot.lane.b32.xlu1 %v2899_v55, %s7613_s27 }
0x1ec9   : > { %v8238_v58 = vpop.permute.xlu1 %2901 }
0x1eca   : > { %6549 = vmatmul.mubr.msk.f32.vlgmr.msra.gmra.mrb[24].mxu0 %vm820_vm5, %v8238_v58 }
0x1ecb   : > { %7037 = vmatpush3.bf16.msk.msra.mxu0 %vm7895_vm3, %v8121_v60  ;;  %6573 = vmatprep.mubr.msk.f32.mxu0 %vm7609_vm0, %v7610_v1 }
0x1ecc   : > { %7038 = vmatprep.subr.bf16.mxu0 %v7608_v0 }
0x1ece   : > { %6574 = vmatmul.mubr.msk.f32.vlgmr.msra.gmra.mrb[26].mxu0 %vm894_vm4, %v7968_v51 }
0x1ecf   : > { %7040 = vmatpush3.bf16.msra.mxu0 %v8106_v52  ;;  %6584 = vmatprep.mubr.msk.f32.mxu0 %vm7609_vm0, %v7610_v1 }
0x1ed0   : > { %7041 = vmatprep.subr.bf16.mxu0 %v7608_v0 }
0x1ed3   : > { %7043 = vmatpush3.bf16.msra.mxu0 %v8117_v56 }
0x1ed4   : > { %7054 = vmatprep.subr.bf16.mxu0 %v7608_v0 }
0x1f9d   : > { %v2971_v59 = vpop.f32.mrb[24].mxu0 }
0x1f9e   : > { %v3042_v62 = vadd.f32 %v3041_v50, %v2971_v59  ;;  %v6550_v63 = vpop.f32.mrb[25].mxu0 }
0x1fa0   : > { %v3045_v3 = vadd.f32 %v8162_v17, %v3042_v62 }
0x1fa1   : > { %v3211_v24 = vpop.f32.mrb[26].mxu0 }
0x1fa2   : > { %7359 = vtanh.f32 %v3045_v3  ;;  %v6007_v51 = vmul.f32 -1.442695, %v3045_v3  ;;  %v6575_v25 = vpop.f32.mrb[27].mxu0 }
0x1fa4   : > { %7361 = vpow2.f32 %v6007_v51 }
0x1fac   : > { %v7360_v8 = vpop.eup %7359 }
0x1fad   : > { %3055 = vrot.lane.b32.xlu0 %v7360_v8, %s7612_s14 }
0x1fae   : > { %v7362_v9 = vpop.eup %7361 }
0x1faf   : > { %v3049_v12 = vadd.f32 1.0, %v7362_v9 }
0x1fb1   : > { %7363 = vrcp.f32 %v3049_v12 }
0x1fbb   : > { %v7364_v16 = vpop.eup %7363 }
0x1fbc   : > { %v3053_v19 = vmul.f32 %v7364_v16, %v2893_v48  ;;  %v7471_v48 = vld [vmem:[%s7905_s20] sm:$0x3]  ;;  %s743_s20 = scalar_lea.vmem %s8625_s8, %s7882_s22 }
0x201f   : > { %v3056_v18 = vpop.permute.xlu0 %3055 }
0x2020   : > { %v3058_v38 = vmul.f32 %v7364_v16, %v3056_v18  ;;  %v776_v18 = vld [vmem:[%s743_s20 + $0x8] sm:$0xff] }
0x2022   : > { %3060 = vrot.lane.b32.xlu1 %v3058_v38, %s7613_s27 }
0x2094   : > { %v3061_v20 = vpop.permute.xlu1 %3060 }
0x2095   : > { %v3063_v22 = vadd.f32 %v3061_v20, %v3053_v19  ;;  %v777_v20 = vld [vmem:[%s743_s20 + $0x10] sm:$0xff] }
0x2097   : > { %7365 = vtanh.f32 %v3063_v22 }
0x20a1   : > { %v7366_v23 = vpop.eup %7365 }
0x20a2   : > { %3066 = vrot.lane.b32.xlu0 %v7366_v23, %s7612_s14 }
0x2114   : > { %v3067_v26 = vpop.permute.xlu0 %3066 }
0x2115   : > { %v3069_v27 = vmul.f32 %v7364_v16, %v3067_v26  ;;  %v775_v16 = vld [vmem:[%s743_s20] sm:$0xff] }
0x2116   : > { %v8306_v38 = vpack.c.bf16 %v776_v18, %v775_v16 }
0x2117   : > { %3071 = vrot.lane.b32.xlu1 %v3069_v27, %s7613_s27  ;;  %v771_v27 = vld [vmem:[%s738_s16] sm:$0xff] }
0x2189   : > { %v8261_v28 = vpop.permute.xlu1 %3071 }
0x218a   : > { %6567 = vmatmul.mubr.msk.f32.vlgmr.msra.gmra.mrb[26].mxu1 %vm820_vm5, %v8261_v28 }
0x218b   : > { %7047 = vmatpush3.bf16.msk.msra.mxu1 %vm7895_vm3, %v8121_v60  ;;  %6591 = vmatprep.mubr.msk.f32.mxu1 %vm7609_vm0, %v7610_v1 }
0x218c   : > { %7048 = vmatprep.subr.bf16.mxu1 %v7608_v0 }
0x218e   : > { %6592 = vmatmul.mubr.msk.f32.vlgmr.msra.gmra.mrb[28].mxu1 %vm894_vm4, %v7942_v30 }
0x218f   : > { %7050 = vmatpush3.bf16.msra.mxu1 %v8106_v52  ;;  %6602 = vmatprep.mubr.msk.f32.mxu1 %vm7609_vm0, %v7610_v1 }
0x2190   : > { %7051 = vmatprep.subr.bf16.mxu1 %v7608_v0 }
0x2193   : > { %7053 = vmatpush3.bf16.msra.mxu1 %v8117_v56 }
0x2194   : > { %7064 = vmatprep.subr.bf16.mxu1 %v7608_v0 }
0x225d   : > { %v3141_v29 = vpop.f32.mrb[26].mxu1 }
0x225e   : > { %v3212_v31 = vadd.f32 %v3211_v24, %v3141_v29  ;;  %v6568_v32 = vpop.f32.mrb[27].mxu1  ;;  %v772_v29 = vld [vmem:[%s738_s16 + $0x8] sm:$0xff] }
0x225f   : > { %v773_v32 = vld [vmem:[%s738_s16 + $0x10] sm:$0xff] }
0x2260   : > { %v3215_v33 = vadd.f32 %v8162_v17, %v3212_v31  ;;  %v8319_v31 = vpack.c.bf16 %v772_v29, %v771_v27 }
0x2261   : > { %v3381_v43 = vpop.f32.mrb[28].mxu1 }
0x2262   : > { %7367 = vtanh.f32 %v3215_v33  ;;  %v6011_v30 = vmul.f32 -1.442695, %v3215_v33  ;;  %v6593_v45 = vpop.f32.mrb[29].mxu1  ;;  %v774_v33 = vld [vmem:[%s738_s16 + $0x18] sm:$0xff]  ;;  %s8667_s16 = sld [smem:[#allocation16_spill]] }
0x2264   : > { %7369 = vpow2.f32 %v6011_v30  ;;  %v8323_v30 = vpack.c.bf16 %v774_v33, %v773_v32 }
0x226c   : > { %v7368_v11 = vpop.eup %7367 }
0x226d   : > { %3225 = vrot.lane.b32.xlu0 %v7368_v11, %s7612_s14 }
0x226e   : > { %v7370_v52 = vpop.eup %7369 }
0x226f   : > { %v3219_v35 = vadd.f32 1.0, %v7370_v52 }
0x2271   : > { %7371 = vrcp.f32 %v3219_v35 }
0x227b   : > { %v7372_v37 = vpop.eup %7371 }
0x227c   : > { %v3223_v56 = vmul.f32 %v7372_v37, %v3063_v22  ;;  %v778_v22 = vld [vmem:[%s743_s20 + $0x18] sm:$0xff]  ;;  %s5946_s20 = sshll.u32 %s8674_s17, 1 }
0x227d   : > { %v8310_v24 = vpack.c.bf16 %v778_v22, %v777_v20  ;;  %s758_s21 = scalar_lea.vmem %s8667_s16, %s5946_s20 }
0x22df   : > { %v3226_v39 = vpop.permute.xlu0 %3225 }
0x22e0   : > { %v3228_v41 = vmul.f32 %v7372_v37, %v3226_v39 }
0x22e2   : > { %3230 = vrot.lane.b32.xlu1 %v3228_v41, %s7613_s27 }
0x2354   : > { %v3231_v14 = vpop.permute.xlu1 %3230 }
0x2355   : > { %v3233_v10 = vadd.f32 %v3231_v14, %v3223_v56 }
0x2357   : > { %7373 = vtanh.f32 %v3233_v10 }
0x2361   : > { %v7374_v42 = vpop.eup %7373 }
0x2362   : > { %3236 = vrot.lane.b32.xlu0 %v7374_v42, %s7612_s14 }
0x23d4   : > { %v3237_v61 = vpop.permute.xlu0 %3236 }
0x23d5   : > { %v3239_v46 = vmul.f32 %v7372_v37, %v3237_v61 }
0x23d7   : > { %3241 = vrot.lane.b32.xlu1 %v3239_v46, %s7613_s27 }
0x2449   : > { %v8284_v47 = vpop.permute.xlu1 %3241 }
0x244a   : > { %6585 = vmatmul.mubr.msk.f32.vlgmr.msra.gmra.mrb[28].mxu0 %vm820_vm5, %v8284_v47 }
0x244b   : > { %7057 = vmatpush3.bf16.msk.msra.mxu0 %vm7895_vm3, %v8121_v60  ;;  %6609 = vmatprep.mubr.msk.f32.mxu0 %vm7609_vm0, %v7610_v1 }
0x244c   : > { %7058 = vmatprep.subr.bf16.mxu0 %v7608_v0 }
0x244e   : > { %6610 = vmatmul.mubr.msk.f32.vlgmr.msra.gmra.mrb[30].mxu0 %vm894_vm4, %v7471_v48 }
0x244f   : > { %6620 = vmatprep.mubr.msk.f32.mxu0 %vm7609_vm0, %v7610_v1  ;;  %7060 = vmatpush3.bf16.msra.mxu0 %v8306_v38 }
0x2450   : > { %7061 = vmatprep.subr.bf16.mxu0 %v7608_v0 }
0x2453   : > { %7063 = vmatpush3.bf16.msra.mxu0 %v8310_v24 }
0x2454   : > { %7070 = vmatprep.subr.bf16.mxu0 %v7608_v0 }
0x251d   : > { %v3311_v49 = vpop.f32.mrb[28].mxu0 }
0x251e   : > { %v3382_v50 = vadd.f32 %v3381_v43, %v3311_v49  ;;  %v6586_v53 = vpop.f32.mrb[29].mxu0 }
0x2520   : > { %v3385_v54 = vadd.f32 %v8162_v17, %v3382_v50 }
0x2521   : > { %v3551_v25 = vpop.f32.mrb[30].mxu0 }
0x2522   : > { %7375 = vtanh.f32 %v3385_v54  ;;  %v6015_v2 = vmul.f32 -1.442695, %v3385_v54  ;;  %v6611_v26 = vpop.f32.mrb[31].mxu0  ;;  %v779_v54 = vld [vmem:[%s748_s19] sm:$0xff] }
0x2524   : > { %7377 = vpow2.f32 %v6015_v2 }
0x252c   : > { %v7376_v55 = vpop.eup %7375 }
0x252d   : > { %3395 = vrot.lane.b32.xlu0 %v7376_v55, %s7612_s14  ;;  %v780_v55 = vld [vmem:[%s748_s19 + $0x8] sm:$0xff] }
0x252e   : > { %v7378_v60 = vpop.eup %7377  ;;  %v8351_v2 = vpack.c.bf16 %v780_v55, %v779_v54 }
0x252f   : > { %v3389_v59 = vadd.f32 1.0, %v7378_v60  ;;  %v781_v60 = vld [vmem:[%s748_s19 + $0x10] sm:$0xff] }
0x2531   : > { %7379 = vrcp.f32 %v3389_v59  ;;  %v782_v59 = vld [vmem:[%s748_s19 + $0x18] sm:$0xff] }
0x253b   : > { %v7380_v62 = vpop.eup %7379 }
0x253c   : > { %v3393_v8 = vmul.f32 %v7380_v62, %v3233_v10 }
0x259f   : > { %v3396_v63 = vpop.permute.xlu0 %3395 }
0x25a0   : > { %v3398_v3 = vmul.f32 %v7380_v62, %v3396_v63 }
0x25a2   : > { %3400 = vrot.lane.b32.xlu1 %v3398_v3, %s7613_s27 }
0x2614   : > { %v3401_v51 = vpop.permute.xlu1 %3400 }
0x2615   : > { %v3403_v9 = vadd.f32 %v3401_v51, %v3393_v8 }
0x2617   : > { %7381 = vtanh.f32 %v3403_v9 }
0x2621   : > { %v7382_v12 = vpop.eup %7381 }
0x2622   : > { %3406 = vrot.lane.b32.xlu0 %v7382_v12, %s7612_s14  ;;  %v8394_v12 = vld [vmem:[%s751_s25] ss:$0 sm:$0xff] }
0x2694   : > { %v3407_v19 = vpop.permute.xlu0 %3406 }
0x2695   : > { %v3409_v23 = vmul.f32 %v7380_v62, %v3407_v19  ;;  %v8355_v62 = vpack.c.bf16 %v782_v59, %v781_v60 }
0x2697   : > { %3411 = vrot.lane.b32.xlu1 %v3409_v23, %s7613_s27 }
0x2709   : > { %v3412_v11 = vpop.permute.xlu1 %3411 }
0x270a   : > { %6603 = vmatmul.mubr.msk.f32.vlgmr.msra.gmra.mrb[30].mxu1 %vm820_vm5, %v3412_v11 }
0x270b   : > { %7066 = vmatpush3.bf16.msra.mxu1 %v8319_v31  ;;  %6631 = vmatprep.mubr.msk.f32.mxu1 %vm7609_vm0, %v7610_v1 }
0x270c   : > { %7067 = vmatprep.subr.bf16.mxu1 %v7608_v0 }
0x270f   : > { %7069 = vmatpush3.bf16.msra.mxu1 %v8323_v30 }
0x2710   : > { %7076 = vmatprep.subr.bf16.mxu1 %v7608_v0 }
0x2712   : > { %6632 = vmatmul.mubr.msk.f32.vlgmr.msra.gmra.mrb[32].mxu1 %vm820_vm5, %v7954_v36 }
0x2713   : > { %7078 = vmatpush3.bf16.msra.mxu1 %v8306_v38  ;;  %6653 = vmatprep.mubr.msk.f32.mxu1 %vm7609_vm0, %v7610_v1 }
0x2714   : > { %7079 = vmatprep.subr.bf16.mxu1 %v7608_v0 }
0x2717   : > { %7081 = vmatpush3.bf16.msra.mxu1 %v8310_v24 }
0x2718   : > { %7088 = vmatprep.subr.bf16.mxu1 %v7608_v0 }
0x271a   : > { %6654 = vmatmul.mubr.msk.f32.vlgmr.msra.gmra.mrb[34].mxu1 %vm820_vm5, %v3412_v11 }
0x271b   : > { %6675 = vmatprep.mubr.msk.f32.mxu1 %vm7609_vm0, %v7610_v1  ;;  %7090 = vmatpush3.bf16.msra.mxu1 %v8351_v2 }
0x271c   : > { %7091 = vmatprep.subr.bf16.mxu1 %v7608_v0 }
0x271f   : > { %7093 = vmatpush3.bf16.msra.mxu1 %v8355_v62 }
0x2720   : > { %7100 = vmatprep.subr.bf16.mxu1 %v7608_v0 }
0x27dd   : > { %v3481_v52 = vpop.f32.mrb[30].mxu1 }
0x27de   : > { %v3552_v35 = vadd.f32 %v3551_v25, %v3481_v52  ;;  %v6604_v37 = vpop.f32.mrb[31].mxu1 }
0x27e0   : > { %v3555_v36 = vadd.f32 %v8162_v17, %v3552_v35 }
0x27e2   : > { %7383 = vtanh.f32 %v3555_v36  ;;  %v6019_v42 = vmul.f32 -1.442695, %v3555_v36 }
0x27e4   : > { %7385 = vpow2.f32 %v6019_v42 }
0x27e5   : > { %v3721_v39 = vpop.f32.mrb[32].mxu1 }
0x27e6   : > { %v6633_v41 = vpop.f32.mrb[33].mxu1 }
0x27ec   : > { %v7384_v56 = vpop.eup %7383 }
0x27ed   : > { %v8342_v14 = vpop.f32.mrb[34].mxu1  ;;  %3565 = vrot.lane.b32.xlu0 %v7384_v56, %s7612_s14 }
0x27ee   : > { %v6655_v10 = vpop.f32.mrb[35].mxu1  ;;  %v7386_v43 = vpop.eup %7385 }
0x27ef   : > { %v3559_v45 = vadd.f32 1.0, %v7386_v43 }
0x27f1   : > { %7387 = vrcp.f32 %v3559_v45 }
0x27fb   : > { %v7388_v61 = vpop.eup %7387 }
0x27fc   : > { %v3563_v17 = vmul.f32 %v7388_v61, %v3403_v9 }
0x285f   : > { %v3566_v46 = vpop.permute.xlu0 %3565 }
0x2860   : > { %v3568_v48 = vmul.f32 %v7388_v61, %v3566_v46 }
0x2862   : > { %3570 = vrot.lane.b32.xlu1 %v3568_v48, %s7613_s27 }
0x28d4   : > { %v3571_v49 = vpop.permute.xlu1 %3570 }
0x28d5   : > { %v3573_v50 = vadd.f32 %v3571_v49, %v3563_v17 }
0x28d7   : > { %7389 = vtanh.f32 %v3573_v50 }
0x28e1   : > { %v7390_v53 = vpop.eup %7389 }
0x28e2   : > { %3576 = vrot.lane.b32.xlu0 %v7390_v53, %s7612_s14 }
0x2954   : > { %v3577_v63 = vpop.permute.xlu0 %3576 }
0x2955   : > { %v3579_v3 = vmul.f32 %v7388_v61, %v3577_v63 }
0x2957   : > { %3581 = vrot.lane.b32.xlu1 %v3579_v3, %s7613_s27 }
0x29c9   : > { %v3582_v8 = vpop.permute.xlu1 %3581 }
0x29ca   : > { %6621 = vmatmul.mubr.msk.f32.vlgmr.msra.gmra.mrb[32].mxu0 %vm820_vm5, %v3582_v8 }
0x29cb   : > { %7072 = vmatpush3.bf16.msra.mxu0 %v8351_v2  ;;  %6642 = vmatprep.mubr.msk.f32.mxu0 %vm7609_vm0, %v7610_v1 }
0x29cc   : > { %7073 = vmatprep.subr.bf16.mxu0 %v7608_v0 }
0x29cf   : > { %7075 = vmatpush3.bf16.msra.mxu0 %v8355_v62 }
0x29d0   : > { %7082 = vmatprep.subr.bf16.mxu0 %v7608_v0 }
0x29d2   : > { %6643 = vmatmul.mubr.f32.vlgmr.msra.gmra.mrb[34].mxu0 %v7610_v1 }
0x29d3   : > { %7084 = vmatpush3.bf16.msra.mxu0 %v8319_v31  ;;  %6664 = vmatprep.mubr.msk.f32.mxu0 %vm7609_vm0, %v7610_v1 }
0x29d4   : > { %7085 = vmatprep.subr.bf16.mxu0 %v7608_v0 }
0x29d7   : > { %7087 = vmatpush3.bf16.msra.mxu0 %v8323_v30 }
0x29d8   : > { %7094 = vmatprep.subr.bf16.mxu0 %v7608_v0 }
0x29da   : > { %6665 = vmatmul.mubr.msk.f32.vlgmr.msra.gmra.mrb[36].mxu0 %vm820_vm5, %v7980_v57 }
0x29db   : > { %7096 = vmatpush3.bf16.msra.mxu0 %v8306_v38  ;;  %6686 = vmatprep.mubr.msk.f32.mxu0 %vm7609_vm0, %v7610_v1 }
0x29dc   : > { %7097 = vmatprep.subr.bf16.mxu0 %v7608_v0 }
0x29df   : > { %7099 = vmatpush3.bf16.msra.mxu0 %v8310_v24 }
0x29e0   : > { %7106 = vmatprep.subr.bf16.mxu0 %v7608_v0 }
0x29e2   : > { %6687 = vmatmul.mubr.msk.f32.vlgmr.msra.gmra.mrb[38].mxu0 %vm820_vm5, %v8284_v47 }
0x29e3   : > { %7108 = vmatpush3.bf16.msra.mxu0 %v8351_v2  ;;  %6708 = vmatprep.mubr.msk.f32.mxu0 %vm7609_vm0, %v7610_v1 }
0x29e4   : > { %7109 = vmatprep.subr.bf16.mxu0 %v7608_v0 }
0x29e7   : > { %7111 = vmatpush3.bf16.msra.mxu0 %v8355_v62 }
0x29e8   : > { %7118 = vmatprep.subr.bf16.mxu0 %v7608_v0 }
0x2a9d   : > { %v3651_v57 = vpop.f32.mrb[32].mxu0 }
0x2a9e   : > { %v3722_v51 = vadd.f32 %v3721_v39, %v3651_v57  ;;  %v6622_v9 = vpop.f32.mrb[33].mxu0 }
0x2aa5   : > { %v3791_v47 = vpop.f32.mrb[34].mxu0 }
0x2aa6   : > { %v3795_v16 = vadd.f32 %v3791_v47, %v3722_v51  ;;  %v6644_v18 = vpop.f32.mrb[35].mxu0 }
0x2aa8   : > { %v3796_v19 = vadd.f32 %v8394_v12, %v3795_v16 }
0x2aaa   : > { %7391 = vtanh.f32 %v3796_v19  ;;  %v6022_v29 = vmul.f32 -1.442695, %v3796_v19 }
0x2aac   : > { %7393 = vpow2.f32 %v6022_v29 }
0x2aad   : > { %v3957_v20 = vpop.f32.mrb[36].mxu0 }
0x2aae   : > { %v3958_v22 = vadd.f32 %v3957_v20, %v8342_v14  ;;  %v6666_v23 = vpop.f32.mrb[37].mxu0 }
0x2ab4   : > { %v7392_v25 = vpop.eup %7391 }
0x2ab5   : > { %v4128_v26 = vpop.f32.mrb[38].mxu0  ;;  %3806 = vrot.lane.b32.xlu0 %v7392_v25, %s7612_s14 }
0x2ab6   : > { %v6688_v27 = vpop.f32.mrb[39].mxu0  ;;  %v7394_v32 = vpop.eup %7393 }
0x2ab7   : > { %v3800_v33 = vadd.f32 1.0, %v7394_v32 }
0x2ab9   : > { %7395 = vrcp.f32 %v3800_v33 }
0x2ac3   : > { %v7396_v11 = vpop.eup %7395 }
0x2ac4   : > { %v3804_v37 = vmul.f32 0.0, %v7396_v11 }
0x2b27   : > { %v3807_v52 = vpop.permute.xlu0 %3806 }
0x2b28   : > { %v3809_v35 = vmul.f32 %v7396_v11, %v3807_v52 }
0x2b2a   : > { %3811 = vrot.lane.b32.xlu1 %v3809_v35, %s7613_s27 }
0x2b9c   : > { %v3812_v36 = vpop.permute.xlu1 %3811 }
0x2b9d   : > { %v3814_v39 = vadd.f32 %v3812_v36, %v3804_v37 }
0x2b9f   : > { %7397 = vtanh.f32 %v3814_v39 }
0x2ba9   : > { %v7398_v41 = vpop.eup %7397 }
0x2baa   : > { %3817 = vrot.lane.b32.xlu0 %v7398_v41, %s7612_s14 }
0x2c1c   : > { %v3818_v56 = vpop.permute.xlu0 %3817 }
0x2c1d   : > { %v3820_v14 = vmul.f32 %v7396_v11, %v3818_v56 }
0x2c1f   : > { %3962 = vrot.lane.b32.xlu1 %v3820_v14, %s7613_s27 }
0x2c91   : > { %v3963_v10 = vpop.permute.xlu1 %3962 }
0x2c92   : > { %6676 = vmatmul.mubr.msk.f32.vlgmr.msra.gmra.mrb[36].mxu1 %vm820_vm5, %v3963_v10 }
0x2c93   : > { %7102 = vmatpush3.bf16.msra.mxu1 %v8319_v31  ;;  %6697 = vmatprep.mubr.msk.f32.mxu1 %vm7609_vm0, %v7610_v1 }
0x2c94   : > { %7103 = vmatprep.subr.bf16.mxu1 %v7608_v0 }
0x2c97   : > { %7105 = vmatpush3.bf16.msra.mxu1 %v8323_v30 }
0x2c98   : > { %7112 = vmatprep.subr.bf16.mxu1 %v7608_v0 }
0x2c9a   : > { %6698 = vmatmul.mubr.msk.f32.vlgmr.msra.gmra.mrb[38].mxu1 %vm820_vm5, %v8006_v21 }
0x2c9b   : > { %7114 = vmatpush3.bf16.msra.mxu1 %v8306_v38  ;;  %6719 = vmatprep.mubr.msk.f32.mxu1 %vm7609_vm0, %v7610_v1 }
0x2c9c   : > { %7115 = vmatprep.subr.bf16.mxu1 %v7608_v0 }
0x2c9f   : > { %7117 = vmatpush3.bf16.msra.mxu1 %v8310_v24 }
0x2ca0   : > { %7124 = vmatprep.subr.bf16.mxu1 %v7608_v0 }
0x2ca2   : > { %6720 = vmatmul.mubr.msk.f32.vlgmr.msra.gmra.mrb[40].mxu1 %vm820_vm5, %v8261_v28 }
0x2ca3   : > { %7126 = vmatpush3.bf16.msra.mxu1 %v8351_v2  ;;  %6741 = vmatprep.mubr.msk.f32.mxu1 %vm7609_vm0, %v7610_v1 }
0x2ca4   : > { %7127 = vmatprep.subr.bf16.mxu1 %v7608_v0 }
0x2ca7   : > { %7129 = vmatpush3.bf16.msra.mxu1 %v8355_v62 }
0x2ca8   : > { %7136 = vmatprep.subr.bf16.mxu1 %v7608_v0 }
0x2d65   : > { %v4032_v21 = vpop.f32.mrb[36].mxu1 }
0x2d66   : > { %v4036_v42 = vadd.f32 %v4032_v21, %v3958_v22  ;;  %v6677_v43 = vpop.f32.mrb[37].mxu1 }
0x2d68   : > { %v4037_v45 = vadd.f32 %v8394_v12, %v4036_v42 }
0x2d6a   : > { %7399 = vtanh.f32 %v4037_v45  ;;  %v6026_v50 = vmul.f32 -1.442695, %v4037_v45 }
0x2d6c   : > { %7401 = vpow2.f32 %v6026_v50 }
0x2d6d   : > { %v4198_v61 = vpop.f32.mrb[38].mxu1 }
0x2d6e   : > { %v4199_v46 = vadd.f32 %v4198_v61, %v4128_v26  ;;  %v6699_v28 = vpop.f32.mrb[39].mxu1 }
0x2d74   : > { %v7400_v48 = vpop.eup %7399 }
0x2d75   : > { %v4369_v17 = vpop.f32.mrb[40].mxu1  ;;  %4047 = vrot.lane.b32.xlu0 %v7400_v48, %s7612_s14 }
0x2d76   : > { %v6721_v49 = vpop.f32.mrb[41].mxu1  ;;  %v7402_v53 = vpop.eup %7401 }
0x2d77   : > { %v4041_v54 = vadd.f32 1.0, %v7402_v53 }
0x2d79   : > { %7403 = vrcp.f32 %v4041_v54 }
0x2d83   : > { %v7404_v55 = vpop.eup %7403 }
0x2d84   : > { %v4045_v63 = vmul.f32 %v7404_v55, %v3814_v39 }
0x2de7   : > { %v4048_v60 = vpop.permute.xlu0 %4047 }
0x2de8   : > { %v4050_v59 = vmul.f32 %v7404_v55, %v4048_v60 }
0x2dea   : > { %4052 = vrot.lane.b32.xlu1 %v4050_v59, %s7613_s27 }
0x2e5c   : > { %v4053_v3 = vpop.permute.xlu1 %4052 }
0x2e5d   : > { %v4055_v8 = vadd.f32 %v4053_v3, %v4045_v63 }
0x2e5f   : > { %7405 = vtanh.f32 %v4055_v8 }
0x2e69   : > { %v7406_v57 = vpop.eup %7405 }
0x2e6a   : > { %4058 = vrot.lane.b32.xlu0 %v7406_v57, %s7612_s14 }
0x2edc   : > { %v4059_v51 = vpop.permute.xlu0 %4058 }
0x2edd   : > { %v4061_v9 = vmul.f32 %v7404_v55, %v4059_v51 }
0x2edf   : > { %4203 = vrot.lane.b32.xlu1 %v4061_v9, %s7613_s27 }
0x2f51   : > { %v4204_v47 = vpop.permute.xlu1 %4203 }
0x2f52   : > { %6709 = vmatmul.mubr.msk.f32.vlgmr.msra.gmra.mrb[40].mxu0 %vm820_vm5, %v4204_v47 }
0x2f53   : > { %7120 = vmatpush3.bf16.msra.mxu0 %v8319_v31  ;;  %6730 = vmatprep.mubr.msk.f32.mxu0 %vm7609_vm0, %v7610_v1 }
0x2f54   : > { %7121 = vmatprep.subr.bf16.mxu0 %v7608_v0 }
0x2f57   : > { %7123 = vmatpush3.bf16.msra.mxu0 %v8323_v30 }
0x2f58   : > { %7130 = vmatprep.subr.bf16.mxu0 %v7608_v0 }
0x2f5a   : > { %6731 = vmatmul.mubr.msk.f32.vlgmr.msra.gmra.mrb[42].mxu0 %vm820_vm5, %v8032_v44 }
0x2f5b   : > { %7132 = vmatpush3.bf16.msra.mxu0 %v8306_v38  ;;  %6752 = vmatprep.mubr.msk.f32.mxu0 %vm7609_vm0, %v7610_v1 }
0x2f5c   : > { %7133 = vmatprep.subr.bf16.mxu0 %v7608_v0 }
0x2f5f   : > { %7135 = vmatpush3.bf16.msra.mxu0 %v8310_v24 }
0x2f60   : > { %7142 = vmatprep.subr.bf16.mxu0 %v7608_v0 }
0x2f62   : > { %6753 = vmatmul.mubr.msk.f32.vlgmr.msra.gmra.mrb[44].mxu0 %vm820_vm5, %v8238_v58 }
0x2f63   : > { %7144 = vmatpush3.bf16.msra.mxu0 %v8351_v2  ;;  %6774 = vmatprep.mubr.msk.f32.mxu0 %vm7609_vm0, %v7610_v1 }
0x2f64   : > { %7145 = vmatprep.subr.bf16.mxu0 %v7608_v0 }
0x2f67   : > { %7147 = vmatpush3.bf16.msra.mxu0 %v8355_v62 }
0x2f68   : > { %7154 = vmatprep.subr.bf16.mxu0 %v7608_v0 }
0x3025   : > { %v4273_v44 = vpop.f32.mrb[40].mxu0 }
0x3026   : > { %v4277_v16 = vadd.f32 %v4273_v44, %v4199_v46  ;;  %v6710_v18 = vpop.f32.mrb[41].mxu0 }
0x3028   : > { %v4278_v19 = vadd.f32 %v8394_v12, %v4277_v16 }
0x302a   : > { %7407 = vtanh.f32 %v4278_v19  ;;  %v6030_v27 = vmul.f32 -1.442695, %v4278_v19 }
0x302c   : > { %7409 = vpow2.f32 %v6030_v27 }
0x302d   : > { %v4439_v20 = vpop.f32.mrb[42].mxu0 }
0x302e   : > { %v4440_v22 = vadd.f32 %v4439_v20, %v4369_v17  ;;  %v6732_v58 = vpop.f32.mrb[43].mxu0 }
0x3034   : > { %v7408_v23 = vpop.eup %7407 }
0x3035   : > { %v4610_v25 = vpop.f32.mrb[44].mxu0  ;;  %4288 = vrot.lane.b32.xlu0 %v7408_v23, %s7612_s14 }
0x3036   : > { %v6754_v26 = vpop.f32.mrb[45].mxu0  ;;  %v7410_v29 = vpop.eup %7409 }
0x3037   : > { %v4282_v32 = vadd.f32 1.0, %v7410_v29 }
0x3039   : > { %7411 = vrcp.f32 %v4282_v32 }
0x3043   : > { %v7412_v33 = vpop.eup %7411 }
0x3044   : > { %v4286_v35 = vmul.f32 %v7412_v33, %v4055_v8 }
0x30a7   : > { %v4289_v11 = vpop.permute.xlu0 %4288 }
0x30a8   : > { %v4291_v52 = vmul.f32 %v7412_v33, %v4289_v11 }
0x30aa   : > { %4293 = vrot.lane.b32.xlu1 %v4291_v52, %s7613_s27 }
0x311c   : > { %v4294_v37 = vpop.permute.xlu1 %4293 }
0x311d   : > { %v4296_v36 = vadd.f32 %v4294_v37, %v4286_v35 }
0x311f   : > { %7413 = vtanh.f32 %v4296_v36 }
0x3129   : > { %v7414_v39 = vpop.eup %7413 }
0x312a   : > { %4299 = vrot.lane.b32.xlu0 %v7414_v39, %s7612_s14 }
0x319c   : > { %v4300_v41 = vpop.permute.xlu0 %4299 }
0x319d   : > { %v4302_v56 = vmul.f32 %v7412_v33, %v4300_v41 }
0x319f   : > { %4444 = vrot.lane.b32.xlu1 %v4302_v56, %s7613_s27 }
0x3211   : > { %v4445_v14 = vpop.permute.xlu1 %4444 }
0x3212   : > { %6742 = vmatmul.mubr.msk.f32.vlgmr.msra.gmra.mrb[42].mxu1 %vm820_vm5, %v4445_v14 }
0x3213   : > { %7138 = vmatpush3.bf16.msra.mxu1 %v8319_v31  ;;  %6763 = vmatprep.mubr.msk.f32.mxu1 %vm7609_vm0, %v7610_v1 }
0x3214   : > { %7139 = vmatprep.subr.bf16.mxu1 %v7608_v0 }
0x3217   : > { %7141 = vmatpush3.bf16.msra.mxu1 %v8323_v30 }
0x3218   : > { %7148 = vmatprep.subr.bf16.mxu1 %v7608_v0 }
0x321a   : > { %6764 = vmatmul.mubr.msk.f32.vlgmr.msra.gmra.mrb[44].mxu1 %vm820_vm5, %v8058_v7 }
0x321b   : > { %7150 = vmatpush3.bf16.msra.mxu1 %v8306_v38  ;;  %6785 = vmatprep.mubr.msk.f32.mxu1 %vm7609_vm0, %v7610_v1 }
0x321c   : > { %7151 = vmatprep.subr.bf16.mxu1 %v7608_v0 }
0x321f   : > { %7153 = vmatpush3.bf16.msra.mxu1 %v8310_v24 }
0x3220   : > { %7160 = vmatprep.subr.bf16.mxu1 %v7608_v0 }
0x3222   : > { %6786 = vmatmul.mubr.msk.f32.vlgmr.msra.gmra.mrb[46].mxu1 %vm820_vm5, %v8215_v6 }
0x3223   : > { %7162 = vmatpush3.bf16.msra.mxu1 %v8351_v2  ;;  %6807 = vmatprep.mubr.msk.f32.mxu1 %vm7609_vm0, %v7610_v1 }
0x3224   : > { %7163 = vmatprep.subr.bf16.mxu1 %v7608_v0 }
0x3227   : > { %7165 = vmatpush3.bf16.msra.mxu1 %v8355_v62 }
0x3228   : > { %7172 = vmatprep.subr.bf16.mxu1 %v7608_v0 }
0x32e5   : > { %v4514_v7 = vpop.f32.mrb[42].mxu1 }
0x32e6   : > { %v4518_v10 = vadd.f32 %v4514_v7, %v4440_v22  ;;  %v6743_v21 = vpop.f32.mrb[43].mxu1 }
0x32e8   : > { %v4519_v42 = vadd.f32 %v8394_v12, %v4518_v10 }
0x32ea   : > { %7415 = vtanh.f32 %v4519_v42  ;;  %v6034_v48 = vmul.f32 -1.442695, %v4519_v42 }
0x32ec   : > { %7417 = vpow2.f32 %v6034_v48 }
0x32ed   : > { %v4680_v43 = vpop.f32.mrb[44].mxu1 }
0x32ee   : > { %v4681_v45 = vadd.f32 %v4680_v43, %v4610_v25  ;;  %v6765_v6 = vpop.f32.mrb[45].mxu1 }
0x32f4   : > { %v7416_v61 = vpop.eup %7415 }
0x32f5   : > { %v4851_v46 = vpop.f32.mrb[46].mxu1  ;;  %4529 = vrot.lane.b32.xlu0 %v7416_v61, %s7612_s14 }
0x32f6   : > { %v6787_v28 = vpop.f32.mrb[47].mxu1  ;;  %v7418_v17 = vpop.eup %7417 }
0x32f7   : > { %v4523_v49 = vadd.f32 1.0, %v7418_v17  ;;  %v7472_v28 = vld [vmem:[%s586_s28] ss:$0 sm:$0xff]  ;;  %s604_s28 = scalar_lea.vmem [#allocation6], %s5928_s10 }
0x32f8   : > { %v2197_v48 = vadd.f32 %v7472_v28, %v8156_v13 }
0x32f9   : > { %7419 = vrcp.f32 %v4523_v49 }
0x3303   : > { %v7420_v50 = vpop.eup %7419 }
0x3304   : > { %v4527_v55 = vmul.f32 %v7420_v50, %v4296_v36 }
0x3367   : > { %v4530_v53 = vpop.permute.xlu0 %4529 }
0x3368   : > { %v4532_v54 = vmul.f32 %v7420_v50, %v4530_v53 }
0x336a   : > { %4534 = vrot.lane.b32.xlu1 %v4532_v54, %s7613_s27 }
0x33dc   : > { %v4535_v60 = vpop.permute.xlu1 %4534 }
0x33dd   : > { %v4537_v59 = vadd.f32 %v4535_v60, %v4527_v55 }
0x33df   : > { %7421 = vtanh.f32 %v4537_v59 }
0x33e9   : > { %v7422_v63 = vpop.eup %7421 }
0x33ea   : > { %4540 = vrot.lane.b32.xlu0 %v7422_v63, %s7612_s14 }
0x345c   : > { %v4541_v3 = vpop.permute.xlu0 %4540 }
0x345d   : > { %v4543_v8 = vmul.f32 %v7420_v50, %v4541_v3  ;;  %v5988_v50 = vmul.f32 -1.442695, %v2197_v48 }
0x345f   : > { %4685 = vrot.lane.b32.xlu1 %v4543_v8, %s7613_s27 }
0x34d1   : > { %v4686_v57 = vpop.permute.xlu1 %4685 }
0x34d2   : > { %6775 = vmatmul.mubr.msk.f32.vlgmr.msra.gmra.mrb[46].mxu0 %vm820_vm5, %v4686_v57 }
0x34d3   : > { %7156 = vmatpush3.bf16.msra.mxu0 %v8319_v31  ;;  %6796 = vmatprep.mubr.msk.f32.mxu0 %vm7609_vm0, %v7610_v1 }
0x34d4   : > { %7157 = vmatprep.subr.bf16.mxu0 %v7608_v0 }
0x34d7   : > { %7159 = vmatpush3.bf16.msra.mxu0 %v8323_v30 }
0x34d8   : > { %7166 = vmatprep.subr.bf16.mxu0 %v7608_v0 }
0x34da   : > { %6797 = vmatmul.mubr.msk.f32.vlgmr.msra.gmra.mrb[48].mxu0 %vm820_vm5, %v8084_v34 }
0x34db   : > { %7168 = vmatpush3.bf16.msra.mxu0 %v8306_v38  ;;  %6818 = vmatprep.mubr.msk.f32.mxu0 %vm7609_vm0, %v7610_v1 }
0x34dc   : > { %7169 = vmatprep.subr.bf16.mxu0 %v7608_v0 }
0x34df   : > { %7171 = vmatpush3.bf16.msra.mxu0 %v8310_v24 }
0x34e0   : > { %7178 = vmatprep.subr.bf16.mxu0 %v7608_v0 }
0x34e2   : > { %6819 = vmatmul.mubr.msk.f32.vlgmr.msra.gmra.mrb[50].mxu0 %vm820_vm5, %v8192_v4 }
0x34e3   : > { %7180 = vmatpush3.bf16.msra.mxu0 %v8351_v2  ;;  %6840 = vmatprep.mubr.msk.f32.mxu0 %vm7609_vm0, %v7610_v1 }
0x34e4   : > { %7181 = vmatprep.subr.bf16.mxu0 %v7608_v0 }
0x34e7   : > { %7183 = vmatpush3.bf16.msra.mxu0 %v8355_v62 }
0x34e8   : > { %7190 = vmatprep.subr.bf16.mxu0 %v7608_v0 }
0x35a5   : > { %v4755_v34 = vpop.f32.mrb[46].mxu0 }
0x35a6   : > { %v4759_v51 = vadd.f32 %v4755_v34, %v4681_v45  ;;  %v6776_v9 = vpop.f32.mrb[47].mxu0 }
0x35a8   : > { %v4760_v47 = vadd.f32 %v8394_v12, %v4759_v51 }
0x35aa   : > { %7423 = vtanh.f32 %v4760_v47  ;;  %v6038_v22 = vmul.f32 -1.442695, %v4760_v47 }
0x35ac   : > { %7425 = vpow2.f32 %v6038_v22  ;;  %v790_v22 = vld [vmem:[%s604_s28 + $0x18] sm:$0xff] }
0x35ad   : > { %v4921_v44 = vpop.f32.mrb[48].mxu0 }
0x35ae   : > { %v4922_v16 = vadd.f32 %v4921_v44, %v4851_v46  ;;  %v6798_v4 = vpop.f32.mrb[49].mxu0 }
0x35b4   : > { %v7424_v18 = vpop.eup %7423 }
0x35b5   : > { %v5092_v19 = vpop.f32.mrb[50].mxu0  ;;  %4770 = vrot.lane.b32.xlu0 %v7424_v18, %s7612_s14  ;;  %v788_v18 = vld [vmem:[%s604_s28 + $0x8] sm:$0xff] }
0x35b6   : > { %v6820_v20 = vpop.f32.mrb[51].mxu0  ;;  %v7426_v58 = vpop.eup %7425 }
0x35b7   : > { %v4764_v23 = vadd.f32 1.0, %v7426_v58  ;;  %v789_v20 = vld [vmem:[%s604_s28 + $0x10] sm:$0xff] }
0x35b9   : > { %7427 = vrcp.f32 %v4764_v23  ;;  %v7206_v23 = vpack.c.bf16 %v790_v22, %v789_v20 }
0x35c3   : > { %v7428_v25 = vpop.eup %7427 }
0x35c4   : > { %v4768_v29 = vmul.f32 %v7428_v25, %v4537_v59 }
0x3627   : > { %v4771_v26 = vpop.permute.xlu0 %4770 }
0x3628   : > { %v4773_v27 = vmul.f32 %v7428_v25, %v4771_v26 }
0x362a   : > { %4775 = vrot.lane.b32.xlu1 %v4773_v27, %s7613_s27 }
0x369c   : > { %v4776_v32 = vpop.permute.xlu1 %4775 }
0x369d   : > { %v4778_v33 = vadd.f32 %v4776_v32, %v4768_v29 }
0x369f   : > { %7429 = vtanh.f32 %v4778_v33 }
0x36a9   : > { %v7430_v11 = vpop.eup %7429 }
0x36aa   : > { %4781 = vrot.lane.b32.xlu0 %v7430_v11, %s7612_s14 }
0x371c   : > { %v4782_v52 = vpop.permute.xlu0 %4781 }
0x371d   : > { %v4784_v35 = vmul.f32 %v7428_v25, %v4782_v52 }
0x371f   : > { %4926 = vrot.lane.b32.xlu1 %v4784_v35, %s7613_s27 }
0x3791   : > { %v4927_v37 = vpop.permute.xlu1 %4926 }
0x3792   : > { %6808 = vmatmul.mubr.msk.f32.vlgmr.msra.gmra.mrb[48].mxu1 %vm820_vm5, %v4927_v37 }
0x3793   : > { %7174 = vmatpush3.bf16.msra.mxu1 %v8319_v31  ;;  %6829 = vmatprep.mubr.msk.f32.mxu1 %vm7609_vm0, %v7610_v1 }
0x3794   : > { %7175 = vmatprep.subr.bf16.mxu1 %v7608_v0 }
0x3797   : > { %7177 = vmatpush3.bf16.msra.mxu1 %v8323_v30 }
0x3798   : > { %7184 = vmatprep.subr.bf16.mxu1 %v7608_v0 }
0x379a   : > { %6830 = vmatmul.mubr.msk.f32.vlgmr.msra.gmra.mrb[50].mxu1 %vm820_vm5, %v8139_v5 }
0x379b   : > { %7186 = vmatpush3.bf16.msra.mxu1 %v8306_v38  ;;  %6851 = vmatprep.mubr.msk.f32.mxu1 %vm7609_vm0, %v7610_v1 }
0x379c   : > { %7187 = vmatprep.subr.bf16.mxu1 %v7608_v0 }
0x379f   : > { %7189 = vmatpush3.bf16.msra.mxu1 %v8310_v24 }
0x37a0   : > { %7196 = vmatprep.subr.bf16.mxu1 %v7608_v0 }
0x37a2   : > { %6852 = vmatmul.mubr.msk.f32.vlgmr.msra.gmra.mrb[52].mxu1 %vm820_vm5, %v8169_v40 }
0x37a3   : > { %7198 = vmatpush3.bf16.msra.mxu1 %v8351_v2  ;;  %6873 = vmatprep.mubr.msk.f32.mxu1 %vm7609_vm0, %v7610_v1 }
0x37a4   : > { %7199 = vmatprep.subr.bf16.mxu1 %v7608_v0 }
0x37a7   : > { %7201 = vmatpush3.bf16.msra.mxu1 %v8355_v62 }
0x37a8   : > { %7208 = vmatprep.subr.bf16.mxu1 %v7608_v0 }
0x3865   : > { %v4996_v5 = vpop.f32.mrb[48].mxu1 }
0x3866   : > { %v5000_v38 = vadd.f32 %v4996_v5, %v4922_v16  ;;  %v6809_v36 = vpop.f32.mrb[49].mxu1 }
0x3868   : > { %v5001_v24 = vadd.f32 %v8394_v12, %v5000_v38 }
0x386a   : > { %7431 = vtanh.f32 %v5001_v24  ;;  %v6042_v10 = vmul.f32 -1.442695, %v5001_v24 }
0x386c   : > { %7433 = vpow2.f32 %v6042_v10  ;;  %v785_v10 = vld [vmem:[%s7865_s24 + $0x10] sm:$0xff] }
0x386d   : > { %v5162_v39 = vpop.f32.mrb[50].mxu1 }
0x386e   : > { %v5163_v41 = vadd.f32 %v5162_v39, %v5092_v19  ;;  %v6831_v56 = vpop.f32.mrb[51].mxu1 }
0x386f   : > { %v783_v56 = vld [vmem:[%s7865_s24] sm:$0xff] }
0x3874   : > { %v7432_v14 = vpop.eup %7431 }
0x3875   : > { %v8538_v2 = vpop.f32.mrb[52].mxu1  ;;  %5011 = vrot.lane.b32.xlu0 %v7432_v14, %s7612_s14  ;;  %v784_v14 = vld [vmem:[%s7865_s24 + $0x8] sm:$0xff] }
0x3876   : > { %v6853_v7 = vpop.f32.mrb[53].mxu1  ;;  %v7434_v62 = vpop.eup %7433 }
0x3877   : > { %v5005_v21 = vadd.f32 1.0, %v7434_v62  ;;  %v7209_v7 = vpack.c.bf16 %v784_v14, %v783_v56  ;;  %v786_v62 = vld [vmem:[%s7865_s24 + $0x18] sm:$0xff]  ;;  %s8666_s24 = sld [smem:[#allocation15_spill]] }
0x3879   : > { %7435 = vrcp.f32 %v5005_v21 }
0x387d   : > { %s754_s29 = scalar_lea.vmem %s8666_s24, %s8674_s17 }
0x3883   : > { %v7436_v42 = vpop.eup %7435 }
0x3884   : > { %v5009_v6 = vmul.f32 %v7436_v42, %v4778_v33 }
0x38e7   : > { %v5012_v43 = vpop.permute.xlu0 %5011 }
0x38e8   : > { %v5014_v45 = vmul.f32 %v7436_v42, %v5012_v43 }
0x38ea   : > { %5016 = vrot.lane.b32.xlu1 %v5014_v45, %s7613_s27 }
0x395c   : > { %v5017_v61 = vpop.permute.xlu1 %5016 }
0x395d   : > { %v8542_v46 = vadd.f32 %v5017_v61, %v5009_v6  ;;  %v5950_v61 = vld [vmem:[%s754_s29] ss:$0 sm:$0xff] }
0x395f   : > { %7437 = vtanh.f32 %v8542_v46 }
0x3960   : > { %7439 = vtanh.f32 %v2197_v48 }
0x3961   : > { %7441 = vpow2.f32 %v5988_v50 }
0x3969   : > { %v7438_v17 = vpop.eup %7437 }
0x396a   : > { %5022 = vrot.lane.b32.xlu0 %v7438_v17, %s7612_s14  ;;  %v7440_v49 = vpop.eup %7439 }
0x396b   : > { %v7442_v53 = vpop.eup %7441 }
0x396c   : > { %v2201_v54 = vadd.f32 1.0, %v7442_v53 }
0x396e   : > { %2207 = vrot.lane.b32.xlu0 %v7440_v49, %s7612_s14  ;;  %7443 = vrcp.f32 %v2201_v54 }
0x3978   : > { %v7444_v59 = vpop.eup %7443 }
0x3979   : > { %v2205_v8 = vmul.f32 %v7444_v59, %v8097_v15 }
0x39dc   : > { %v5023_v55 = vpop.permute.xlu0 %5022 }
0x39dd   : > { %v5025_v60 = vmul.f32 %v7436_v42, %v5023_v55 }
0x39df   : > { %5167 = vrot.lane.b32.xlu1 %v5025_v60, %s7613_s27 }
0x39e0   : > { %v2208_v13 = vpop.permute.xlu0 %2207 }
0x39e1   : > { %v2210_v63 = vmul.f32 %v7444_v59, %v2208_v13 }
0x39e3   : > { %2212 = vrot.lane.b32.xlu0 %v2210_v63, %s7613_s27 }
0x3a51   : > { %v5168_v3 = vpop.permute.xlu1 %5167 }
0x3a52   : > { %6841 = vmatmul.mubr.msk.f32.vlgmr.msra.gmra.mrb[52].mxu0 %vm820_vm5, %v5168_v3 }
0x3a53   : > { %7192 = vmatpush3.bf16.msra.mxu0 %v8319_v31  ;;  %6862 = vmatprep.mubr.msk.f32.mxu0 %vm7609_vm0, %v7610_v1 }
0x3a54   : > { %7193 = vmatprep.subr.bf16.mxu0 %v7608_v0 }
0x3a55   : > { %v2213_v57 = vpop.permute.xlu0 %2212 }
0x3a56   : > { %v2215_v34 = vadd.f32 %v2213_v57, %v2205_v8 }
0x3a57   : > { %7195 = vmatpush3.bf16.msra.mxu0 %v8323_v30  ;;  %v787_v30 = vld [vmem:[%s604_s28] sm:$0xff] }
0x3a58   : > { %7445 = vtanh.f32 %v2215_v34  ;;  %7202 = vmatprep.subr.bf16.mxu0 %v7608_v0  ;;  %v7203_v19 = vpack.c.bf16 %v788_v18, %v787_v30 }
0x3a62   : > { %v7446_v51 = vpop.eup %7445 }
0x3a63   : > { %2218 = vrot.lane.b32.xlu0 %v7446_v51, %s7612_s14 }
0x3ad5   : > { %v2219_v9 = vpop.permute.xlu0 %2218 }
0x3ad6   : > { %v2221_v31 = vmul.f32 %v7444_v59, %v2219_v9 }
0x3ad8   : > { %5338 = vrot.lane.b32.xlu0 %v2221_v31, %s7613_s27 }
0x3b25   : > { %v5237_v47 = vpop.f32.mrb[52].mxu0 }
0x3b26   : > { %v5241_v44 = vadd.f32 %v5237_v47, %v5163_v41  ;;  %v6842_v15 = vpop.f32.mrb[53].mxu0 }
0x3b28   : > { %v5242_v16 = vadd.f32 %v8394_v12, %v5241_v44 }
0x3b2a   : > { %7447 = vtanh.f32 %v5242_v16  ;;  %v6046_v25 = vmul.f32 -1.442695, %v5242_v16 }
0x3b2c   : > { %7449 = vpow2.f32 %v6046_v25 }
0x3b34   : > { %v7448_v4 = vpop.eup %7447 }
0x3b35   : > { %5252 = vrot.lane.b32.xlu1 %v7448_v4, %s7612_s14 }
0x3b36   : > { %v7450_v26 = vpop.eup %7449 }
0x3b37   : > { %v5246_v27 = vadd.f32 1.0, %v7450_v26 }
0x3b39   : > { %7451 = vrcp.f32 %v5246_v27 }
0x3b43   : > { %v7452_v29 = vpop.eup %7451 }
0x3b44   : > { %v5250_v11 = vmul.f32 %v7452_v29, %v8542_v46 }
0x3b4a   : > { %v5339_v58 = vpop.permute.xlu0 %5338 }
0x3b4b   : > { %6863 = vmatmul.mubr.msk.f32.vlgmr.msra.gmra.mrb[54].mxu0 %vm820_vm5, %v5339_v58 }
0x3b4c   : > { %7204 = vmatpush3.bf16.msra.mxu0 %v7203_v19  ;;  %6884 = vmatprep.mubr.msk.f32.mxu0 %vm7609_vm0, %v7610_v1 }
0x3b4d   : > { %7205 = vmatprep.subr.bf16.mxu0 %v7608_v0 }
0x3b50   : > { %7207 = vmatpush3.bf16.msra.mxu0 %v7206_v23 }
0x3b53   : > { %6885 = vmatmul.mubr.msk.f32.vlgmr.msra.gmra.mrb[56].mxu0 %vm820_vm5, %v8169_v40 }
0x3ba7   : > { %v5253_v32 = vpop.permute.xlu1 %5252 }
0x3ba8   : > { %v5255_v33 = vmul.f32 %v7452_v29, %v5253_v32 }
0x3baa   : > { %5257 = vrot.lane.b32.xlu1 %v5255_v33, %s7613_s27 }
0x3c1c   : > { %v5258_v52 = vpop.permute.xlu1 %5257 }
0x3c1d   : > { %v5260_v35 = vadd.f32 %v5258_v52, %v5250_v11 }
0x3c1e   : > { %v5408_v37 = vpop.f32.mrb[54].mxu0 }
0x3c1f   : > { %7453 = vtanh.f32 %v5260_v35  ;;  %v5409_v40 = vadd.f32 %v5408_v37, %v8538_v2  ;;  %v6864_v5 = vpop.f32.mrb[55].mxu0  ;;  %v7212_v2 = vpack.c.bf16 %v786_v62, %v785_v10 }
0x3c26   : > { %v5579_v38 = vpop.f32.mrb[56].mxu0 }
0x3c27   : > { %v6886_v36 = vpop.f32.mrb[57].mxu0 }
0x3c29   : > { %v7454_v24 = vpop.eup %7453 }
0x3c2a   : > { %5263 = vrot.lane.b32.xlu1 %v7454_v24, %s7612_s14 }
0x3c9c   : > { %v5264_v39 = vpop.permute.xlu1 %5263 }
0x3c9d   : > { %v5266_v41 = vmul.f32 %v7452_v29, %v5264_v39 }
0x3c9f   : > { %5413 = vrot.lane.b32.xlu1 %v5266_v41, %s7613_s27 }
0x3d11   : > { %v5414_v21 = vpop.permute.xlu1 %5413 }
0x3d12   : > { %6874 = vmatmul.mubr.msk.f32.vlgmr.msra.gmra.mrb[54].mxu1 %vm820_vm5, %v5414_v21 }
0x3d13   : > { %7210 = vmatpush3.bf16.msra.mxu1 %v7209_v7  ;;  %6895 = vmatprep.mubr.msk.f32.mxu1 %vm7609_vm0, %v7610_v1 }
0x3d14   : > { %7211 = vmatprep.subr.bf16.mxu1 %v7608_v0 }
0x3d17   : > { %7213 = vmatpush3.bf16.msra.mxu1 %v7212_v2 }
0x3d1a   : > { %6896 = vmatmul.mubr.msk.f32.vlgmr.msra.gmra.mrb[56].mxu1 %vm820_vm5, %v5339_v58 }
0x3de5   : > { %v5483_v42 = vpop.f32.mrb[54].mxu1 }
0x3de6   : > { %v5487_v43 = vadd.f32 %v5483_v42, %v5409_v40  ;;  %v6875_v45 = vpop.f32.mrb[55].mxu1 }
0x3de8   : > { %v5488_v6 = vadd.f32 %v8394_v12, %v5487_v43 }
0x3dea   : > { %7455 = vtanh.f32 %v5488_v6  ;;  %v6050_v49 = vmul.f32 -1.442695, %v5488_v6 }
0x3ded   : > { %v5649_v46 = vpop.f32.mrb[56].mxu1 }
0x3dee   : > { %v5650_v28 = vadd.f32 %v5649_v46, %v5579_v38  ;;  %v6897_v48 = vpop.f32.mrb[57].mxu1 }
0x3df0   : > { %v5653_v1 = vadd.f32 %v5950_v61, %v5650_v28 }
0x3df2   : > { %7457 = vtanh.f32 %v5653_v1  ;;  %v6053_v12 = vmul.f32 -1.442695, %v5653_v1 }
0x3df3   : > { %7459 = vpow2.f32 %v6050_v49 }
0x3df4   : > { %v7456_v0 = vpop.eup %7455  ;;  %7461 = vpow2.f32 %v6053_v12 }
0x3df5   : > { %5498 = vrot.lane.b32.xlu0 %v7456_v0, %s7612_s14 }
0x3dfc   : > { %v7458_v17 = vpop.eup %7457 }
0x3dfd   : > { %5663 = vrot.lane.b32.xlu1 %v7458_v17, %s7612_s14  ;;  %v7460_v50 = vpop.eup %7459 }
0x3dfe   : > { %v5492_v53 = vadd.f32 1.0, %v7460_v50  ;;  %v7462_v54 = vpop.eup %7461 }
0x3dff   : > { %v5657_v55 = vadd.f32 1.0, %v7462_v54 }
0x3e00   : > { %7463 = vrcp.f32 %v5492_v53 }
0x3e01   : > { %7465 = vrcp.f32 %v5657_v55 }
0x3e0a   : > { %v7464_v60 = vpop.eup %7463 }
0x3e0b   : > { %v7466_v63 = vpop.eup %7465  ;;  %v5496_v57 = vmul.f32 %v7464_v60, %v5260_v35 }
0x3e0c   : > { %v5661_v9 = vmul.f32 0.0, %v7466_v63 }
0x3e67   : > { %v5499_v59 = vpop.permute.xlu0 %5498 }
0x3e68   : > { %v5501_v13 = vmul.f32 %v7464_v60, %v5499_v59 }
0x3e6a   : > { %5503 = vrot.lane.b32.xlu0 %v5501_v13, %s7613_s27 }
0x3e6f   : > { %v5664_v3 = vpop.permute.xlu1 %5663 }
0x3e70   : > { %v5666_v8 = vmul.f32 %v7466_v63, %v5664_v3 }
0x3e72   : > { %5668 = vrot.lane.b32.xlu1 %v5666_v8, %s7613_s27 }
0x3edc   : > { %v5504_v34 = vpop.permute.xlu0 %5503 }
0x3edd   : > { %v5506_v51 = vadd.f32 %v5504_v34, %v5496_v57 }
0x3edf   : > { %7467 = vtanh.f32 %v5506_v51 }
0x3ee4   : > { %v5669_v31 = vpop.permute.xlu1 %5668 }
0x3ee5   : > { %v5671_v47 = vadd.f32 %v5669_v31, %v5661_v9 }
0x3ee7   : > { %7469 = vtanh.f32 %v5671_v47 }
0x3ee9   : > { %v7468_v44 = vpop.eup %7467 }
0x3eea   : > { %5509 = vrot.lane.b32.xlu0 %v7468_v44, %s7612_s14 }
0x3ef1   : > { %v7470_v15 = vpop.eup %7469 }
0x3ef2   : > { %5674 = vrot.lane.b32.xlu1 %v7470_v15, %s7612_s14 }
0x3f5c   : > { %v5510_v16 = vpop.permute.xlu0 %5509 }
0x3f5d   : > { %v5512_v4 = vmul.f32 %v7464_v60, %v5510_v16 }
0x3f5f   : > { %5679 = vrot.lane.b32.xlu0 %v5512_v4, %s7613_s27 }
0x3f64   : > { %v5675_v30 = vpop.permute.xlu1 %5674 }
0x3f65   : > { %v5677_v18 = vmul.f32 %v7466_v63, %v5675_v30 }
0x3f67   : > { %5683 = vrot.lane.b32.xlu1 %v5677_v18, %s7612_s14 }
0x3fd1   : > { %v5680_v19 = vpop.permute.xlu0 %5679 }
0x3fd9   : > { %v5684_v20 = vpop.permute.xlu1 %5683 }
0x3fda   : > { %v5686_v22 = vsel %vm820_vm5, %v5680_v19, %v5684_v20 }
0x3fdb   : > { %5688 = vst.msk [vmem:[%s758_s21] sm:$0x3] %vm5687_vm6, %v5686_v22 }
0x3fdc PF: > { %s8668_s16 = sld [smem:[#allocation10_spill]]  ;;  %s8669_s9 = sld [smem:[#allocation9_spill]] }
0x3fdd   : > { %s8670_s15 = sld [smem:[#allocation11_spill]]  ;;  %s8671_s29 = smov %s7593_s30 }
0x3fe2   : > { %p27_p13 = scmp.ge.s32.totalorder %s8668_s16, 4   ;;  %s8672_s30 = smov %s8669_s9 }
0x3fe4   :  { %29 = sbr.rel (!%p27_p13) target bundleno = 11 (0xb), region = 180 }
0x3feb   :  { %5708 = vsyncpa [#allocation3], 1 }
0x3fec   :  { %5710 = vsyncpa [#allocation3 + $0x1], 1 }
0x3fed   :  { %5711 = vsyncpa [#allocation5], 1 }
0x3fee   :  { %5713 = vsyncpa [#allocation5 + $0x1], 1 }

</bundles_post_ra>
